<compile_context>
chip_gen: v7x
topology: tpu7x:2x2x1
jax: 0.10.0
libtpu: 0.0.40
codegen_flags: <defaults>
</compile_context>

<pallas_src>
import numpy as np

import jax
import jax.numpy as jnp
from jax.experimental import pallas as pl
from jax.experimental.pallas import tpu as pltpu


# ----------------------------- in-kernel helpers -----------------------------

def _elu(v):
    # nn.ELU(alpha=1.0); clamp the exp argument so the unselected branch never
    # produces inf intermediates.
    return jnp.where(v > 0, v, jnp.exp(jnp.minimum(v, 0.0)) - 1.0)


def _sigmoid(v):
    # sigmoid via the EUP reciprocal (free slot next to VALU work).
    return pl.reciprocal(1.0 + jnp.exp(-jnp.maximum(v, -30.0)), approx=True)


def _row_conv(x, tp_ref, tn_ref, b_ref):
    """One ZeroPad2d+Conv2d(kh,kw) acting on CELU(x), as kh row-level matmuls.

    x:      (B, H, W*C) f32, pre-activation, lane-dense flat layout.
    tp/tn:  (kh, W*C, Nout) bf16 row-matmul weights for the elu(x) / elu(-x)
            halves of the concatenated ELU (W padding folded in at setup).
    b_ref:  (1, Nout) f32 flat bias.
    Returns (B, H, Nout) f32.
    """
    b, h, wc = x.shape
    kh = tp_ref.shape[0]
    nout = tp_ref.shape[-1]
    # Pad kh-1 zero rows on top (the ZeroPad2d top padding), activate once.
    p = jnp.concatenate([jnp.zeros((b, kh - 1, wc), x.dtype), x], axis=1)
    a_pos = _elu(p).astype(jnp.bfloat16)
    a_neg = _elu(-p).astype(jnp.bfloat16)
    acc = jnp.zeros((b * h, nout), jnp.float32)
    for di in range(kh):
        lhs_p = a_pos[:, di:di + h, :].reshape(b * h, wc)
        lhs_n = a_neg[:, di:di + h, :].reshape(b * h, wc)
        acc = acc + jnp.dot(lhs_p, tp_ref[di], preferred_element_type=jnp.float32)
        acc = acc + jnp.dot(lhs_n, tn_ref[di], preferred_element_type=jnp.float32)
    return (acc + b_ref[...]).reshape(b, h, nout)


# --------------------------------- the kernel --------------------------------

def _double_res_kernel(xv_ref, xh_ref,
                       t1vp_ref, t1vn_ref, b1v_ref,
                       t2vp_ref, t2vn_ref, b2v_ref,
                       t1hp_ref, t1hn_ref, b1h_ref,
                       t2hp_ref, t2hn_ref, b2h_ref,
                       tlp_ref, tln_ref,
                       yv_ref, yh_ref):
    xv = xv_ref[...].astype(jnp.float32)        # (B, H, W*C) lane-dense
    xh = xh_ref[...].astype(jnp.float32)
    b, h, wc = xv.shape

    # ---- vertical ResConvBlock: conv(2,3) -> conv(2,3) -> gate -> +residual ----
    o1 = _row_conv(xv, t1vp_ref, t1vn_ref, b1v_ref)             # (B, H, WC)
    # TODO(synk): nn.Dropout implemented as eval-mode identity (no stochastic mask).
    o2 = _row_conv(o1, t2vp_ref, t2vn_ref, b2v_ref)             # (B, H, 2*WC) = [x1 | gate]
    yv = o2[..., :wc] * _sigmoid(o2[..., wc:]) + xv             # GatedActivation + residual
    yv_ref[...] = yv.astype(yv_ref.dtype)

    # ---- horizontal ResConvBlock: conv(2,2) + link(yv) -> conv(2,2) -> gate ----
    o1h = _row_conv(xh, t1hp_ref, t1hn_ref, b1h_ref)            # bias already includes link bias
    lp = _elu(yv).astype(jnp.bfloat16).reshape(b * h, wc)
    ln = _elu(-yv).astype(jnp.bfloat16).reshape(b * h, wc)
    link = (jnp.dot(lp, tlp_ref[...], preferred_element_type=jnp.float32)
            + jnp.dot(ln, tln_ref[...], preferred_element_type=jnp.float32))
    o1h = o1h + link.reshape(b, h, wc)
    o2h = _row_conv(o1h, t2hp_ref, t2hn_ref, b2h_ref)           # (B, H, 2*WC)
    yh = o2h[..., :wc] * _sigmoid(o2h[..., wc:]) + xh
    yh_ref[...] = yh.astype(yh_ref.dtype)


# --------------------------------- wrapper ------------------------------------

_WEIGHT_KEYS = ("t1vp", "t1vn", "b1v", "t2vp", "t2vn", "b2v",
                "t1hp", "t1hn", "b1h", "t2hp", "t2hn", "b2h",
                "tlp", "tln")


def _pick_batch_tile(n):
    """Largest batch tile that still leaves >=2 grid steps (both v7x TCs busy)."""
    if n < 2:
        return 1
    for b in range(n // 2, 0, -1):
        if n % b == 0:
            return b
    return 1


def double_res_conv_block(x_v, x_h, packed, *, batch_tile=None):
    N, H, W, C = x_v.shape
    wc = W * C
    if batch_tile is None:
        batch_tile = _pick_batch_tile(N)
    assert N % batch_tile == 0
    steps = N // batch_tile

    # Lane-dense HBM view: (N, H, W*C) is the same contiguous buffer, free reshape.
    xvf = x_v.reshape(N, H, wc)
    xhf = x_h.reshape(N, H, wc)
    weights = [packed[k] for k in _WEIGHT_KEYS]

    x_spec = pl.BlockSpec((batch_tile, H, wc), lambda n: (n, 0, 0))

    def w_spec(a):
        # Grid-invariant full-array block: DMA'd once, revisited across steps.
        # (pl.Buffered(1) would halve the weight VMEM if C grows; default is fine here.)
        return pl.BlockSpec(a.shape, lambda n, _r=a.ndim: (0,) * _r)

    yv, yh = pl.pallas_call(
        _double_res_kernel,
        out_shape=(jax.ShapeDtypeStruct((N, H, wc), x_v.dtype),
                   jax.ShapeDtypeStruct((N, H, wc), x_h.dtype)),
        grid_spec=pltpu.PrefetchScalarGridSpec(
            num_scalar_prefetch=0,
            grid=(steps,),
            in_specs=[x_spec, x_spec] + [w_spec(w) for w in weights],
            out_specs=[x_spec, x_spec]),
        compiler_params=pltpu.CompilerParams(
            dimension_semantics=("parallel",),
            vmem_limit_bytes=32 * 1024 * 1024),
    )(xvf, xhf, *weights)

    return yv.reshape(N, H, W, C), yh.reshape(N, H, W, C)


# -------------------------- parameters (deterministic) ------------------------

def _wn_conv(key, cout, cin, kh, kw):
    """Weight-normed Conv2d params: effective weight = g * v / ||v|| (per out-ch)."""
    kv, kg, kb = jax.random.split(key, 3)
    v = 0.05 * jax.random.normal(kv, (cout, cin, kh, kw), jnp.float32)      # OIHW
    g = 1.0 + 0.1 * jax.random.normal(kg, (cout,), jnp.float32)
    norm = jnp.sqrt(jnp.sum(v * v, axis=(1, 2, 3), keepdims=True))
    w = g[:, None, None, None] * v / norm
    b = 0.01 * jax.random.normal(kb, (1, cout), jnp.float32)
    return jnp.transpose(w, (2, 3, 1, 0)), b                                # HWIO


def init_params(key, C):
    keys = jax.random.split(key, 5)
    w1v, b1v = _wn_conv(keys[0], C, 2 * C, 2, 3)       # vertical conv1
    w2v, b2v = _wn_conv(keys[1], 2 * C, 2 * C, 2, 3)   # vertical conv2
    w1h, b1h = _wn_conv(keys[2], C, 2 * C, 2, 2)       # horizontal conv1
    w2h, b2h = _wn_conv(keys[3], 2 * C, 2 * C, 2, 2)   # horizontal conv2
    wl4, bl = _wn_conv(keys[4], C, 2 * C, 1, 1)        # horizontal link (1x1)
    wl = wl4.reshape(2 * C, C)
    return dict(w1v=w1v, b1v=b1v, w2v=w2v, b2v=b2v,
                w1h=w1h, b1h=b1h, wl=wl, bl=bl, w2h=w2h, b2h=b2h)


# ---------------- kernel-side weight packing (plain JAX / numpy, once) ----------

def _row_weights(w_hwio, W, pad_left, gated):
    """Fold a (kh,kw) conv acting on concat([elu(x), elu(-x)]) into kh row-level
    matmuls.  Returns bf16 (kh, W*C, W*Cout) matrices T_pos / T_neg multiplying
    the flat elu(x) / elu(-x) rows; W zero padding is folded in by dropping
    out-of-range taps.  If `gated`, output columns are permuted to
    [x1 block | gate block] so the gated activation is a plain lane slice."""
    w = np.asarray(w_hwio, np.float32)
    kh, kw, cin2, cout = w.shape
    C = cin2 // 2
    t_pos = np.zeros((kh, W * C, W * cout), np.float32)
    t_neg = np.zeros((kh, W * C, W * cout), np.float32)
    half = cout // 2
    for di in range(kh):
        for wo in range(W):
            for dj in range(kw):
                wi = wo + dj - pad_left
                if not 0 <= wi < W:
                    continue
                rows = slice(wi * C, (wi + 1) * C)
                if gated:
                    c0 = slice(wo * half, (wo + 1) * half)
                    c1 = slice(W * half + wo * half, W * half + (wo + 1) * half)
                    t_pos[di, rows, c0] = w[di, dj, :C, :half]
                    t_pos[di, rows, c1] = w[di, dj, :C, half:]
                    t_neg[di, rows, c0] = w[di, dj, C:, :half]
                    t_neg[di, rows, c1] = w[di, dj, C:, half:]
                else:
                    cols = slice(wo * cout, (wo + 1) * cout)
                    t_pos[di, rows, cols] = w[di, dj, :C, :]
                    t_neg[di, rows, cols] = w[di, dj, C:, :]
    return jnp.asarray(t_pos, jnp.bfloat16), jnp.asarray(t_neg, jnp.bfloat16)


def _link_weights(wl, W):
    """1x1 link conv on celu(yv) as block-diagonal (W*C, W*C) row matmuls."""
    wl = np.asarray(wl, np.float32)
    C = wl.shape[1]
    tp = np.zeros((W * C, W * C), np.float32)
    tn = np.zeros((W * C, W * C), np.float32)
    for w in range(W):
        blk = slice(w * C, (w + 1) * C)
        tp[blk, blk] = wl[:C]
        tn[blk, blk] = wl[C:]
    return jnp.asarray(tp, jnp.bfloat16), jnp.asarray(tn, jnp.bfloat16)


def _bias_flat(b, W, gated):
    b = np.asarray(b, np.float32).reshape(-1)
    if gated:
        C = b.shape[0] // 2
        flat = np.concatenate([np.tile(b[:C], W), np.tile(b[C:], W)])
    else:
        flat = np.tile(b, W)
    return jnp.asarray(flat, jnp.float32)[None, :]


def pack_params(params, W):
    t1vp, t1vn = _row_weights(params["w1v"], W, pad_left=1, gated=False)
    t2vp, t2vn = _row_weights(params["w2v"], W, pad_left=1, gated=True)
    t1hp, t1hn = _row_weights(params["w1h"], W, pad_left=1, gated=False)
    t2hp, t2hn = _row_weights(params["w2h"], W, pad_left=1, gated=True)
    tlp, tln = _link_weights(params["wl"], W)
    b1v = _bias_flat(params["b1v"], W, gated=False)
    b2v = _bias_flat(params["b2v"], W, gated=True)
    # Fold the link conv's bias into the horizontal conv1 bias (both add to o1h).
    b1h = _bias_flat(params["b1h"], W, gated=False) + _bias_flat(params["bl"], W, gated=False)
    b2h = _bias_flat(params["b2h"], W, gated=True)
    return dict(t1vp=t1vp, t1vn=t1vn, b1v=b1v, t2vp=t2vp, t2vn=t2vn, b2v=b2v,
                t1hp=t1hp, t1hn=t1hn, b1h=b1h, t2hp=t2hp, t2hn=t2hn, b2h=b2h,
                tlp=tlp, tln=tln)


# ----------------------------- pure-JAX reference -----------------------------

def _ref_conv(x, w, b, pad):  # pad = (top, bottom, left, right)
    top, bottom, left, right = pad
    xp = jnp.pad(x, ((0, 0), (top, bottom), (left, right), (0, 0)))
    y = jax.lax.conv_general_dilated(
        xp, w, (1, 1), "VALID", dimension_numbers=("NHWC", "HWIO", "NHWC"))
    return y + b.reshape(1, 1, 1, -1)


def _ref_celu(x):
    return jnp.concatenate([_elu(x), _elu(-x)], axis=-1)


def reference(x_v, x_h, p):
    C = x_v.shape[-1]
    o1 = _ref_conv(_ref_celu(x_v), p["w1v"], p["b1v"], (1, 0, 1, 1))
    o2 = _ref_conv(_ref_celu(o1), p["w2v"], p["b2v"], (1, 0, 1, 1))
    yv = o2[..., :C] * jax.nn.sigmoid(o2[..., C:]) + x_v

    o1h = _ref_conv(_ref_celu(x_h), p["w1h"], p["b1h"], (1, 0, 1, 0))
    link = jnp.einsum("nhwi,io->nhwo", _ref_celu(yv), p["wl"]) \
        + p["bl"].reshape(1, 1, 1, -1)
    o1h = o1h + link
    o2h = _ref_conv(_ref_celu(o1h), p["w2h"], p["b2h"], (1, 0, 1, 0))
    yh = o2h[..., :C] * jax.nn.sigmoid(o2h[..., C:]) + x_h
    return yv, yh


# ----------------------------------- main --------------------------------------

if __name__ == "__main__":
    key = jax.random.PRNGKey(0)
    k_xv, k_xh, k_p = jax.random.split(key, 3)
    # NHWC (torch-equivalent NCHW: (4, 32, 8, 8)); batch tiled 2-per-step -> 2 grid steps.
    N, H, W, C = 4, 8, 8, 32
    x_v = jax.random.normal(k_xv, (N, H, W, C), jnp.float32)
    x_h = jax.random.normal(k_xh, (N, H, W, C), jnp.float32)
    params = init_params(k_p, C)
    packed = pack_params(params, W)

    y_v, y_h = double_res_conv_block(x_v, x_h, packed)
    jax.block_until_ready((y_v, y_h))

    rv, rh = reference(x_v, x_h, params)
    assert y_v.shape == (N, H, W, C) and y_h.shape == (N, H, W, C)
    # bf16 MXU operands (f32 accumulate) -> slightly looser tolerance than pure f32.
    assert jnp.allclose(y_v, rv, atol=2e-2, rtol=2e-2), float(jnp.max(jnp.abs(y_v - rv)))
    assert jnp.allclose(y_h, rh, atol=2e-2, rtol=2e-2), float(jnp.max(jnp.abs(y_h - rh)))
    print("KERNEL_OK")
</pallas_src>

<mosaic_0001>
module attributes {stable_mosaic.version = 11 : i64} {
  func.func @_double_res_kernel(%arg0: i32, %arg1: memref<2x8x256xf32, #tpu.memory_space<vmem>>, %arg2: memref<2x8x256xf32, #tpu.memory_space<vmem>>, %arg3: memref<2x256x256xbf16, #tpu.memory_space<vmem>>, %arg4: memref<2x256x256xbf16, #tpu.memory_space<vmem>>, %arg5: memref<1x256xf32, #tpu.memory_space<vmem>>, %arg6: memref<2x256x512xbf16, #tpu.memory_space<vmem>>, %arg7: memref<2x256x512xbf16, #tpu.memory_space<vmem>>, %arg8: memref<1x512xf32, #tpu.memory_space<vmem>>, %arg9: memref<2x256x256xbf16, #tpu.memory_space<vmem>>, %arg10: memref<2x256x256xbf16, #tpu.memory_space<vmem>>, %arg11: memref<1x256xf32, #tpu.memory_space<vmem>>, %arg12: memref<2x256x512xbf16, #tpu.memory_space<vmem>>, %arg13: memref<2x256x512xbf16, #tpu.memory_space<vmem>>, %arg14: memref<1x512xf32, #tpu.memory_space<vmem>>, %arg15: memref<256x256xbf16, #tpu.memory_space<vmem>>, %arg16: memref<256x256xbf16, #tpu.memory_space<vmem>>, %arg17: memref<2x8x256xf32, #tpu.memory_space<vmem>>, %arg18: memref<2x8x256xf32, #tpu.memory_space<vmem>>) attributes {dimension_semantics = [#tpu.dimension_semantics<parallel>], iteration_bounds = array<i64: 2>, scalar_prefetch = 0 : i64, scratch_operands = 0 : i64, tpu.core_type = #tpu.core_type<tc>, window_params = [{transform_indices = @transform_0, window_bounds = array<i64: 2, 8, 256>}, {transform_indices = @transform_1, window_bounds = array<i64: 2, 8, 256>}, {pipeline_mode = #tpu.pipeline_mode<synchronous>, transform_indices = @transform_2, window_bounds = array<i64: 2, 256, 256>}, {pipeline_mode = #tpu.pipeline_mode<synchronous>, transform_indices = @transform_3, window_bounds = array<i64: 2, 256, 256>}, {pipeline_mode = #tpu.pipeline_mode<synchronous>, transform_indices = @transform_4, window_bounds = array<i64: 1, 256>}, {pipeline_mode = #tpu.pipeline_mode<synchronous>, transform_indices = @transform_5, window_bounds = array<i64: 2, 256, 512>}, {pipeline_mode = #tpu.pipeline_mode<synchronous>, transform_indices = @transform_6, window_bounds = array<i64: 2, 256, 512>}, {pipeline_mode = #tpu.pipeline_mode<synchronous>, transform_indices = @transform_7, window_bounds = array<i64: 1, 512>}, {pipeline_mode = #tpu.pipeline_mode<synchronous>, transform_indices = @transform_8, window_bounds = array<i64: 2, 256, 256>}, {pipeline_mode = #tpu.pipeline_mode<synchronous>, transform_indices = @transform_9, window_bounds = array<i64: 2, 256, 256>}, {pipeline_mode = #tpu.pipeline_mode<synchronous>, transform_indices = @transform_10, window_bounds = array<i64: 1, 256>}, {pipeline_mode = #tpu.pipeline_mode<synchronous>, transform_indices = @transform_11, window_bounds = array<i64: 2, 256, 512>}, {pipeline_mode = #tpu.pipeline_mode<synchronous>, transform_indices = @transform_12, window_bounds = array<i64: 2, 256, 512>}, {pipeline_mode = #tpu.pipeline_mode<synchronous>, transform_indices = @transform_13, window_bounds = array<i64: 1, 512>}, {pipeline_mode = #tpu.pipeline_mode<synchronous>, transform_indices = @transform_14, window_bounds = array<i64: 256, 256>}, {pipeline_mode = #tpu.pipeline_mode<synchronous>, transform_indices = @transform_15, window_bounds = array<i64: 256, 256>}, {transform_indices = @transform_16, window_bounds = array<i64: 2, 8, 256>}, {transform_indices = @transform_17, window_bounds = array<i64: 2, 8, 256>}]} {
    %c0 = arith.constant 0 : index
    %c0_0 = arith.constant 0 : index
    %c0_1 = arith.constant 0 : index
    %0 = vector.load %arg1[%c0, %c0_0, %c0_1] : memref<2x8x256xf32, #tpu.memory_space<vmem>>, vector<2x8x256xf32>
    %c0_2 = arith.constant 0 : index
    %c0_3 = arith.constant 0 : index
    %c0_4 = arith.constant 0 : index
    %1 = vector.load %arg2[%c0_2, %c0_3, %c0_4] : memref<2x8x256xf32, #tpu.memory_space<vmem>>, vector<2x8x256xf32>
    %cst = arith.constant 0.000000e+00 : f32
    %2 = vector.broadcast %cst : f32 to vector<2x1x256xf32>
    %3 = tpu.concatenate %2, %0 in 1 : vector<2x1x256xf32>, vector<2x8x256xf32> -> vector<2x9x256xf32>
    %cst_5 = arith.constant 0.000000e+00 : f32
    %4 = vector.broadcast %cst_5 : f32 to vector<2x9x256xf32>
    %5 = arith.cmpf ogt, %3, %4 : vector<2x9x256xf32>
    %cst_6 = arith.constant 0.000000e+00 : f32
    %6 = vector.broadcast %cst_6 : f32 to vector<2x9x256xf32>
    %7 = arith.minimumf %3, %6 : vector<2x9x256xf32>
    %8 = math.exp %7 : vector<2x9x256xf32>
    %cst_7 = arith.constant 1.000000e+00 : f32
    %9 = vector.broadcast %cst_7 : f32 to vector<2x9x256xf32>
    %10 = arith.subf %8, %9 : vector<2x9x256xf32>
    %11 = arith.select %5, %3, %10 : vector<2x9x256xi1>, vector<2x9x256xf32>
    %12 = arith.truncf %11 : vector<2x9x256xf32> to vector<2x9x256xbf16>
    %cst_8 = arith.constant 0.000000e+00 : f32
    %13 = vector.broadcast %cst_8 : f32 to vector<2x9x256xf32>
    %14 = arith.subf %13, %3 : vector<2x9x256xf32>
    %cst_9 = arith.constant 0.000000e+00 : f32
    %15 = vector.broadcast %cst_9 : f32 to vector<2x9x256xf32>
    %16 = arith.cmpf ogt, %14, %15 : vector<2x9x256xf32>
    %cst_10 = arith.constant 0.000000e+00 : f32
    %17 = vector.broadcast %cst_10 : f32 to vector<2x9x256xf32>
    %18 = arith.minimumf %14, %17 : vector<2x9x256xf32>
    %19 = math.exp %18 : vector<2x9x256xf32>
    %cst_11 = arith.constant 1.000000e+00 : f32
    %20 = vector.broadcast %cst_11 : f32 to vector<2x9x256xf32>
    %21 = arith.subf %19, %20 : vector<2x9x256xf32>
    %22 = arith.select %16, %14, %21 : vector<2x9x256xi1>, vector<2x9x256xf32>
    %23 = arith.truncf %22 : vector<2x9x256xf32> to vector<2x9x256xbf16>
    %cst_12 = arith.constant 0.000000e+00 : f32
    %24 = vector.broadcast %cst_12 : f32 to vector<16x256xf32>
    %25 = vector.extract_strided_slice %12 {offsets = [0, 0, 0], sizes = [2, 8, 256], strides = [1, 1, 1]} : vector<2x9x256xbf16> to vector<2x8x256xbf16>
    %26 = vector.shape_cast %25 : vector<2x8x256xbf16> to vector<16x256xbf16>
    %27 = vector.extract_strided_slice %23 {offsets = [0, 0, 0], sizes = [2, 8, 256], strides = [1, 1, 1]} : vector<2x9x256xbf16> to vector<2x8x256xbf16>
    %28 = vector.shape_cast %27 : vector<2x8x256xbf16> to vector<16x256xbf16>
    %c0_13 = arith.constant 0 : index
    %c0_14 = arith.constant 0 : index
    %c0_15 = arith.constant 0 : index
    %29 = vector.load %arg3[%c0_13, %c0_14, %c0_15] : memref<2x256x256xbf16, #tpu.memory_space<vmem>>, vector<1x256x256xbf16>
    %30 = vector.shape_cast %29 : vector<1x256x256xbf16> to vector<256x256xbf16>
    %cst_16 = arith.constant dense<0.000000e+00> : vector<16x256xf32>
    %31 = tpu.matmul %26, %30, %cst_16 {dimension_numbers = #tpu.dot_dimension_numbers<[1], [0], [0], [1], [0, 0, 1, 1], [], []>} : vector<16x256xbf16>, vector<256x256xbf16>, vector<16x256xf32> -> vector<16x256xf32>
    %32 = arith.addf %24, %31 : vector<16x256xf32>
    %c0_17 = arith.constant 0 : index
    %c0_18 = arith.constant 0 : index
    %c0_19 = arith.constant 0 : index
    %33 = vector.load %arg4[%c0_17, %c0_18, %c0_19] : memref<2x256x256xbf16, #tpu.memory_space<vmem>>, vector<1x256x256xbf16>
    %34 = vector.shape_cast %33 : vector<1x256x256xbf16> to vector<256x256xbf16>
    %cst_20 = arith.constant dense<0.000000e+00> : vector<16x256xf32>
    %35 = tpu.matmul %28, %34, %cst_20 {dimension_numbers = #tpu.dot_dimension_numbers<[1], [0], [0], [1], [0, 0, 1, 1], [], []>} : vector<16x256xbf16>, vector<256x256xbf16>, vector<16x256xf32> -> vector<16x256xf32>
    %36 = arith.addf %32, %35 : vector<16x256xf32>
    %37 = vector.extract_strided_slice %12 {offsets = [0, 1, 0], sizes = [2, 8, 256], strides = [1, 1, 1]} : vector<2x9x256xbf16> to vector<2x8x256xbf16>
    %38 = vector.shape_cast %37 : vector<2x8x256xbf16> to vector<16x256xbf16>
    %39 = vector.extract_strided_slice %23 {offsets = [0, 1, 0], sizes = [2, 8, 256], strides = [1, 1, 1]} : vector<2x9x256xbf16> to vector<2x8x256xbf16>
    %40 = vector.shape_cast %39 : vector<2x8x256xbf16> to vector<16x256xbf16>
    %c1 = arith.constant 1 : index
    %c0_21 = arith.constant 0 : index
    %c0_22 = arith.constant 0 : index
    %41 = vector.load %arg3[%c1, %c0_21, %c0_22] : memref<2x256x256xbf16, #tpu.memory_space<vmem>>, vector<1x256x256xbf16>
    %42 = vector.shape_cast %41 : vector<1x256x256xbf16> to vector<256x256xbf16>
    %cst_23 = arith.constant dense<0.000000e+00> : vector<16x256xf32>
    %43 = tpu.matmul %38, %42, %cst_23 {dimension_numbers = #tpu.dot_dimension_numbers<[1], [0], [0], [1], [0, 0, 1, 1], [], []>} : vector<16x256xbf16>, vector<256x256xbf16>, vector<16x256xf32> -> vector<16x256xf32>
    %44 = arith.addf %36, %43 : vector<16x256xf32>
    %c1_24 = arith.constant 1 : index
    %c0_25 = arith.constant 0 : index
    %c0_26 = arith.constant 0 : index
    %45 = vector.load %arg4[%c1_24, %c0_25, %c0_26] : memref<2x256x256xbf16, #tpu.memory_space<vmem>>, vector<1x256x256xbf16>
    %46 = vector.shape_cast %45 : vector<1x256x256xbf16> to vector<256x256xbf16>
    %cst_27 = arith.constant dense<0.000000e+00> : vector<16x256xf32>
    %47 = tpu.matmul %40, %46, %cst_27 {dimension_numbers = #tpu.dot_dimension_numbers<[1], [0], [0], [1], [0, 0, 1, 1], [], []>} : vector<16x256xbf16>, vector<256x256xbf16>, vector<16x256xf32> -> vector<16x256xf32>
    %48 = arith.addf %44, %47 : vector<16x256xf32>
    %c0_28 = arith.constant 0 : index
    %c0_29 = arith.constant 0 : index
    %49 = vector.load %arg5[%c0_28, %c0_29] : memref<1x256xf32, #tpu.memory_space<vmem>>, vector<1x256xf32>
    %50 = vector.broadcast %49 : vector<1x256xf32> to vector<16x256xf32>
    %51 = arith.addf %48, %50 : vector<16x256xf32>
    %52 = vector.shape_cast %51 : vector<16x256xf32> to vector<2x8x256xf32>
    %cst_30 = arith.constant 0.000000e+00 : f32
    %53 = vector.broadcast %cst_30 : f32 to vector<2x1x256xf32>
    %54 = tpu.concatenate %53, %52 in 1 : vector<2x1x256xf32>, vector<2x8x256xf32> -> vector<2x9x256xf32>
    %cst_31 = arith.constant 0.000000e+00 : f32
    %55 = vector.broadcast %cst_31 : f32 to vector<2x9x256xf32>
    %56 = arith.cmpf ogt, %54, %55 : vector<2x9x256xf32>
    %cst_32 = arith.constant 0.000000e+00 : f32
    %57 = vector.broadcast %cst_32 : f32 to vector<2x9x256xf32>
    %58 = arith.minimumf %54, %57 : vector<2x9x256xf32>
    %59 = math.exp %58 : vector<2x9x256xf32>
    %cst_33 = arith.constant 1.000000e+00 : f32
    %60 = vector.broadcast %cst_33 : f32 to vector<2x9x256xf32>
    %61 = arith.subf %59, %60 : vector<2x9x256xf32>
    %62 = arith.select %56, %54, %61 : vector<2x9x256xi1>, vector<2x9x256xf32>
    %63 = arith.truncf %62 : vector<2x9x256xf32> to vector<2x9x256xbf16>
    %cst_34 = arith.constant 0.000000e+00 : f32
    %64 = vector.broadcast %cst_34 : f32 to vector<2x9x256xf32>
    %65 = arith.subf %64, %54 : vector<2x9x256xf32>
    %cst_35 = arith.constant 0.000000e+00 : f32
    %66 = vector.broadcast %cst_35 : f32 to vector<2x9x256xf32>
    %67 = arith.cmpf ogt, %65, %66 : vector<2x9x256xf32>
    %cst_36 = arith.constant 0.000000e+00 : f32
    %68 = vector.broadcast %cst_36 : f32 to vector<2x9x256xf32>
    %69 = arith.minimumf %65, %68 : vector<2x9x256xf32>
    %70 = math.exp %69 : vector<2x9x256xf32>
    %cst_37 = arith.constant 1.000000e+00 : f32
    %71 = vector.broadcast %cst_37 : f32 to vector<2x9x256xf32>
    %72 = arith.subf %70, %71 : vector<2x9x256xf32>
    %73 = arith.select %67, %65, %72 : vector<2x9x256xi1>, vector<2x9x256xf32>
    %74 = arith.truncf %73 : vector<2x9x256xf32> to vector<2x9x256xbf16>
    %cst_38 = arith.constant 0.000000e+00 : f32
    %75 = vector.broadcast %cst_38 : f32 to vector<16x512xf32>
    %76 = vector.extract_strided_slice %63 {offsets = [0, 0, 0], sizes = [2, 8, 256], strides = [1, 1, 1]} : vector<2x9x256xbf16> to vector<2x8x256xbf16>
    %77 = vector.shape_cast %76 : vector<2x8x256xbf16> to vector<16x256xbf16>
    %78 = vector.extract_strided_slice %74 {offsets = [0, 0, 0], sizes = [2, 8, 256], strides = [1, 1, 1]} : vector<2x9x256xbf16> to vector<2x8x256xbf16>
    %79 = vector.shape_cast %78 : vector<2x8x256xbf16> to vector<16x256xbf16>
    %c0_39 = arith.constant 0 : index
    %c0_40 = arith.constant 0 : index
    %c0_41 = arith.constant 0 : index
    %80 = vector.load %arg6[%c0_39, %c0_40, %c0_41] : memref<2x256x512xbf16, #tpu.memory_space<vmem>>, vector<1x256x512xbf16>
    %81 = vector.shape_cast %80 : vector<1x256x512xbf16> to vector<256x512xbf16>
    %cst_42 = arith.constant dense<0.000000e+00> : vector<16x512xf32>
    %82 = tpu.matmul %77, %81, %cst_42 {dimension_numbers = #tpu.dot_dimension_numbers<[1], [0], [0], [1], [0, 0, 1, 1], [], []>} : vector<16x256xbf16>, vector<256x512xbf16>, vector<16x512xf32> -> vector<16x512xf32>
    %83 = arith.addf %75, %82 : vector<16x512xf32>
    %c0_43 = arith.constant 0 : index
    %c0_44 = arith.constant 0 : index
    %c0_45 = arith.constant 0 : index
    %84 = vector.load %arg7[%c0_43, %c0_44, %c0_45] : memref<2x256x512xbf16, #tpu.memory_space<vmem>>, vector<1x256x512xbf16>
    %85 = vector.shape_cast %84 : vector<1x256x512xbf16> to vector<256x512xbf16>
    %cst_46 = arith.constant dense<0.000000e+00> : vector<16x512xf32>
    %86 = tpu.matmul %79, %85, %cst_46 {dimension_numbers = #tpu.dot_dimension_numbers<[1], [0], [0], [1], [0, 0, 1, 1], [], []>} : vector<16x256xbf16>, vector<256x512xbf16>, vector<16x512xf32> -> vector<16x512xf32>
    %87 = arith.addf %83, %86 : vector<16x512xf32>
    %88 = vector.extract_strided_slice %63 {offsets = [0, 1, 0], sizes = [2, 8, 256], strides = [1, 1, 1]} : vector<2x9x256xbf16> to vector<2x8x256xbf16>
    %89 = vector.shape_cast %88 : vector<2x8x256xbf16> to vector<16x256xbf16>
    %90 = vector.extract_strided_slice %74 {offsets = [0, 1, 0], sizes = [2, 8, 256], strides = [1, 1, 1]} : vector<2x9x256xbf16> to vector<2x8x256xbf16>
    %91 = vector.shape_cast %90 : vector<2x8x256xbf16> to vector<16x256xbf16>
    %c1_47 = arith.constant 1 : index
    %c0_48 = arith.constant 0 : index
    %c0_49 = arith.constant 0 : index
    %92 = vector.load %arg6[%c1_47, %c0_48, %c0_49] : memref<2x256x512xbf16, #tpu.memory_space<vmem>>, vector<1x256x512xbf16>
    %93 = vector.shape_cast %92 : vector<1x256x512xbf16> to vector<256x512xbf16>
    %cst_50 = arith.constant dense<0.000000e+00> : vector<16x512xf32>
    %94 = tpu.matmul %89, %93, %cst_50 {dimension_numbers = #tpu.dot_dimension_numbers<[1], [0], [0], [1], [0, 0, 1, 1], [], []>} : vector<16x256xbf16>, vector<256x512xbf16>, vector<16x512xf32> -> vector<16x512xf32>
    %95 = arith.addf %87, %94 : vector<16x512xf32>
    %c1_51 = arith.constant 1 : index
    %c0_52 = arith.constant 0 : index
    %c0_53 = arith.constant 0 : index
    %96 = vector.load %arg7[%c1_51, %c0_52, %c0_53] : memref<2x256x512xbf16, #tpu.memory_space<vmem>>, vector<1x256x512xbf16>
    %97 = vector.shape_cast %96 : vector<1x256x512xbf16> to vector<256x512xbf16>
    %cst_54 = arith.constant dense<0.000000e+00> : vector<16x512xf32>
    %98 = tpu.matmul %91, %97, %cst_54 {dimension_numbers = #tpu.dot_dimension_numbers<[1], [0], [0], [1], [0, 0, 1, 1], [], []>} : vector<16x256xbf16>, vector<256x512xbf16>, vector<16x512xf32> -> vector<16x512xf32>
    %99 = arith.addf %95, %98 : vector<16x512xf32>
    %c0_55 = arith.constant 0 : index
    %c0_56 = arith.constant 0 : index
    %100 = vector.load %arg8[%c0_55, %c0_56] : memref<1x512xf32, #tpu.memory_space<vmem>>, vector<1x512xf32>
    %101 = vector.broadcast %100 : vector<1x512xf32> to vector<16x512xf32>
    %102 = arith.addf %99, %101 : vector<16x512xf32>
    %103 = vector.shape_cast %102 : vector<16x512xf32> to vector<2x8x512xf32>
    %104 = vector.extract_strided_slice %103 {offsets = [0, 0, 0], sizes = [2, 8, 256], strides = [1, 1, 1]} : vector<2x8x512xf32> to vector<2x8x256xf32>
    %105 = vector.extract_strided_slice %103 {offsets = [0, 0, 256], sizes = [2, 8, 256], strides = [1, 1, 1]} : vector<2x8x512xf32> to vector<2x8x256xf32>
    %cst_57 = arith.constant -3.000000e+01 : f32
    %106 = vector.broadcast %cst_57 : f32 to vector<2x8x256xf32>
    %107 = arith.maximumf %105, %106 : vector<2x8x256xf32>
    %cst_58 = arith.constant 0.000000e+00 : f32
    %108 = vector.broadcast %cst_58 : f32 to vector<2x8x256xf32>
    %109 = arith.subf %108, %107 : vector<2x8x256xf32>
    %110 = math.exp %109 : vector<2x8x256xf32>
    %cst_59 = arith.constant 1.000000e+00 : f32
    %111 = vector.broadcast %cst_59 : f32 to vector<2x8x256xf32>
    %112 = arith.addf %111, %110 : vector<2x8x256xf32>
    %113 = tpu.reciprocal %112 {approx = true} : vector<2x8x256xf32> -> vector<2x8x256xf32>
    %114 = arith.mulf %104, %113 : vector<2x8x256xf32>
    %115 = arith.addf %114, %0 : vector<2x8x256xf32>
    %c0_60 = arith.constant 0 : index
    %c0_61 = arith.constant 0 : index
    %c0_62 = arith.constant 0 : index
    %116 = vector.load %arg17[%c0_60, %c0_61, %c0_62] : memref<2x8x256xf32, #tpu.memory_space<vmem>>, vector<2x8x256xf32>
    tpu.vector_store %arg17[%c0_60, %c0_61, %c0_62], %115 {strides = array<i32>} : memref<2x8x256xf32, #tpu.memory_space<vmem>>, vector<2x8x256xf32>,
    %cst_63 = arith.constant 0.000000e+00 : f32
    %117 = vector.broadcast %cst_63 : f32 to vector<2x1x256xf32>
    %118 = tpu.concatenate %117, %1 in 1 : vector<2x1x256xf32>, vector<2x8x256xf32> -> vector<2x9x256xf32>
    %cst_64 = arith.constant 0.000000e+00 : f32
    %119 = vector.broadcast %cst_64 : f32 to vector<2x9x256xf32>
    %120 = arith.cmpf ogt, %118, %119 : vector<2x9x256xf32>
    %cst_65 = arith.constant 0.000000e+00 : f32
    %121 = vector.broadcast %cst_65 : f32 to vector<2x9x256xf32>
    %122 = arith.minimumf %118, %121 : vector<2x9x256xf32>
    %123 = math.exp %122 : vector<2x9x256xf32>
    %cst_66 = arith.constant 1.000000e+00 : f32
    %124 = vector.broadcast %cst_66 : f32 to vector<2x9x256xf32>
    %125 = arith.subf %123, %124 : vector<2x9x256xf32>
    %126 = arith.select %120, %118, %125 : vector<2x9x256xi1>, vector<2x9x256xf32>
    %127 = arith.truncf %126 : vector<2x9x256xf32> to vector<2x9x256xbf16>
    %cst_67 = arith.constant 0.000000e+00 : f32
    %128 = vector.broadcast %cst_67 : f32 to vector<2x9x256xf32>
    %129 = arith.subf %128, %118 : vector<2x9x256xf32>
    %cst_68 = arith.constant 0.000000e+00 : f32
    %130 = vector.broadcast %cst_68 : f32 to vector<2x9x256xf32>
    %131 = arith.cmpf ogt, %129, %130 : vector<2x9x256xf32>
    %cst_69 = arith.constant 0.000000e+00 : f32
    %132 = vector.broadcast %cst_69 : f32 to vector<2x9x256xf32>
    %133 = arith.minimumf %129, %132 : vector<2x9x256xf32>
    %134 = math.exp %133 : vector<2x9x256xf32>
    %cst_70 = arith.constant 1.000000e+00 : f32
    %135 = vector.broadcast %cst_70 : f32 to vector<2x9x256xf32>
    %136 = arith.subf %134, %135 : vector<2x9x256xf32>
    %137 = arith.select %131, %129, %136 : vector<2x9x256xi1>, vector<2x9x256xf32>
    %138 = arith.truncf %137 : vector<2x9x256xf32> to vector<2x9x256xbf16>
    %cst_71 = arith.constant 0.000000e+00 : f32
    %139 = vector.broadcast %cst_71 : f32 to vector<16x256xf32>
    %140 = vector.extract_strided_slice %127 {offsets = [0, 0, 0], sizes = [2, 8, 256], strides = [1, 1, 1]} : vector<2x9x256xbf16> to vector<2x8x256xbf16>
    %141 = vector.shape_cast %140 : vector<2x8x256xbf16> to vector<16x256xbf16>
    %142 = vector.extract_strided_slice %138 {offsets = [0, 0, 0], sizes = [2, 8, 256], strides = [1, 1, 1]} : vector<2x9x256xbf16> to vector<2x8x256xbf16>
    %143 = vector.shape_cast %142 : vector<2x8x256xbf16> to vector<16x256xbf16>
    %c0_72 = arith.constant 0 : index
    %c0_73 = arith.constant 0 : index
    %c0_74 = arith.constant 0 : index
    %144 = vector.load %arg9[%c0_72, %c0_73, %c0_74] : memref<2x256x256xbf16, #tpu.memory_space<vmem>>, vector<1x256x256xbf16>
    %145 = vector.shape_cast %144 : vector<1x256x256xbf16> to vector<256x256xbf16>
    %cst_75 = arith.constant dense<0.000000e+00> : vector<16x256xf32>
    %146 = tpu.matmul %141, %145, %cst_75 {dimension_numbers = #tpu.dot_dimension_numbers<[1], [0], [0], [1], [0, 0, 1, 1], [], []>} : vector<16x256xbf16>, vector<256x256xbf16>, vector<16x256xf32> -> vector<16x256xf32>
    %147 = arith.addf %139, %146 : vector<16x256xf32>
    %c0_76 = arith.constant 0 : index
    %c0_77 = arith.constant 0 : index
    %c0_78 = arith.constant 0 : index
    %148 = vector.load %arg10[%c0_76, %c0_77, %c0_78] : memref<2x256x256xbf16, #tpu.memory_space<vmem>>, vector<1x256x256xbf16>
    %149 = vector.shape_cast %148 : vector<1x256x256xbf16> to vector<256x256xbf16>
    %cst_79 = arith.constant dense<0.000000e+00> : vector<16x256xf32>
    %150 = tpu.matmul %143, %149, %cst_79 {dimension_numbers = #tpu.dot_dimension_numbers<[1], [0], [0], [1], [0, 0, 1, 1], [], []>} : vector<16x256xbf16>, vector<256x256xbf16>, vector<16x256xf32> -> vector<16x256xf32>
    %151 = arith.addf %147, %150 : vector<16x256xf32>
    %152 = vector.extract_strided_slice %127 {offsets = [0, 1, 0], sizes = [2, 8, 256], strides = [1, 1, 1]} : vector<2x9x256xbf16> to vector<2x8x256xbf16>
    %153 = vector.shape_cast %152 : vector<2x8x256xbf16> to vector<16x256xbf16>
    %154 = vector.extract_strided_slice %138 {offsets = [0, 1, 0], sizes = [2, 8, 256], strides = [1, 1, 1]} : vector<2x9x256xbf16> to vector<2x8x256xbf16>
    %155 = vector.shape_cast %154 : vector<2x8x256xbf16> to vector<16x256xbf16>
    %c1_80 = arith.constant 1 : index
    %c0_81 = arith.constant 0 : index
    %c0_82 = arith.constant 0 : index
    %156 = vector.load %arg9[%c1_80, %c0_81, %c0_82] : memref<2x256x256xbf16, #tpu.memory_space<vmem>>, vector<1x256x256xbf16>
    %157 = vector.shape_cast %156 : vector<1x256x256xbf16> to vector<256x256xbf16>
    %cst_83 = arith.constant dense<0.000000e+00> : vector<16x256xf32>
    %158 = tpu.matmul %153, %157, %cst_83 {dimension_numbers = #tpu.dot_dimension_numbers<[1], [0], [0], [1], [0, 0, 1, 1], [], []>} : vector<16x256xbf16>, vector<256x256xbf16>, vector<16x256xf32> -> vector<16x256xf32>
    %159 = arith.addf %151, %158 : vector<16x256xf32>
    %c1_84 = arith.constant 1 : index
    %c0_85 = arith.constant 0 : index
    %c0_86 = arith.constant 0 : index
    %160 = vector.load %arg10[%c1_84, %c0_85, %c0_86] : memref<2x256x256xbf16, #tpu.memory_space<vmem>>, vector<1x256x256xbf16>
    %161 = vector.shape_cast %160 : vector<1x256x256xbf16> to vector<256x256xbf16>
    %cst_87 = arith.constant dense<0.000000e+00> : vector<16x256xf32>
    %162 = tpu.matmul %155, %161, %cst_87 {dimension_numbers = #tpu.dot_dimension_numbers<[1], [0], [0], [1], [0, 0, 1, 1], [], []>} : vector<16x256xbf16>, vector<256x256xbf16>, vector<16x256xf32> -> vector<16x256xf32>
    %163 = arith.addf %159, %162 : vector<16x256xf32>
    %c0_88 = arith.constant 0 : index
    %c0_89 = arith.constant 0 : index
    %164 = vector.load %arg11[%c0_88, %c0_89] : memref<1x256xf32, #tpu.memory_space<vmem>>, vector<1x256xf32>
    %165 = vector.broadcast %164 : vector<1x256xf32> to vector<16x256xf32>
    %166 = arith.addf %163, %165 : vector<16x256xf32>
    %167 = vector.shape_cast %166 : vector<16x256xf32> to vector<2x8x256xf32>
    %cst_90 = arith.constant 0.000000e+00 : f32
    %168 = vector.broadcast %cst_90 : f32 to vector<2x8x256xf32>
    %169 = arith.cmpf ogt, %115, %168 : vector<2x8x256xf32>
    %cst_91 = arith.constant 0.000000e+00 : f32
    %170 = vector.broadcast %cst_91 : f32 to vector<2x8x256xf32>
    %171 = arith.minimumf %115, %170 : vector<2x8x256xf32>
    %172 = math.exp %171 : vector<2x8x256xf32>
    %cst_92 = arith.constant 1.000000e+00 : f32
    %173 = vector.broadcast %cst_92 : f32 to vector<2x8x256xf32>
    %174 = arith.subf %172, %173 : vector<2x8x256xf32>
    %175 = arith.select %169, %115, %174 : vector<2x8x256xi1>, vector<2x8x256xf32>
    %176 = arith.truncf %175 : vector<2x8x256xf32> to vector<2x8x256xbf16>
    %177 = vector.shape_cast %176 : vector<2x8x256xbf16> to vector<16x256xbf16>
    %cst_93 = arith.constant 0.000000e+00 : f32
    %178 = vector.broadcast %cst_93 : f32 to vector<2x8x256xf32>
    %179 = arith.subf %178, %115 : vector<2x8x256xf32>
    %cst_94 = arith.constant 0.000000e+00 : f32
    %180 = vector.broadcast %cst_94 : f32 to vector<2x8x256xf32>
    %181 = arith.cmpf ogt, %179, %180 : vector<2x8x256xf32>
    %cst_95 = arith.constant 0.000000e+00 : f32
    %182 = vector.broadcast %cst_95 : f32 to vector<2x8x256xf32>
    %183 = arith.minimumf %179, %182 : vector<2x8x256xf32>
    %184 = math.exp %183 : vector<2x8x256xf32>
    %cst_96 = arith.constant 1.000000e+00 : f32
    %185 = vector.broadcast %cst_96 : f32 to vector<2x8x256xf32>
    %186 = arith.subf %184, %185 : vector<2x8x256xf32>
    %187 = arith.select %181, %179, %186 : vector<2x8x256xi1>, vector<2x8x256xf32>
    %188 = arith.truncf %187 : vector<2x8x256xf32> to vector<2x8x256xbf16>
    %189 = vector.shape_cast %188 : vector<2x8x256xbf16> to vector<16x256xbf16>
    %c0_97 = arith.constant 0 : index
    %c0_98 = arith.constant 0 : index
    %190 = vector.load %arg15[%c0_97, %c0_98] : memref<256x256xbf16, #tpu.memory_space<vmem>>, vector<256x256xbf16>
    %cst_99 = arith.constant dense<0.000000e+00> : vector<16x256xf32>
    %191 = tpu.matmul %177, %190, %cst_99 {dimension_numbers = #tpu.dot_dimension_numbers<[1], [0], [0], [1], [0, 0, 1, 1], [], []>} : vector<16x256xbf16>, vector<256x256xbf16>, vector<16x256xf32> -> vector<16x256xf32>
    %c0_100 = arith.constant 0 : index
    %c0_101 = arith.constant 0 : index
    %192 = vector.load %arg16[%c0_100, %c0_101] : memref<256x256xbf16, #tpu.memory_space<vmem>>, vector<256x256xbf16>
    %cst_102 = arith.constant dense<0.000000e+00> : vector<16x256xf32>
    %193 = tpu.matmul %189, %192, %cst_102 {dimension_numbers = #tpu.dot_dimension_numbers<[1], [0], [0], [1], [0, 0, 1, 1], [], []>} : vector<16x256xbf16>, vector<256x256xbf16>, vector<16x256xf32> -> vector<16x256xf32>
    %194 = arith.addf %191, %193 : vector<16x256xf32>
    %195 = vector.shape_cast %194 : vector<16x256xf32> to vector<2x8x256xf32>
    %196 = arith.addf %167, %195 : vector<2x8x256xf32>
    %cst_103 = arith.constant 0.000000e+00 : f32
    %197 = vector.broadcast %cst_103 : f32 to vector<2x1x256xf32>
    %198 = tpu.concatenate %197, %196 in 1 : vector<2x1x256xf32>, vector<2x8x256xf32> -> vector<2x9x256xf32>
    %cst_104 = arith.constant 0.000000e+00 : f32
    %199 = vector.broadcast %cst_104 : f32 to vector<2x9x256xf32>
    %200 = arith.cmpf ogt, %198, %199 : vector<2x9x256xf32>
    %cst_105 = arith.constant 0.000000e+00 : f32
    %201 = vector.broadcast %cst_105 : f32 to vector<2x9x256xf32>
    %202 = arith.minimumf %198, %201 : vector<2x9x256xf32>
    %203 = math.exp %202 : vector<2x9x256xf32>
    %cst_106 = arith.constant 1.000000e+00 : f32
    %204 = vector.broadcast %cst_106 : f32 to vector<2x9x256xf32>
    %205 = arith.subf %203, %204 : vector<2x9x256xf32>
    %206 = arith.select %200, %198, %205 : vector<2x9x256xi1>, vector<2x9x256xf32>
    %207 = arith.truncf %206 : vector<2x9x256xf32> to vector<2x9x256xbf16>
    %cst_107 = arith.constant 0.000000e+00 : f32
    %208 = vector.broadcast %cst_107 : f32 to vector<2x9x256xf32>
    %209 = arith.subf %208, %198 : vector<2x9x256xf32>
    %cst_108 = arith.constant 0.000000e+00 : f32
    %210 = vector.broadcast %cst_108 : f32 to vector<2x9x256xf32>
    %211 = arith.cmpf ogt, %209, %210 : vector<2x9x256xf32>
    %cst_109 = arith.constant 0.000000e+00 : f32
    %212 = vector.broadcast %cst_109 : f32 to vector<2x9x256xf32>
    %213 = arith.minimumf %209, %212 : vector<2x9x256xf32>
    %214 = math.exp %213 : vector<2x9x256xf32>
    %cst_110 = arith.constant 1.000000e+00 : f32
    %215 = vector.broadcast %cst_110 : f32 to vector<2x9x256xf32>
    %216 = arith.subf %214, %215 : vector<2x9x256xf32>
    %217 = arith.select %211, %209, %216 : vector<2x9x256xi1>, vector<2x9x256xf32>
    %218 = arith.truncf %217 : vector<2x9x256xf32> to vector<2x9x256xbf16>
    %cst_111 = arith.constant 0.000000e+00 : f32
    %219 = vector.broadcast %cst_111 : f32 to vector<16x512xf32>
    %220 = vector.extract_strided_slice %207 {offsets = [0, 0, 0], sizes = [2, 8, 256], strides = [1, 1, 1]} : vector<2x9x256xbf16> to vector<2x8x256xbf16>
    %221 = vector.shape_cast %220 : vector<2x8x256xbf16> to vector<16x256xbf16>
    %222 = vector.extract_strided_slice %218 {offsets = [0, 0, 0], sizes = [2, 8, 256], strides = [1, 1, 1]} : vector<2x9x256xbf16> to vector<2x8x256xbf16>
    %223 = vector.shape_cast %222 : vector<2x8x256xbf16> to vector<16x256xbf16>
    %c0_112 = arith.constant 0 : index
    %c0_113 = arith.constant 0 : index
    %c0_114 = arith.constant 0 : index
    %224 = vector.load %arg12[%c0_112, %c0_113, %c0_114] : memref<2x256x512xbf16, #tpu.memory_space<vmem>>, vector<1x256x512xbf16>
    %225 = vector.shape_cast %224 : vector<1x256x512xbf16> to vector<256x512xbf16>
    %cst_115 = arith.constant dense<0.000000e+00> : vector<16x512xf32>
    %226 = tpu.matmul %221, %225, %cst_115 {dimension_numbers = #tpu.dot_dimension_numbers<[1], [0], [0], [1], [0, 0, 1, 1], [], []>} : vector<16x256xbf16>, vector<256x512xbf16>, vector<16x512xf32> -> vector<16x512xf32>
    %227 = arith.addf %219, %226 : vector<16x512xf32>
    %c0_116 = arith.constant 0 : index
    %c0_117 = arith.constant 0 : index
    %c0_118 = arith.constant 0 : index
    %228 = vector.load %arg13[%c0_116, %c0_117, %c0_118] : memref<2x256x512xbf16, #tpu.memory_space<vmem>>, vector<1x256x512xbf16>
    %229 = vector.shape_cast %228 : vector<1x256x512xbf16> to vector<256x512xbf16>
    %cst_119 = arith.constant dense<0.000000e+00> : vector<16x512xf32>
    %230 = tpu.matmul %223, %229, %cst_119 {dimension_numbers = #tpu.dot_dimension_numbers<[1], [0], [0], [1], [0, 0, 1, 1], [], []>} : vector<16x256xbf16>, vector<256x512xbf16>, vector<16x512xf32> -> vector<16x512xf32>
    %231 = arith.addf %227, %230 : vector<16x512xf32>
    %232 = vector.extract_strided_slice %207 {offsets = [0, 1, 0], sizes = [2, 8, 256], strides = [1, 1, 1]} : vector<2x9x256xbf16> to vector<2x8x256xbf16>
    %233 = vector.shape_cast %232 : vector<2x8x256xbf16> to vector<16x256xbf16>
    %234 = vector.extract_strided_slice %218 {offsets = [0, 1, 0], sizes = [2, 8, 256], strides = [1, 1, 1]} : vector<2x9x256xbf16> to vector<2x8x256xbf16>
    %235 = vector.shape_cast %234 : vector<2x8x256xbf16> to vector<16x256xbf16>
    %c1_120 = arith.constant 1 : index
    %c0_121 = arith.constant 0 : index
    %c0_122 = arith.constant 0 : index
    %236 = vector.load %arg12[%c1_120, %c0_121, %c0_122] : memref<2x256x512xbf16, #tpu.memory_space<vmem>>, vector<1x256x512xbf16>
    %237 = vector.shape_cast %236 : vector<1x256x512xbf16> to vector<256x512xbf16>
    %cst_123 = arith.constant dense<0.000000e+00> : vector<16x512xf32>
    %238 = tpu.matmul %233, %237, %cst_123 {dimension_numbers = #tpu.dot_dimension_numbers<[1], [0], [0], [1], [0, 0, 1, 1], [], []>} : vector<16x256xbf16>, vector<256x512xbf16>, vector<16x512xf32> -> vector<16x512xf32>
    %239 = arith.addf %231, %238 : vector<16x512xf32>
    %c1_124 = arith.constant 1 : index
    %c0_125 = arith.constant 0 : index
    %c0_126 = arith.constant 0 : index
    %240 = vector.load %arg13[%c1_124, %c0_125, %c0_126] : memref<2x256x512xbf16, #tpu.memory_space<vmem>>, vector<1x256x512xbf16>
    %241 = vector.shape_cast %240 : vector<1x256x512xbf16> to vector<256x512xbf16>
    %cst_127 = arith.constant dense<0.000000e+00> : vector<16x512xf32>
    %242 = tpu.matmul %235, %241, %cst_127 {dimension_numbers = #tpu.dot_dimension_numbers<[1], [0], [0], [1], [0, 0, 1, 1], [], []>} : vector<16x256xbf16>, vector<256x512xbf16>, vector<16x512xf32> -> vector<16x512xf32>
    %243 = arith.addf %239, %242 : vector<16x512xf32>
    %c0_128 = arith.constant 0 : index
    %c0_129 = arith.constant 0 : index
    %244 = vector.load %arg14[%c0_128, %c0_129] : memref<1x512xf32, #tpu.memory_space<vmem>>, vector<1x512xf32>
    %245 = vector.broadcast %244 : vector<1x512xf32> to vector<16x512xf32>
    %246 = arith.addf %243, %245 : vector<16x512xf32>
    %247 = vector.shape_cast %246 : vector<16x512xf32> to vector<2x8x512xf32>
    %248 = vector.extract_strided_slice %247 {offsets = [0, 0, 0], sizes = [2, 8, 256], strides = [1, 1, 1]} : vector<2x8x512xf32> to vector<2x8x256xf32>
    %249 = vector.extract_strided_slice %247 {offsets = [0, 0, 256], sizes = [2, 8, 256], strides = [1, 1, 1]} : vector<2x8x512xf32> to vector<2x8x256xf32>
    %cst_130 = arith.constant -3.000000e+01 : f32
    %250 = vector.broadcast %cst_130 : f32 to vector<2x8x256xf32>
    %251 = arith.maximumf %249, %250 : vector<2x8x256xf32>
    %cst_131 = arith.constant 0.000000e+00 : f32
    %252 = vector.broadcast %cst_131 : f32 to vector<2x8x256xf32>
    %253 = arith.subf %252, %251 : vector<2x8x256xf32>
    %254 = math.exp %253 : vector<2x8x256xf32>
    %cst_132 = arith.constant 1.000000e+00 : f32
    %255 = vector.broadcast %cst_132 : f32 to vector<2x8x256xf32>
    %256 = arith.addf %255, %254 : vector<2x8x256xf32>
    %257 = tpu.reciprocal %256 {approx = true} : vector<2x8x256xf32> -> vector<2x8x256xf32>
    %258 = arith.mulf %248, %257 : vector<2x8x256xf32>
    %259 = arith.addf %258, %1 : vector<2x8x256xf32>
    %c0_133 = arith.constant 0 : index
    %c0_134 = arith.constant 0 : index
    %c0_135 = arith.constant 0 : index
    %260 = vector.load %arg18[%c0_133, %c0_134, %c0_135] : memref<2x8x256xf32, #tpu.memory_space<vmem>>, vector<2x8x256xf32>
    tpu.vector_store %arg18[%c0_133, %c0_134, %c0_135], %259 {strides = array<i32>} : memref<2x8x256xf32, #tpu.memory_space<vmem>>, vector<2x8x256xf32>,
    return
  }
  func.func @transform_0(%arg0: i32) -> (i32, i32, i32) {
    %c0_i32 = arith.constant 0 : i32
    %c0_i32_0 = arith.constant 0 : i32
    %c0_i32_1 = arith.constant 0 : i32
    return %arg0, %c0_i32, %c0_i32_0 : i32, i32, i32
  }
  func.func @transform_1(%arg0: i32) -> (i32, i32, i32) {
    %c0_i32 = arith.constant 0 : i32
    %c0_i32_0 = arith.constant 0 : i32
    %c0_i32_1 = arith.constant 0 : i32
    return %arg0, %c0_i32, %c0_i32_0 : i32, i32, i32
  }
  func.func @transform_2(%arg0: i32) -> (i32, i32, i32) {
    %c0_i32 = arith.constant 0 : i32
    %c0_i32_0 = arith.constant 0 : i32
    %c0_i32_1 = arith.constant 0 : i32
    %c0_i32_2 = arith.constant 0 : i32
    return %c0_i32, %c0_i32_0, %c0_i32_1 : i32, i32, i32
  }
  func.func @transform_3(%arg0: i32) -> (i32, i32, i32) {
    %c0_i32 = arith.constant 0 : i32
    %c0_i32_0 = arith.constant 0 : i32
    %c0_i32_1 = arith.constant 0 : i32
    %c0_i32_2 = arith.constant 0 : i32
    return %c0_i32, %c0_i32_0, %c0_i32_1 : i32, i32, i32
  }
  func.func @transform_4(%arg0: i32) -> (i32, i32) {
    %c0_i32 = arith.constant 0 : i32
    %c0_i32_0 = arith.constant 0 : i32
    %c0_i32_1 = arith.constant 0 : i32
    return %c0_i32, %c0_i32_0 : i32, i32
  }
  func.func @transform_5(%arg0: i32) -> (i32, i32, i32) {
    %c0_i32 = arith.constant 0 : i32
    %c0_i32_0 = arith.constant 0 : i32
    %c0_i32_1 = arith.constant 0 : i32
    %c0_i32_2 = arith.constant 0 : i32
    return %c0_i32, %c0_i32_0, %c0_i32_1 : i32, i32, i32
  }
  func.func @transform_6(%arg0: i32) -> (i32, i32, i32) {
    %c0_i32 = arith.constant 0 : i32
    %c0_i32_0 = arith.constant 0 : i32
    %c0_i32_1 = arith.constant 0 : i32
    %c0_i32_2 = arith.constant 0 : i32
    return %c0_i32, %c0_i32_0, %c0_i32_1 : i32, i32, i32
  }
  func.func @transform_7(%arg0: i32) -> (i32, i32) {
    %c0_i32 = arith.constant 0 : i32
    %c0_i32_0 = arith.constant 0 : i32
    %c0_i32_1 = arith.constant 0 : i32
    return %c0_i32, %c0_i32_0 : i32, i32
  }
  func.func @transform_8(%arg0: i32) -> (i32, i32, i32) {
    %c0_i32 = arith.constant 0 : i32
    %c0_i32_0 = arith.constant 0 : i32
    %c0_i32_1 = arith.constant 0 : i32
    %c0_i32_2 = arith.constant 0 : i32
    return %c0_i32, %c0_i32_0, %c0_i32_1 : i32, i32, i32
  }
  func.func @transform_9(%arg0: i32) -> (i32, i32, i32) {
    %c0_i32 = arith.constant 0 : i32
    %c0_i32_0 = arith.constant 0 : i32
    %c0_i32_1 = arith.constant 0 : i32
    %c0_i32_2 = arith.constant 0 : i32
    return %c0_i32, %c0_i32_0, %c0_i32_1 : i32, i32, i32
  }
  func.func @transform_10(%arg0: i32) -> (i32, i32) {
    %c0_i32 = arith.constant 0 : i32
    %c0_i32_0 = arith.constant 0 : i32
    %c0_i32_1 = arith.constant 0 : i32
    return %c0_i32, %c0_i32_0 : i32, i32
  }
  func.func @transform_11(%arg0: i32) -> (i32, i32, i32) {
    %c0_i32 = arith.constant 0 : i32
    %c0_i32_0 = arith.constant 0 : i32
    %c0_i32_1 = arith.constant 0 : i32
    %c0_i32_2 = arith.constant 0 : i32
    return %c0_i32, %c0_i32_0, %c0_i32_1 : i32, i32, i32
  }
  func.func @transform_12(%arg0: i32) -> (i32, i32, i32) {
    %c0_i32 = arith.constant 0 : i32
    %c0_i32_0 = arith.constant 0 : i32
    %c0_i32_1 = arith.constant 0 : i32
    %c0_i32_2 = arith.constant 0 : i32
    return %c0_i32, %c0_i32_0, %c0_i32_1 : i32, i32, i32
  }
  func.func @transform_13(%arg0: i32) -> (i32, i32) {
    %c0_i32 = arith.constant 0 : i32
    %c0_i32_0 = arith.constant 0 : i32
    %c0_i32_1 = arith.constant 0 : i32
    return %c0_i32, %c0_i32_0 : i32, i32
  }
  func.func @transform_14(%arg0: i32) -> (i32, i32) {
    %c0_i32 = arith.constant 0 : i32
    %c0_i32_0 = arith.constant 0 : i32
    %c0_i32_1 = arith.constant 0 : i32
    return %c0_i32, %c0_i32_0 : i32, i32
  }
  func.func @transform_15(%arg0: i32) -> (i32, i32) {
    %c0_i32 = arith.constant 0 : i32
    %c0_i32_0 = arith.constant 0 : i32
    %c0_i32_1 = arith.constant 0 : i32
    return %c0_i32, %c0_i32_0 : i32, i32
  }
  func.func @transform_16(%arg0: i32) -> (i32, i32, i32) {
    %c0_i32 = arith.constant 0 : i32
    %c0_i32_0 = arith.constant 0 : i32
    %c0_i32_1 = arith.constant 0 : i32
    return %arg0, %c0_i32, %c0_i32_0 : i32, i32, i32
  }
  func.func @transform_17(%arg0: i32) -> (i32, i32, i32) {
    %c0_i32 = arith.constant 0 : i32
    %c0_i32_0 = arith.constant 0 : i32
    %c0_i32_1 = arith.constant 0 : i32
    return %arg0, %c0_i32, %c0_i32_0 : i32, i32, i32
  }
}

</mosaic_0001>

<bundles_post_ra>
// kernel: tpu_custom_call.1
= control target key start
LH: loop header
LB: loop body
LE: loop exit
PB: predicated region body
PF: predicated region fallthrough
CT: control target
= control target key end

     0   :  { %s12992_s0 = inlined_call_operand.hbm [shape: f32[4,8,256], index: 0, kind: input, shape index: {}]   ;;  %s12993_s1 = inlined_call_operand.hbm [shape: f32[4,8,256], index: 1, kind: input, shape index: {}]   ;;  %s12994_s2 = inlined_call_operand.hbm [shape: bf16[2,256,256], index: 2, kind: input, shape index: {}]   ;;  %s12995_s3 = inlined_call_operand.hbm [shape: bf16[2,256,256], index: 3, kind: input, shape index: {}]   ;;  %s12996_s4 = inlined_call_operand.vmem [shape: f32[1,256], index: 4, kind: input, shape index: {}]   ;;  %s12997_s5 = inlined_call_operand.hbm [shape: bf16[2,256,512], index: 5, kind: input, shape index: {}]   ;;  %s12998_s6 = inlined_call_operand.hbm [shape: bf16[2,256,512], index: 6, kind: input, shape index: {}]   ;;  %s12999_s7 = inlined_call_operand.vmem [shape: f32[1,512], index: 7, kind: input, shape index: {}]   ;;  %s13000_s8 = inlined_call_operand.hbm [shape: bf16[2,256,256], index: 8, kind: input, shape index: {}]   ;;  %s13001_s9 = inlined_call_operand.hbm [shape: bf16[2,256,256], index: 9, kind: input, shape index: {}]   ;;  %s13002_s10 = inlined_call_operand.vmem [shape: f32[1,256], index: 10, kind: input, shape index: {}]   ;;  %s13003_s11 = inlined_call_operand.hbm [shape: bf16[2,256,512], index: 11, kind: input, shape index: {}]   ;;  %s13004_s12 = inlined_call_operand.hbm [shape: bf16[2,256,512], index: 12, kind: input, shape index: {}]   ;;  %s13005_s13 = inlined_call_operand.vmem [shape: f32[1,512], index: 13, kind: input, shape index: {}]   ;;  %s13006_s14 = inlined_call_operand.hbm [shape: bf16[256,256], index: 14, kind: input, shape index: {}]   ;;  %s13007_s15 = inlined_call_operand.hbm [shape: bf16[256,256], index: 15, kind: input, shape index: {}]   ;;  %s13008_s16 = inlined_call_operand.hbm [shape: f32[4,8,256], index: 16, kind: output, shape index: {0}]   ;;  %s13009_s17 = inlined_call_operand.hbm [shape: f32[4,8,256], index: 17, kind: output, shape index: {1}]  }
   0x1   :  { %13027 = sst [smem:[#allocation36_spill]] %s12992_s0 }
   0x2   :  { %13028 = sst [smem:[#allocation37_spill]] %s12993_s1 }
   0x3   :  { %13029 = sst [smem:[#allocation38_spill]] %s12994_s2 }
   0x4   :  { %13030 = sst [smem:[#allocation39_spill]] %s12995_s3 }
   0x5   :  { %13031 = sst [smem:[#allocation40_spill]] %s12996_s4 }
   0x6   :  { %13032 = sst [smem:[#allocation41_spill]] %s12997_s5 }
   0x7   :  { %13033 = sst [smem:[#allocation42_spill]] %s12998_s6 }
   0x8   :  { %13034 = sst [smem:[#allocation43_spill]] %s12999_s7 }
   0x9   :  { %13035 = sst [smem:[#allocation44_spill]] %s13000_s8 }
   0xa   :  { %13036 = sst [smem:[#allocation45_spill]] %s13001_s9 }
   0xb   :  { %13037 = sst [smem:[#allocation46_spill]] %s13002_s10 }
   0xc   :  { %13038 = sst [smem:[#allocation47_spill]] %s13005_s13 }
   0xd   :  { %13039 = sst [smem:[#allocation48_spill]] %s13008_s16 }
   0xe   :  { %13040 = sst [smem:[#allocation49_spill]] %s13009_s17 }
   0xf   :  { %23 = vsyncpa [#allocation3], 0 }
  0x10   :  { %25 = vsyncpa [#allocation3 + $0x1], 0 }
  0x11   :  { %26 = vsyncpa [#allocation6], 0 }
  0x12   :  { %28 = vsyncpa [#allocation6 + $0x1], 0 }
  0x13   :  { %29 = vsyncpa [#allocation9], 0 }
  0x14   :  { %30 = vsyncpa [#allocation12], 0 }
  0x15   :  { %31 = vsyncpa [#allocation15], 0 }
  0x16   :  { %32 = vsyncpa [#allocation18], 0 }
  0x17   :  { %33 = vsyncpa [#allocation21], 0 }
  0x18   :  { %34 = vsyncpa [#allocation4], 0 }
  0x19   :  { %36 = vsyncpa [#allocation4 + $0x1], 0 }
  0x1a   :  { %37 = vsyncpa [#allocation24], 0 }
  0x1b   :  { %39 = vsyncpa [#allocation24 + $0x1], 0  ;;  %s11754_s24 = smov 0   ;;  %s11756_s25 = smov 0  }
  0x1c   :  { %s11758_s26 = smov 0   ;;  %s11760_s27 = smov 0  }
  0x1d LB: > { %s11644_s28 = smov [#allocation7]   ;;  %s11775_s0 = sadd.s32 4294967295, %s11642_s27   ;;  %s11642_s27 = sphi %s11760_s27, %s13091_s27   ;;  %s11638_s26 = sphi %s11758_s26, %s13090_s26   ;;  %s11634_s25 = sphi %s11756_s25, %s13089_s25   ;;  %s11630_s24 = sphi %s11754_s24, %s13088_s24  }
  0x1e   : > { %s460_s29 = sshll.u32 %s11644_s28, 4  ;;  %p8420_p0 = scmp.ge.s32.totalorder %s11642_s27, 1  ;;  %s11780_s29 = int_to_ptr.vmem [resolvable:$true] %s460_s29 }
  0x1f   : > { %p13015_p1 = scmp.eq.s32.totalorder %s11775_s0, 0  ;;  %p448_p2 = scmp.lt.s32.totalorder %s11642_s27, 3 }
  0x20   : > { %s11645_s18 = smov [#allocation8]   ;;  %s11646_s20 = smov [#allocation11]  }
  0x21   : > { %p11782_p3 = pnand %p8420_p0, %p448_p2  ;;  %s473_s19 = sshll.u32 %s11645_s18, 4  ;;  %s11795_s19 = int_to_ptr.vmem [resolvable:$true] %s473_s19 }
  0x22   : > { %s11797_s21 = sshll.u32 %s11646_s20, 4  ;;  %s13044_s2 = sld [smem:[#allocation38_spill]]  ;;  %s503_s21 = int_to_ptr.vmem [resolvable:$true] %s11797_s21 }
  0x23   : > { %s13041_s30 = scalar_select %p11782_p3, 1, 0 }
  0x24   : > { %p9629_p5 = pneg %p11782_p3 }
  0x25   : > { %13042 = sst [smem:[#allocation35_spill]] %s13041_s30 }
  0x26   : > { %p11791_p6 = pnand %p9629_p5, %p13015_p1 }
  0x28   : > { %s11176_s28 = scalar_lea.hbm %s13044_s2, 8192  ;;  %p11807_p8 = pneg %p11791_p6 }
  0x29   : > { %p11177_p7 = scmp.ne.s32.totalorder %s13044_s2, %s11176_s28  ;;  %p11183_p11 = scmp.lt.u32.totalorder %s11176_s28, %s13044_s2 }
  0x2b   : > { %p11179_p9 = pnand %p11807_p8, %p11177_p7 }
  0x2d   : > { %p11180_p10 = pneg %p11179_p9 }
  0x2f   : > { %p11185_p12 = pnand %p11183_p11, %p11180_p10 }
  0x31   : > { %11188 = shalt.err (!%p11185_p12)
}
  0x32   : > { %s11189_s13 = scalar_lea.vmem %s11780_s29, 8192  ;;  %p11197_p5 = scmp.lt.s32.totalorder %s11780_s29, %s11780_s29 }
  0x33   : > { %p11190_p13 = scmp.ne.s32.totalorder %s11780_s29, %s11189_s13  ;;  %p11198_p4 = scmp.lt.s32.totalorder %s11189_s13, %s11189_s13 }
  0x35   : > { %p11192_p0 = pnand %p11190_p13, %p11807_p8  ;;  %p11199_p7 = por %p11198_p4, %p11197_p5 }
  0x37   : > { %p11193_p2 = pneg %p11192_p0 }
  0x39   : > { %p11200_p9 = pnand %p11199_p7, %p11193_p2 }
  0x3b   : > { %11203 = shalt.err (!%p11200_p9)
}
  0x3c   : > { %s13017_s17 = smov 128   ;;  %s13019_s16 = smov 8  }
  0x3d   : > { %9632 = dma.hbm_to_vmem [thread:$0]  (!%p11791_p6), %s13044_s2, 8192, %s11780_s29, [#allocation6], %s13017_s17, %s13017_s17, %s13019_s16  }
  0x3e   : > { %s13046_s3 = sld [smem:[#allocation39_spill]] }
  0x44   : > { %s11204_s13 = scalar_lea.hbm %s13046_s3, 8192 }
  0x45   : > { %p11205_p4 = scmp.ne.s32.totalorder %s13046_s3, %s11204_s13  ;;  %p11211_p12 = scmp.lt.u32.totalorder %s11204_s13, %s13046_s3 }
  0x47   : > { %p11207_p10 = pnand %p11205_p4, %p11807_p8 }
  0x49   : > { %p11208_p11 = pneg %p11207_p10 }
  0x4b   : > { %p11213_p13 = pnand %p11211_p12, %p11208_p11 }
  0x4d   : > { %11216 = shalt.err (!%p11213_p13)
}
  0x4e   : > { %s11217_s29 = scalar_lea.vmem %s11795_s19, 8192  ;;  %p11225_p7 = scmp.lt.s32.totalorder %s11795_s19, %s11795_s19 }
  0x4f   : > { %p11218_p0 = scmp.ne.s32.totalorder %s11795_s19, %s11217_s29  ;;  %p11226_p9 = scmp.lt.s32.totalorder %s11217_s29, %s11217_s29 }
  0x51   : > { %p11220_p2 = pnand %p11218_p0, %p11807_p8  ;;  %p11227_p4 = por %p11226_p9, %p11225_p7 }
  0x53   : > { %p11221_p5 = pneg %p11220_p2 }
  0x55   : > { %p11228_p10 = pnand %p11227_p4, %p11221_p5 }
  0x57   : > { %11231 = shalt.err (!%p11228_p10)
}
  0x58   : > { %9635 = dma.hbm_to_vmem [thread:$0]  (!%p11791_p6), %s13046_s3, 8192, %s11795_s19, [#allocation9], %s13017_s17, %s13017_s17, %s13019_s16  }
  0x59   : > { %s13047_s6 = sld [smem:[#allocation42_spill]] }
  0x5f   : > { %s11232_s22 = scalar_lea.hbm %s13047_s6, 16384 }
  0x60   : > { %p11233_p11 = scmp.ne.s32.totalorder %s13047_s6, %s11232_s22  ;;  %p11239_p0 = scmp.lt.u32.totalorder %s11232_s22, %s13047_s6 }
  0x62   : > { %p11235_p12 = pnand %p11233_p11, %p11807_p8 }
  0x64   : > { %p11236_p13 = pneg %p11235_p12 }
  0x66   : > { %p11241_p2 = pnand %p11239_p0, %p11236_p13 }
  0x68   : > { %11244 = shalt.err (!%p11241_p2)
}
  0x69   : > { %s11245_s29 = scalar_lea.vmem %s503_s21, 16384  ;;  %p11253_p4 = scmp.lt.s32.totalorder %s503_s21, %s503_s21 }
  0x6a   : > { %p11246_p5 = scmp.ne.s32.totalorder %s503_s21, %s11245_s29  ;;  %p11254_p10 = scmp.lt.s32.totalorder %s11245_s29, %s11245_s29 }
  0x6c   : > { %p11248_p7 = pnand %p11246_p5, %p11807_p8  ;;  %p11255_p1 = por %p11254_p10, %p11253_p4 }
  0x6e   : > { %p11249_p9 = pneg %p11248_p7 }
  0x70   : > { %p11256_p3 = pnand %p11255_p1, %p11249_p9 }
  0x72   : > { %11259 = shalt.err (!%p11256_p3)
}
  0x73   : > { %s13021_s19 = smov 256   ;;  %s13023_s4 = smov 16  }
  0x74   : > { %9641 = dma.hbm_to_vmem [thread:$0]  (!%p11791_p6), %s13047_s6, 16384, %s503_s21, [#allocation12], %s13021_s19, %s13021_s19, %s13023_s4  }
  0x75   : > { %s11651_s30 = smov [#allocation14]   ;;  %s11652_s23 = smov [#allocation17]  }
  0x76   : > { %s531_s22 = sshll.u32 %s11651_s30, 4  ;;  %s560_s28 = sshll.u32 %s11652_s23, 4  ;;  %s532_s22 = int_to_ptr.vmem [resolvable:$true] %s531_s22  ;;  %s561_s28 = int_to_ptr.vmem [resolvable:$true] %s560_s28 }
  0x77   : > { %s13048_s9 = sld [smem:[#allocation45_spill]] }
  0x7d   : > { %s11260_s29 = scalar_lea.hbm %s13048_s9, 8192 }
  0x7e   : > { %p11261_p1 = scmp.ne.s32.totalorder %s13048_s9, %s11260_s29  ;;  %p11267_p12 = scmp.lt.u32.totalorder %s11260_s29, %s13048_s9 }
  0x80   : > { %p11263_p3 = pnand %p11261_p1, %p11807_p8 }
  0x82   : > { %p11264_p11 = pneg %p11263_p3 }
  0x84   : > { %p11269_p13 = pnand %p11267_p12, %p11264_p11 }
  0x86   : > { %11272 = shalt.err (!%p11269_p13)
}
  0x87   : > { %s11273_s21 = scalar_lea.vmem %s532_s22, 8192  ;;  %p11281_p7 = scmp.lt.s32.totalorder %s532_s22, %s532_s22 }
  0x88   : > { %p11274_p0 = scmp.ne.s32.totalorder %s532_s22, %s11273_s21  ;;  %p11282_p9 = scmp.lt.s32.totalorder %s11273_s21, %s11273_s21 }
  0x8a   : > { %p11276_p2 = pnand %p11274_p0, %p11807_p8  ;;  %p11283_p4 = por %p11282_p9, %p11281_p7 }
  0x8c   : > { %p11277_p5 = pneg %p11276_p2 }
  0x8e   : > { %p11284_p10 = pnand %p11283_p4, %p11277_p5 }
  0x90   : > { %11287 = shalt.err (!%p11284_p10)
}
  0x91   : > { %s13049_s17 = smov 8   ;;  %s13050_s16 = smov 128  }
  0x92   : > { %9647 = dma.hbm_to_vmem [thread:$0]  (!%p11791_p6), %s13048_s9, 8192, %s532_s22, [#allocation15], %s13050_s16, %s13050_s16, %s13049_s17  }
  0x93   : > { %s11288_s30 = scalar_lea.hbm %s13004_s12, 16384 }
  0x94   : > { %p11289_p1 = scmp.ne.s32.totalorder %s13004_s12, %s11288_s30  ;;  %p11295_p12 = scmp.lt.u32.totalorder %s11288_s30, %s13004_s12 }
  0x96   : > { %p11291_p3 = pnand %p11289_p1, %p11807_p8 }
  0x98   : > { %p11292_p11 = pneg %p11291_p3 }
  0x9a   : > { %p11297_p13 = pnand %p11295_p12, %p11292_p11 }
  0x9c   : > { %11300 = shalt.err (!%p11297_p13)
}
  0x9d   : > { %s11301_s21 = scalar_lea.vmem %s561_s28, 16384  ;;  %p11309_p7 = scmp.lt.s32.totalorder %s561_s28, %s561_s28 }
  0x9e   : > { %p11302_p0 = scmp.ne.s32.totalorder %s561_s28, %s11301_s21  ;;  %p11310_p9 = scmp.lt.s32.totalorder %s11301_s21, %s11301_s21 }
  0xa0   : > { %p11304_p2 = pnand %p11302_p0, %p11807_p8  ;;  %p11311_p4 = por %p11310_p9, %p11309_p7 }
  0xa2   : > { %p11305_p5 = pneg %p11304_p2 }
  0xa4   : > { %p11312_p10 = pnand %p11311_p4, %p11305_p5 }
  0xa6   : > { %11315 = shalt.err (!%p11312_p10)
}
  0xa7   : > { %9653 = dma.hbm_to_vmem [thread:$0]  (!%p11791_p6), %s13004_s12, 16384, %s561_s28, [#allocation18], %s13021_s19, %s13021_s19, %s13023_s4  }
  0xa8   : > { %s11653_s3 = smov [#allocation10]   ;;  %s11654_s10 = smov [#allocation13]  }
  0xa9   : > { %s489_s7 = sshll.u32 %s11653_s3, 4  ;;  %s518_s30 = sshll.u32 %s11654_s10, 4  ;;  %s490_s7 = int_to_ptr.vmem [resolvable:$true] %s489_s7  ;;  %s519_s30 = int_to_ptr.vmem [resolvable:$true] %s518_s30 }
  0xaa   : > { %s13051_s5 = sld [smem:[#allocation41_spill]] }
  0xb0   : > { %s11316_s13 = scalar_lea.hbm %s13051_s5, 16384 }
  0xb1   : > { %p11317_p1 = scmp.ne.s32.totalorder %s13051_s5, %s11316_s13  ;;  %p11323_p12 = scmp.lt.u32.totalorder %s11316_s13, %s13051_s5 }
  0xb3   : > { %p11319_p3 = pnand %p11317_p1, %p11807_p8 }
  0xb5   : > { %p11320_p11 = pneg %p11319_p3 }
  0xb7   : > { %p11325_p13 = pnand %p11323_p12, %p11320_p11 }
  0xb9   : > { %11328 = shalt.err (!%p11325_p13)
}
  0xba   : > { %s11329_s28 = scalar_lea.vmem %s490_s7, 16384  ;;  %p11337_p7 = scmp.lt.s32.totalorder %s490_s7, %s490_s7 }
  0xbb   : > { %p11330_p0 = scmp.ne.s32.totalorder %s490_s7, %s11329_s28  ;;  %p11338_p9 = scmp.lt.s32.totalorder %s11329_s28, %s11329_s28 }
  0xbd   : > { %p11332_p2 = pnand %p11330_p0, %p11807_p8  ;;  %p11339_p4 = por %p11338_p9, %p11337_p7 }
  0xbf   : > { %p11333_p5 = pneg %p11332_p2 }
  0xc1   : > { %p11340_p10 = pnand %p11339_p4, %p11333_p5 }
  0xc3   : > { %11343 = shalt.err (!%p11340_p10)
}
  0xc4   : > { %9638 = dma.hbm_to_vmem [thread:$0]  (!%p11791_p6), %s13051_s5, 16384, %s490_s7, [#allocation9], %s13021_s19, %s13021_s19, %s13023_s4  }
  0xc5   : > { %s13052_s8 = sld [smem:[#allocation44_spill]] }
  0xcb   : > { %s11344_s23 = scalar_lea.hbm %s13052_s8, 8192 }
  0xcc   : > { %p11345_p1 = scmp.ne.s32.totalorder %s13052_s8, %s11344_s23  ;;  %p11351_p12 = scmp.lt.u32.totalorder %s11344_s23, %s13052_s8 }
  0xce   : > { %p11347_p3 = pnand %p11345_p1, %p11807_p8 }
  0xd0   : > { %p11348_p11 = pneg %p11347_p3 }
  0xd2   : > { %p11353_p13 = pnand %p11351_p12, %p11348_p11 }
  0xd4   : > { %11356 = shalt.err (!%p11353_p13)
}
  0xd5   : > { %s11357_s22 = scalar_lea.vmem %s519_s30, 8192  ;;  %p11365_p7 = scmp.lt.s32.totalorder %s519_s30, %s519_s30 }
  0xd6   : > { %p11358_p0 = scmp.ne.s32.totalorder %s519_s30, %s11357_s22  ;;  %p11366_p9 = scmp.lt.s32.totalorder %s11357_s22, %s11357_s22 }
  0xd8   : > { %p11360_p2 = pnand %p11358_p0, %p11807_p8  ;;  %p11367_p4 = por %p11366_p9, %p11365_p7 }
  0xda   : > { %p11361_p5 = pneg %p11360_p2 }
  0xdc   : > { %p11368_p10 = pnand %p11367_p4, %p11361_p5 }
  0xde   : > { %11371 = shalt.err (!%p11368_p10)
}
  0xdf   : > { %9644 = dma.hbm_to_vmem [thread:$0]  (!%p11791_p6), %s13052_s8, 8192, %s519_s30, [#allocation12], %s13050_s16, %s13050_s16, %s13049_s17  }
  0xe0   : > { %s11655_s6 = smov [#allocation16]   ;;  %s11656_s3 = smov [#allocation19]  }
  0xe1   : > { %s547_s2 = sshll.u32 %s11655_s6, 4  ;;  %s576_s10 = sshll.u32 %s11656_s3, 4  ;;  %s548_s2 = int_to_ptr.vmem [resolvable:$true] %s547_s2  ;;  %s577_s10 = int_to_ptr.vmem [resolvable:$true] %s576_s10 }
  0xe2   : > { %s11372_s13 = scalar_lea.hbm %s13003_s11, 16384 }
  0xe3   : > { %p11373_p1 = scmp.ne.s32.totalorder %s13003_s11, %s11372_s13  ;;  %p11379_p12 = scmp.lt.u32.totalorder %s11372_s13, %s13003_s11 }
  0xe5   : > { %p11375_p3 = pnand %p11373_p1, %p11807_p8 }
  0xe7   : > { %p11376_p11 = pneg %p11375_p3 }
  0xe9   : > { %p11381_p13 = pnand %p11379_p12, %p11376_p11 }
  0xeb   : > { %11384 = shalt.err (!%p11381_p13)
}
  0xec   : > { %s11385_s30 = scalar_lea.vmem %s548_s2, 16384  ;;  %p11393_p7 = scmp.lt.s32.totalorder %s548_s2, %s548_s2 }
  0xed   : > { %p11386_p0 = scmp.ne.s32.totalorder %s548_s2, %s11385_s30  ;;  %p11394_p9 = scmp.lt.s32.totalorder %s11385_s30, %s11385_s30 }
  0xef   : > { %p11388_p2 = pnand %p11386_p0, %p11807_p8  ;;  %p11395_p4 = por %p11394_p9, %p11393_p7 }
  0xf1   : > { %p11389_p5 = pneg %p11388_p2 }
  0xf3   : > { %p11396_p10 = pnand %p11395_p4, %p11389_p5 }
  0xf5   : > { %11399 = shalt.err (!%p11396_p10)
}
  0xf6   : > { %9650 = dma.hbm_to_vmem [thread:$0]  (!%p11791_p6), %s13003_s11, 16384, %s548_s2, [#allocation15], %s13021_s19, %s13021_s19, %s13023_s4  }
  0xf7   : > { %s11400_s20 = scalar_lea.hbm %s13006_s14, 4096 }
  0xf8   : > { %p11401_p1 = scmp.ne.s32.totalorder %s13006_s14, %s11400_s20  ;;  %p11407_p12 = scmp.lt.u32.totalorder %s11400_s20, %s13006_s14 }
  0xfa   : > { %p11403_p3 = pnand %p11401_p1, %p11807_p8 }
  0xfc   : > { %p11404_p11 = pneg %p11403_p3 }
  0xfe   : > { %p11409_p13 = pnand %p11407_p12, %p11404_p11 }
 0x100   : > { %11412 = shalt.err (!%p11409_p13)
}
 0x101   : > { %s11413_s7 = scalar_lea.vmem %s577_s10, 4096  ;;  %p11421_p7 = scmp.lt.s32.totalorder %s577_s10, %s577_s10 }
 0x102   : > { %p11414_p0 = scmp.ne.s32.totalorder %s577_s10, %s11413_s7  ;;  %p11422_p9 = scmp.lt.s32.totalorder %s11413_s7, %s11413_s7 }
 0x104   : > { %p11416_p2 = pnand %p11414_p0, %p11807_p8  ;;  %p11423_p4 = por %p11422_p9, %p11421_p7 }
 0x106   : > { %p11417_p5 = pneg %p11416_p2 }
 0x108   : > { %p11424_p10 = pnand %p11423_p4, %p11417_p5 }
 0x10a   : > { %11427 = shalt.err (!%p11424_p10)
}
 0x10b   : > { %9656 = dma.hbm_to_vmem [thread:$0]  (!%p11791_p6), %s13006_s14, 4096, %s577_s10, [#allocation18], %s13050_s16, %s13050_s16, %s13049_s17  }
 0x10c   : > { %s11657_s28 = smov [#allocation20]   ;;  %s11428_s20 = scalar_lea.hbm %s13007_s15, 4096 }
 0x10d   : > { %s589_s6 = sshll.u32 %s11657_s28, 4  ;;  %p11429_p1 = scmp.ne.s32.totalorder %s13007_s15, %s11428_s20  ;;  %s590_s6 = int_to_ptr.vmem [resolvable:$true] %s589_s6 }
 0x10e   : > { %p11435_p12 = scmp.lt.u32.totalorder %s11428_s20, %s13007_s15 }
 0x10f   : > { %p11431_p3 = pnand %p11429_p1, %p11807_p8 }
 0x111   : > { %p11432_p11 = pneg %p11431_p3 }
 0x113   : > { %p11437_p13 = pnand %p11435_p12, %p11432_p11 }
 0x115   : > { %11440 = shalt.err (!%p11437_p13)
}
 0x116   : > { %s11441_s10 = scalar_lea.vmem %s590_s6, 4096  ;;  %p11449_p7 = scmp.lt.s32.totalorder %s590_s6, %s590_s6 }
 0x117   : > { %p11442_p0 = scmp.ne.s32.totalorder %s590_s6, %s11441_s10  ;;  %p11450_p9 = scmp.lt.s32.totalorder %s11441_s10, %s11441_s10 }
 0x119   : > { %p11444_p2 = pnand %p11442_p0, %p11807_p8  ;;  %p11451_p4 = por %p11450_p9, %p11449_p7 }
 0x11b   : > { %p11445_p5 = pneg %p11444_p2 }
 0x11d   : > { %p11452_p10 = pnand %p11451_p4, %p11445_p5 }
 0x11f   : > { %11455 = shalt.err (!%p11452_p10)
}
 0x120   : > { %9659 = dma.hbm_to_vmem [thread:$0]  (!%p11791_p6), %s13007_s15, 4096, %s590_s6, [#allocation21], %s13050_s16, %s13050_s16, %s13049_s17  }
 0x121   : > { %s8419_s1 = sadd.s32 4294967294, %s11642_s27   ;;  %s12028_s18 = sadd.s32 1, %s11642_s27  }
 0x122   : > { %s49_s30 = ssub.s32 %s11642_s27, %s12028_s18  ;;  %s52_s28 = sadd.s32 1, %s11638_s26 }
 0x123   : > { %p50_p8 = scmp.eq.s32.totalorder %s49_s30, 0  ;;  %p59_p1 = scmp.ne.s32.totalorder %s11638_s26, %s11634_s25 }
 0x124   : > { %p60_p3 = scmp.eq.s32.totalorder %s11642_s27, 0  ;;  %p65_p11 = scmp.ne.s32.totalorder %s11634_s25, %s11630_s24 }
 0x125   : > { %s12039_s3 = scalar_select %p50_p8, %s11638_s26, %s52_s28  }
 0x126   : > { %p12041_p12 = por %p60_p3, %p59_p1  ;;  %p13054_p13 = scmp.eq.s32.totalorder %s11775_s0, 0 }
 0x127   : > { %p409_p0 = scmp.eq.s32.totalorder %s11775_s0, 1  ;;  %p415_p2 = scmp.eq.s32.totalorder %s8419_s1, 1 }
 0x128   : > { %p12047_p6 = por %p13054_p13, %p65_p11  ;;  %p9684_p5 = scmp.lt.s32.totalorder %s11642_s27, 2 }
 0x129   : > { %s603_s16 = sand.u32 1, %s11638_s26   ;;  %p12054_p7 = por %p409_p0, %p59_p1 }
 0x12a   : > { %p12058_p9 = por %p415_p2, %p65_p11  ;;  %s8432_s13 = sshll.u32 %s603_s16, 5 }
 0x12b   : > { %s13056_s6 = scalar_select %p12054_p7, 1, 0 }
 0x12c   : > { %s13057_s20 = scalar_select %p12058_p9, 1, 0 }
 0x12d   : > { %s9438_s29 = sshll.u32 %s11642_s27, 9  ;;  %s13058_s10 = sld [smem:[#allocation36_spill]] }
 0x12e   : > { %s607_s2 = scalar_lea.vmem [#allocation2], %s8432_s13  ;;  %p12072_p4 = pnand %p9684_p5, %p12041_p12 }
 0x12f   : > { %s615_s1 = sshll.u32 %s607_s2, 4  ;;  %s13060_s4 = sld [smem:[#allocation37_spill]]  ;;  %s12068_s1 = int_to_ptr.vmem [resolvable:$true] %s615_s1 }
 0x130   : > { %s629_s22 = scalar_lea.vmem [#allocation5], %s8432_s13  ;;  %s12083_s8 = scalar_lea.sflag [#allocation3], %s603_s16 }
 0x131   : > { %s12081_s5 = sshll.u32 %s629_s22, 4  ;;  %p11458_p8 = pneg %p12072_p4  ;;  %s12115_s5 = int_to_ptr.vmem [resolvable:$true] %s12081_s5 }
 0x133   : > { %s12066_s7 = scalar_lea.hbm %s13058_s10, %s9438_s29  ;;  %s11461_s19 = scalar_lea.hbm %s13058_s10, 1024 }
 0x134   : > { %s11456_s2 = scalar_lea.hbm %s12066_s7, 512  ;;  %p11462_p11 = scmp.lt.u32.totalorder %s12066_s7, %s13058_s10 }
 0x135   : > { %s12079_s21 = scalar_lea.hbm %s13060_s4, %s9438_s29  ;;  %p11457_p10 = scmp.ne.s32.totalorder %s12066_s7, %s11456_s2 }
 0x136   : > { %p11463_p12 = scmp.lt.u32.totalorder %s11461_s19, %s11456_s2  ;;  %p11465_p0 = scmp.lt.u32.totalorder %s11456_s2, %s12066_s7 }
 0x137   : > { %p11459_p1 = pnand %p11458_p8, %p11457_p10 }
 0x138   : > { %p11464_p13 = por %p11463_p12, %p11462_p11 }
 0x139   : > { %p11460_p3 = pneg %p11459_p1 }
 0x13a   : > { %p11466_p2 = por %p11465_p0, %p11464_p13 }
 0x13c   : > { %p11467_p5 = pnand %p11466_p2, %p11460_p3 }
 0x13e   : > { %11470 = shalt.err (!%p11467_p5)
}
 0x13f   : > { %s11471_s16 = scalar_lea.vmem %s12068_s1, 512  ;;  %s11658_s9 = smov [#allocation2]  }
 0x140   : > { %p11472_p10 = scmp.ne.s32.totalorder %s12068_s1, %s11471_s16  ;;  %s11476_s13 = sshll.u32 %s11658_s9, 4  ;;  %s11477_s13 = int_to_ptr.vmem [resolvable:$false] %s11476_s13 }
 0x141   : > { %s11478_s22 = scalar_lea.vmem %s11477_s13, 1024  ;;  %p11479_p7 = scmp.lt.s32.totalorder %s12068_s1, %s11477_s13 }
 0x142   : > { %p11474_p1 = pnand %p11472_p10, %p11458_p8  ;;  %p11480_p11 = scmp.lt.s32.totalorder %s11478_s22, %s11471_s16 }
 0x144   : > { %p11475_p9 = pneg %p11474_p1  ;;  %p11481_p12 = por %p11480_p11, %p11479_p7 }
 0x146   : > { %p11482_p13 = pnand %p11481_p12, %p11475_p9 }
 0x148   : > { %11485 = shalt.err (!%p11482_p13)
}
 0x149   : > { %s13061_s2 = smov 16   ;;  %s13062_s23 = smov 256  }
 0x14a   : > { %9663 = dma.hbm_to_vmem [thread:$0]  (!%p12072_p4), %s12066_s7, 512, %s12068_s1, %s12083_s8, %s13062_s23, %s13062_s23, %s13061_s2  }
 0x14b   : > { %s625_s19 = sand.u32 1, %s11642_s27   ;;  %s11486_s29 = scalar_lea.hbm %s12079_s21, 512 }
 0x14c   : > { %s12118_s28 = scalar_lea.sflag [#allocation6], %s625_s19  ;;  %p11487_p7 = scmp.ne.s32.totalorder %s12079_s21, %s11486_s29 }
 0x14d   : > { %s11491_s13 = scalar_lea.hbm %s13060_s4, 1024  ;;  %p11492_p0 = scmp.lt.u32.totalorder %s12079_s21, %s13060_s4 }
 0x14e   : > { %p11489_p9 = pnand %p11487_p7, %p11458_p8  ;;  %p11493_p2 = scmp.lt.u32.totalorder %s11491_s13, %s11486_s29 }
 0x14f   : > { %p11495_p10 = scmp.lt.u32.totalorder %s11486_s29, %s12079_s21 }
 0x150   : > { %p11490_p3 = pneg %p11489_p9  ;;  %p11494_p5 = por %p11493_p2, %p11492_p0 }
 0x152   : > { %p11496_p1 = por %p11495_p10, %p11494_p5 }
 0x154   : > { %p11497_p11 = pnand %p11496_p1, %p11490_p3 }
 0x156   : > { %11500 = shalt.err (!%p11497_p11)
}
 0x157   : > { %s11501_s8 = scalar_lea.vmem %s12115_s5, 512  ;;  %s11659_s7 = smov [#allocation5]  }
 0x158   : > { %p11502_p12 = scmp.ne.s32.totalorder %s12115_s5, %s11501_s8  ;;  %s11506_s1 = sshll.u32 %s11659_s7, 4  ;;  %s11507_s1 = int_to_ptr.vmem [resolvable:$false] %s11506_s1 }
 0x159   : > { %s11508_s10 = scalar_lea.vmem %s11507_s1, 1024  ;;  %p11509_p9 = scmp.lt.s32.totalorder %s12115_s5, %s11507_s1 }
 0x15a   : > { %p11504_p13 = pnand %p11502_p12, %p11458_p8  ;;  %p11510_p0 = scmp.lt.s32.totalorder %s11508_s10, %s11501_s8 }
 0x15c   : > { %p11505_p7 = pneg %p11504_p13  ;;  %p11511_p2 = por %p11510_p0, %p11509_p9 }
 0x15e   : > { %p11512_p5 = pnand %p11511_p2, %p11505_p7 }
 0x160   : > { %11515 = shalt.err (!%p11512_p5)
}
 0x161   : > { %9666 = dma.hbm_to_vmem [thread:$0]  (!%p12072_p4), %s12079_s21, 512, %s12115_s5, %s12118_s28, %s13062_s23, %s13062_s23, %s13061_s2  }
 0x162   : > { %s13063_s19 = sld [smem:[#allocation35_spill]] }
 0x168   : > { %p13064_p8 = scmp.ne.s32.totalorder %s13063_s19, 0 }
 0x169   : > { %s12150_s29 = sand.u32 (!%p13064_p8), 1, %s11634_s25  }
 0x16a   : > { %649 = sbr.rel (%p13064_p8) target bundleno = 2449 (0x991), region = 84  ;;  %s12153_s16 = sshll.u32 (!%p13064_p8), %s12150_s29, 5 }
 0x16b   : > { %s652_s30 = scalar_lea.sflag (!%p13064_p8), [#allocation3], %s12150_s29  ;;  %s12157_s9 = scalar_lea.vmem (!%p13064_p8), [#allocation2], %s12153_s16 }
 0x171   : > { %11589 = dma.done.wait (%p12047_p6), %s652_s30, 512  }
 0x172   : > { %11591 = vsyncadd (%p12047_p6), %s652_s30, 4294966784  ;;  %s660_s5 = sand.u32 1, %s11775_s0   ;;  %s12165_s2 = scalar_lea.vmem [#allocation5], %s12153_s16 }
 0x173   : > { %s661_s21 = scalar_lea.sflag [#allocation6], %s660_s5 }
 0x174   : > { %11593 = dma.done.wait (%p12047_p6), %s661_s21, 512  }
 0x175   : > { %11595 = vsyncadd (%p12047_p6), %s661_s21, 4294966784  ;;  %p13065_p4 = scmp.eq.s32.totalorder %s11775_s0, 0 }
 0x177   : > { %11597 = dma.done.wait (%p13065_p4), [#allocation6], 8192   ;;  %p13066_p3 = pmov %p13065_p4 }
 0x179   : > { %11599 = vsyncadd (%p13066_p3), [#allocation6], 4294959104  ;;  %p13067_p10 = pmov %p13066_p3 }
 0x17a   : > { %p13068_p1 = pmov %p13066_p3 }
 0x17b   : > { %11601 = dma.done.wait (%p13067_p10), [#allocation9], 24576  }
 0x17c   : > { %11603 = vsyncadd (%p13068_p1), [#allocation9], 4294942720  ;;  %p13069_p11 = pmov %p13068_p1 }
 0x17d   : > { %p13070_p12 = pmov %p13068_p1 }
 0x17e   : > { %11605 = dma.done.wait (%p13069_p11), [#allocation12], 24576  }
 0x17f   : > { %11607 = vsyncadd (%p13070_p12), [#allocation12], 4294942720  ;;  %p13071_p6 = pmov %p13068_p1 }
 0x180   : > { %p13072_p13 = pmov %p13068_p1 }
 0x181   : > { %11609 = dma.done.wait (%p13071_p6), [#allocation15], 24576  }
 0x182   : > { %11611 = vsyncadd (%p13072_p13), [#allocation15], 4294942720  ;;  %p13073_p7 = pmov %p13068_p1 }
 0x183   : > { %p13074_p9 = pmov %p13068_p1 }
 0x184   : > { %11613 = dma.done.wait (%p13073_p7), [#allocation18], 20480  }
 0x185   : > { %11615 = vsyncadd (%p13074_p9), [#allocation18], 4294946816  ;;  %p13075_p0 = pmov %p13068_p1 }
 0x187   : > { %11617 = dma.done.wait (%p13075_p0), [#allocation21], 4096   ;;  %p13076_p2 = pmov %p13075_p0 }
 0x188   : > { %v9744_v0 = vld [vmem:[#allocation8 + $0x4] ss:$8 sps:$4 sm:$0xff]   ;;  %v9746_v1 = vld [vmem:[#allocation8] ss:$8 sps:$4 sm:$0xff]   ;;  %v9747_v2 = vld [vmem:[#allocation8 + $0x14] ss:$8 sps:$4 sm:$0xff]  }
 0x189   : > { %11619 = vsyncadd (%p13076_p2), [#allocation21], 4294963200  ;;  %1150 = vmatprep.subr.bf16.mxu0 %v9744_v0  ;;  %v9749_v3 = vld [vmem:[#allocation8 + $0x10] ss:$8 sps:$4 sm:$0xff]   ;;  %v9750_v4 = vld [vmem:[#allocation8 + $0x24] ss:$8 sps:$4 sm:$0xff]  }
 0x18a   : > { %1151 = vmatpush1.bf16.msra.mxu0 %v9746_v1  ;;  %v9752_v5 = vld [vmem:[#allocation8 + $0x20] ss:$8 sps:$4 sm:$0xff]   ;;  %v9753_v6 = vld [vmem:[#allocation8 + $0x34] ss:$8 sps:$4 sm:$0xff]   ;;  %v9755_v7 = vld [vmem:[#allocation8 + $0x30] ss:$8 sps:$4 sm:$0xff]  }
 0x18b   : > { %1152 = vmatprep.subr.bf16.mxu0 %v9747_v2  ;;  %v9756_v8 = vld [vmem:[#allocation8 + $0x44] ss:$8 sps:$4 sm:$0xff]   ;;  %v9758_v9 = vld [vmem:[#allocation8 + $0x40] ss:$8 sps:$4 sm:$0xff]   ;;  %v9759_v10 = vld [vmem:[#allocation8 + $0x54] ss:$8 sps:$4 sm:$0xff]  }
 0x18c   : > { %v9761_v11 = vld [vmem:[#allocation8 + $0x50] ss:$8 sps:$4 sm:$0xff]   ;;  %v9762_v12 = vld [vmem:[#allocation8 + $0x64] ss:$8 sps:$4 sm:$0xff]   ;;  %vm789_vm0 = vcmask 1040384   ;;  %s13079_s28 = sld [smem:[#allocation40_spill]] }
 0x18d   : > { %v769_v13 = vld [vmem:[%s12157_s9] sm:$0xff]  ;;  %v770_v14 = vld [vmem:[%s12157_s9 + $0x8] sm:$0xff]  ;;  %v771_v15 = vld [vmem:[%s12157_s9 + $0x10] sm:$0xff]  ;;  %vm1408_vm13 = vsmask.f32 3328  ;;  %s13080_s8 = sld [smem:[#allocation43_spill]] }
 0x18e   : > { %1153 = vmatpush1.bf16.msra.mxu0 %v9749_v3  ;;  %v772_v16 = vld [vmem:[%s12157_s9 + $0x18] sm:$0xff]  ;;  %v12199_v17 = vrot.slane %v769_v13, 7  ;;  %v12201_v18 = vrot.slane %v770_v14, 7  ;;  %v9764_v19 = vld [vmem:[#allocation8 + $0x60] ss:$8 sps:$4 sm:$0xff]   ;;  %v12203_v20 = vrot.slane %v771_v15, 7 }
 0x18f   : > { %1154 = vmatprep.subr.bf16.mxu0 %v9750_v4  ;;  %v12205_v21 = vrot.slane %v772_v16, 7  ;;  %v9765_v22 = vld [vmem:[#allocation8 + $0x74] ss:$8 sps:$4 sm:$0xff]   ;;  %v9767_v31 = vld [vmem:[#allocation8 + $0x70] ss:$8 sps:$4 sm:$0xff]   ;;  %s12694_s7 = scalar_lea.vmem [#allocation22], %s12153_s16 }
 0x190   : > { %v12209_v23 = vsel %vm789_vm0, 0.0, %v12199_v17  ;;  %v12213_v24 = vsel %vm789_vm0, 0.0, %v12201_v18  ;;  %v12217_v25 = vsel %vm789_vm0, 0.0, %v12203_v20  ;;  %v9768_v34 = vld [vmem:[#allocation8 + $0x84] ss:$8 sps:$4 sm:$0xff]   ;;  %v804_v3 = vmin.f32 %v12199_v17, 0.0 }
 0x191   : > { %v12221_v26 = vsel %vm789_vm0, 0.0, %v12205_v21  ;;  %v846_v27 = vsub.f32 0.0, %v12209_v23  ;;  %v847_v28 = vsub.f32 0.0, %v12213_v24  ;;  %v850_v29 = vsub.f32 0.0, %v12217_v25  ;;  %v9770_v41 = vld [vmem:[#allocation8 + $0x80] ss:$8 sps:$4 sm:$0xff]  }
 0x192   : > { %1155 = vmatpush1.bf16.msra.mxu0 %v9752_v5  ;;  %v851_v30 = vsub.f32 0.0, %v12221_v26  ;;  %v9771_v42 = vld [vmem:[#allocation8 + $0x94] ss:$8 sps:$4 sm:$0xff]   ;;  %v9773_v43 = vld [vmem:[#allocation8 + $0x90] ss:$8 sps:$4 sm:$0xff]   ;;  %v802_v44 = vmin.f32 %v12209_v23, 0.0 }
 0x193   : > { %1156 = vmatprep.subr.bf16.mxu0 %v9753_v6  ;;  %v862_v32 = vmin.f32 %v846_v27, 0.0  ;;  %v863_v33 = vmin.f32 %v847_v28, 0.0  ;;  %v866_v35 = vmin.f32 %v850_v29, 0.0  ;;  %v9774_v45 = vld [vmem:[#allocation8 + $0xa4] ss:$8 sps:$4 sm:$0xff]   ;;  %v803_v46 = vmin.f32 %v12213_v24, 0.0 }
 0x194   : > { %v867_v36 = vmin.f32 %v851_v30, 0.0  ;;  %v9776_v47 = vld [vmem:[#allocation8 + $0xa0] ss:$8 sps:$4 sm:$0xff]   ;;  %v810_v48 = vmul.f32 1.442695, %v802_v44  ;;  %vm854_vm1 = vcmp.gt.f32.partialorder %v846_v27, 0.0 }
 0x195   : > { %v870_v37 = vmul.f32 1.442695, %v862_v32  ;;  %v872_v38 = vmul.f32 1.442695, %v863_v33  ;;  %v878_v39 = vmul.f32 1.442695, %v866_v35 }
 0x196   : > { %1157 = vmatpush1.bf16.msra.mxu0 %v9755_v7  ;;  %v880_v40 = vmul.f32 1.442695, %v867_v36  ;;  %v9777_v49 = vld [vmem:[#allocation8 + $0xb4] ss:$8 sps:$4 sm:$0xff]   ;;  %v9779_v51 = vld [vmem:[#allocation8 + $0xb0] ss:$8 sps:$4 sm:$0xff]  }
 0x197   : > { %1158 = vmatprep.subr.bf16.mxu0 %v9756_v8  ;;  %10992 = vpow2.f32 %v870_v37  ;;  %v812_v52 = vmul.f32 1.442695, %v803_v46  ;;  %v9780_v54 = vld [vmem:[#allocation8 + $0xc4] ss:$8 sps:$4 sm:$0xff]   ;;  %vm855_vm2 = vcmp.gt.f32.partialorder %v847_v28, 0.0  ;;  %v806_v58 = vmin.f32 %v12217_v25, 0.0 }
 0x198   : > { %10994 = vpow2.f32 %v872_v38  ;;  %v807_v59 = vmin.f32 %v12221_v26, 0.0  ;;  %vm858_vm3 = vcmp.gt.f32.partialorder %v850_v29, 0.0  ;;  %vm859_vm4 = vcmp.gt.f32.partialorder %v851_v30, 0.0  ;;  %v9782_v1 = vld [vmem:[#allocation8 + $0xc0] ss:$8 sps:$4 sm:$0xff]   ;;  %s13081_s19 = sld [smem:[#allocation46_spill]] }
 0x199   : > { %10996 = vpow2.f32 %v878_v39  ;;  %v805_v4 = vmin.f32 %v12201_v18, 0.0  ;;  %v818_v7 = vmul.f32 1.442695, %v806_v58  ;;  %v9785_v13 = vld [vmem:[#allocation8 + $0xd0] ss:$8 sps:$4 sm:$0xff]   ;;  %vm794_vm5 = vcmp.gt.f32.partialorder %v12209_v23, 0.0 }
 0x19a   : > { %1159 = vmatpush1.bf16.msra.mxu0 %v9758_v9  ;;  %10998 = vpow2.f32 %v880_v40  ;;  %v820_v8 = vmul.f32 1.442695, %v807_v59  ;;  %v9783_v9 = vld [vmem:[#allocation8 + $0xd4] ss:$8 sps:$4 sm:$0xff]   ;;  %v9786_v15 = vld [vmem:[#allocation8 + $0xe4] ss:$8 sps:$4 sm:$0xff]  }
 0x19b   : > { %1160 = vmatprep.subr.bf16.mxu0 %v9759_v10  ;;  %11000 = vpow2.f32 %v810_v48  ;;  %v816_v14 = vmul.f32 1.442695, %v805_v4  ;;  %vm795_vm6 = vcmp.gt.f32.partialorder %v12213_v24, 0.0  ;;  %vm798_vm7 = vcmp.gt.f32.partialorder %v12217_v25, 0.0  ;;  %v9794_v32 = vld [vmem:[#allocation7 + $0x4] ss:$8 sps:$4 sm:$0xff]  }
 0x19c   : > { %11002 = vpow2.f32 %v812_v52  ;;  %vm799_vm8 = vcmp.gt.f32.partialorder %v12221_v26, 0.0  ;;  %v808_v36 = vmin.f32 %v12203_v20, 0.0  ;;  %v809_v37 = vmin.f32 %v12205_v21, 0.0  ;;  %v9797_v44 = vld [vmem:[#allocation7 + $0x14] ss:$8 sps:$4 sm:$0xff]   ;;  %s9494_s30 = sshll.u32 %s11775_s0, 9 }
 0x19d   : > { %11004 = vpow2.f32 %v818_v7  ;;  %vm796_vm9 = vcmp.gt.f32.partialorder %v12199_v17, 0.0  ;;  %vm797_vm10 = vcmp.gt.f32.partialorder %v12201_v18, 0.0  ;;  %v9803_v58 = vld [vmem:[#allocation7 + $0x34] ss:$8 sps:$4 sm:$0xff]   ;;  %vm800_vm11 = vcmp.gt.f32.partialorder %v12203_v20, 0.0  ;;  %s13082_s21 = sld [smem:[#allocation48_spill]] }
 0x19e   : > { %1161 = vmatpush1.bf16.msra.mxu0 %v9761_v11  ;;  %11006 = vpow2.f32 %v820_v8  ;;  %v822_v48 = vmul.f32 1.442695, %v808_v36  ;;  %vm801_vm12 = vcmp.gt.f32.partialorder %v12205_v21, 0.0  ;;  %vm1409_vm14 = vsmask.f32 7440  ;;  %s8179_s23 = sshll.u32 %s12694_s7, 4  ;;  %s12895_s23 = int_to_ptr.vmem [resolvable:$true] %s8179_s23 }
 0x19f   : > { %1162 = vmatprep.subr.bf16.mxu0 %v9762_v12  ;;  %v814_v12 = vmul.f32 1.442695, %v804_v3  ;;  %vm12267_vm15 = vmor %vm1408_vm13, %vm1409_vm14  ;;  %v9810_v36 = vld [vmem:[#allocation7 + $0x60] ss:$8 sps:$4 sm:$0xff]   ;;  %s11516_s13 = scalar_lea.vmem %s12895_s23, 512  ;;  %p13083_p8 = scmp.ne.s32.totalorder %s13056_s6, 0 }
 0x1a0   : > { %p11517_p5 = scmp.ne.s32.totalorder %s12895_s23, %s11516_s13  ;;  %s11660_s22 = smov [#allocation22]  }
 0x1a1   : > { %v10993_v50 = vpop.eup %10992  ;;  %11008 = vpow2.f32 %v814_v12  ;;  %v9809_v12 = vld [vmem:[#allocation7 + $0x54] ss:$8 sps:$4 sm:$0xff]  }
 0x1a2   : > { %1163 = vmatpush1.bf16.msra.mxu0 %v9764_v19  ;;  %v10995_v53 = vpop.eup %10994  ;;  %v8463_v55 = vadd.f32 -1.0, %v10993_v50  ;;  %11010 = vpow2.f32 %v816_v14  ;;  %p11518_p4 = pnand %p11517_p5, %p13083_p8 }
 0x1a3   : > { %1164 = vmatprep.subr.bf16.mxu0 %v9765_v22  ;;  %v10997_v56 = vpop.eup %10996  ;;  %v8464_v57 = vadd.f32 -1.0, %v10995_v53  ;;  %v9788_v22 = vld [vmem:[#allocation8 + $0xe0] ss:$8 sps:$4 sm:$0xff]   ;;  %11012 = vpow2.f32 %v822_v48  ;;  %v848_v48 = vsub.f32 0.0, %v12199_v17  ;;  %s12892_s17 = scalar_lea.hbm %s13082_s21, %s9494_s30 }
 0x1a4   : > { %v10999_v60 = vpop.eup %10998  ;;  %v8467_v61 = vadd.f32 -1.0, %v10997_v56  ;;  %v12231_v63 = vsel %vm854_vm1, %v846_v27, %v8463_v55  ;;  %v9789_v27 = vld [vmem:[#allocation8 + $0xf4] ss:$8 sps:$4 sm:$0xff]   ;;  %v9798_v55 = vld [vmem:[#allocation7 + $0x20] ss:$8 sps:$4 sm:$0xff]   ;;  %p11519_p3 = pneg %p11518_p4 }
 0x1a5   : > { %v8468_v62 = vadd.f32 -1.0, %v10999_v60  ;;  %v895_v0 = vsel %vm855_vm2, %v847_v28, %v8464_v57  ;;  %v11001_v16 = vpop.eup %11000  ;;  %vm856_vm1 = vcmp.gt.f32.partialorder %v848_v48, 0.0 }
 0x1a6   : > { %1165 = vmatpush1.bf16.msra.mxu0 %v9767_v31  ;;  %v12234_v2 = vpack.c.bf16 %v895_v0, %v12231_v63  ;;  %v898_v5 = vsel %vm858_vm3, %v850_v29, %v8467_v61  ;;  %v11003_v19 = vpop.eup %11002  ;;  %v8455_v28 = vadd.f32 -1.0, %v11001_v16  ;;  %v9791_v31 = vld [vmem:[#allocation8 + $0xf0] ss:$8 sps:$4 sm:$0xff]  }
 0x1a7   : > { %1166 = vmatprep.subr.bf16.mxu0 %v9768_v34  ;;  %v899_v6 = vsel %vm859_vm4, %v851_v30, %v8468_v62  ;;  %v8456_v29 = vadd.f32 -1.0, %v11003_v19  ;;  %v11005_v30 = vpop.eup %11004  ;;  %v9441_v38 = vpack.c.bf16 %v898_v5, %v12231_v63  ;;  %v9807_v16 = vld [vmem:[#allocation7 + $0x50] ss:$8 sps:$4 sm:$0xff]  }
 0x1a8   : > { %v9442_v10 = vpack.c.bf16 %v899_v6, %v895_v0  ;;  %v12238_v11 = vpack.c.bf16 %v899_v6, %v898_v5  ;;  %v8459_v33 = vadd.f32 -1.0, %v11005_v30  ;;  %v12244_v34 = vsel %vm794_vm5, %v12209_v23, %v8455_v28  ;;  %v11007_v35 = vpop.eup %11006  ;;  %v9801_v0 = vld [vmem:[#allocation7 + $0x30] ss:$8 sps:$4 sm:$0xff]   ;;  %v9804_v6 = vld [vmem:[#allocation7 + $0x40] ss:$8 sps:$4 sm:$0xff]  }
 0x1a9   : > { %v8460_v39 = vadd.f32 -1.0, %v11007_v35  ;;  %v835_v40 = vsel %vm795_vm6, %v12213_v24, %v8456_v29  ;;  %v824_v24 = vmul.f32 1.442695, %v809_v37  ;;  %v9812_v29 = vld [vmem:[#allocation7 + $0x64] ss:$8 sps:$4 sm:$0xff]  }
 0x1aa   : > { %1167 = vmatpush1.bf16.msra.mxu0 %v9770_v41  ;;  %1182 = vmatprep.mubr.bf16.mxu0 %v9442_v10  ;;  %v12252_v41 = vsel %vm798_vm7, %v12217_v25, %v8459_v33  ;;  %v9795_v25 = vld [vmem:[#allocation7 + $0x10] ss:$8 sps:$4 sm:$0xff]   ;;  %v9815_v37 = vld [vmem:[#allocation7 + $0x74] ss:$8 sps:$4 sm:$0xff]  }
 0x1ab   : > { %1168 = vmatprep.subr.bf16.mxu0 %v9771_v42  ;;  %v9792_v42 = vld [vmem:[#allocation7] ss:$8 sps:$4 sm:$0xff]   ;;  %v9443_v23 = vpack.c.bf16 %v12252_v41, %v12244_v34  ;;  %11014 = vpow2.f32 %v824_v24  ;;  %v852_v24 = vsub.f32 0.0, %v12203_v20  ;;  %v10682_v30 = vld [vmem:[#allocation17 + $0x10c] ss:$16 sps:$4 sm:$0xff]  }
 0x1ad   : > { %vm860_vm3 = vcmp.gt.f32.partialorder %v852_v24, 0.0 }
 0x1ae   : > { %1169 = vmatpush1.bf16.msra.mxu0 %v9773_v43  ;;  %v11009_v43 = vpop.eup %11008 }
 0x1af   : > { %1170 = vmatprep.subr.bf16.mxu0 %v9774_v45  ;;  %v839_v45 = vsel %vm799_vm8, %v12221_v26, %v8460_v39  ;;  %v11011_v46 = vpop.eup %11010  ;;  %v8457_v50 = vadd.f32 -1.0, %v11009_v43  ;;  %v9818_v43 = vld [vmem:[#allocation7 + $0x84] ss:$8 sps:$4 sm:$0xff]  }
 0x1b0   : > { %v9447_v52 = vpack.c.bf16 %v839_v45, %v12252_v41  ;;  %v8458_v26 = vadd.f32 -1.0, %v11011_v46  ;;  %v11013_v5 = vpop.eup %11012  ;;  %v9819_v46 = vld [vmem:[#allocation7 + $0x90] ss:$8 sps:$4 sm:$0xff]   ;;  %v9846_v41 = vld [vmem:[#allocation7 + $0x120] ss:$8 sps:$4 sm:$0xff]  }
 0x1b1   : > { %v836_v56 = vsel %vm796_vm9, %v12199_v17, %v8457_v50  ;;  %v8461_v8 = vadd.f32 -1.0, %v11013_v5  ;;  %v864_v50 = vmin.f32 %v848_v48, 0.0  ;;  %v9825_v17 = vld [vmem:[#allocation7 + $0xb0] ss:$8 sps:$4 sm:$0xff]  }
 0x1b2   : > { %1171 = vmatpush1.bf16.msra.mxu0 %v9776_v47  ;;  %v9444_v47 = vpack.c.bf16 %v839_v45, %v835_v40  ;;  %v837_v57 = vsel %vm797_vm10, %v12201_v18, %v8458_v26  ;;  %v1426_v59 = vshrl.u32 %v9447_v52, 16  ;;  %v1429_v60 = vshll.u32 %v9447_v52, 16  ;;  %v9821_v45 = vld [vmem:[#allocation7 + $0x94] ss:$8 sps:$4 sm:$0xff]  }
 0x1b3   : > { %1172 = vmatprep.subr.bf16.mxu0 %v9777_v49  ;;  %v9445_v49 = vpack.c.bf16 %v835_v40, %v12244_v34  ;;  %v9446_v63 = vpack.c.bf16 %v837_v57, %v836_v56  ;;  %v840_v14 = vsel %vm800_vm11, %v12203_v20, %v8461_v8  ;;  %v868_v52 = vmin.f32 %v852_v24, 0.0  ;;  %v9828_v20 = vld [vmem:[#allocation7 + $0xc0] ss:$8 sps:$4 sm:$0xff]  }
 0x1b4   : > { %v1428_v3 = vrot.slane %v1426_v59, 4  ;;  %v1431_v4 = vrot.slane %v1429_v60, 5  ;;  %v1448_v59 = vshrl.u32 %v12234_v2, 16  ;;  %v1451_v60 = vshll.u32 %v12234_v2, 16  ;;  %v9834_v8 = vld [vmem:[#allocation7 + $0xe0] ss:$8 sps:$4 sm:$0xff]  }
 0x1b5   : > { %v1412_v53 = vshrl.u32 %v9445_v49, 16  ;;  %v11015_v7 = vpop.eup %11014  ;;  %v1421_v10 = vshll.u32 %v9446_v63, 16  ;;  %v882_v57 = vmul.f32 1.442695, %v868_v52  ;;  %v9831_v63 = vld [vmem:[#allocation7 + $0xd0] ss:$8 sps:$4 sm:$0xff]  }
 0x1b6   : > { %1173 = vmatpush1.bf16.msra.mxu0 %v9779_v51  ;;  %v9800_v51 = vld [vmem:[#allocation7 + $0x24] ss:$8 sps:$4 sm:$0xff]   ;;  %v9843_v52 = vld [vmem:[#allocation7 + $0x110] ss:$8 sps:$4 sm:$0xff]  }
 0x1b7   : > { %1174 = vmatprep.subr.bf16.mxu0 %v9780_v54  ;;  %v1415_v54 = vshll.u32 %v9445_v49, 16  ;;  %v1414_v61 = vrot.slane %v1412_v53, 4  ;;  %v1423_v28 = vrot.slane %v1421_v10, 5  ;;  %v849_v49 = vsub.f32 0.0, %v12201_v18  ;;  %v9822_v53 = vld [vmem:[#allocation7 + $0xa0] ss:$8 sps:$4 sm:$0xff]  }
 0x1b8   : > { %v9830_v18 = vld [vmem:[#allocation7 + $0xc4] ss:$8 sps:$4 sm:$0xff]   ;;  %v9944_v34 = vld [vmem:[#allocation10 + $0x28] ss:$16 sps:$4 sm:$0xff]  }
 0x1b9   : > { %v1417_v62 = vrot.slane %v1415_v54, 5  ;;  %v9827_v54 = vld [vmem:[#allocation7 + $0xb4] ss:$8 sps:$4 sm:$0xff]   ;;  %vm857_vm2 = vcmp.gt.f32.partialorder %v849_v49, 0.0 }
 0x1ba   : > { %1175 = vmatpush1.bf16.msra.mxu0 %v9782_v1  ;;  %v9806_v1 = vld [vmem:[#allocation7 + $0x44] ss:$8 sps:$4 sm:$0xff]  }
 0x1bb   : > { %1176 = vmatprep.subr.bf16.mxu0 %v9783_v9  ;;  %v1418_v9 = vor.u32 %v1417_v62, %v1414_v61  ;;  %v1462_v61 = vshrl.u32 %v12238_v11, 16  ;;  %v1465_v62 = vshll.u32 %v12238_v11, 16 }
 0x1be   : > { %1177 = vmatpush1.bf16.msra.mxu0 %v9785_v13  ;;  %v8462_v13 = vadd.f32 -1.0, %v11015_v7  ;;  %v1467_v7 = vrot.slane %v1465_v62, 5  ;;  %v9968_v62 = vld [vmem:[#allocation10 + $0xa8] ss:$16 sps:$4 sm:$0xff]  }
 0x1bf   : > { %1178 = vmatprep.subr.bf16.mxu0 %v9786_v15  ;;  %v1432_v15 = vor.u32 %v1431_v4, %v1428_v3  ;;  %v1450_v3 = vrot.slane %v1448_v59, 4  ;;  %v1453_v4 = vrot.slane %v1451_v60, 5  ;;  %v9855_v59 = vld [vmem:[#allocation7 + $0x150] ss:$8 sps:$4 sm:$0xff]   ;;  %v9860_v60 = vld [vmem:[#allocation7 + $0x164] ss:$8 sps:$4 sm:$0xff]  }
 0x1c0   : > { %v841_v19 = vsel %vm801_vm12, %v12205_v21, %v8462_v13 }
 0x1c2   : > { %1179 = vmatpush1.bf16.msra.mxu0 %v9788_v22  ;;  %v9448_v22 = vpack.c.bf16 %v841_v19, %v840_v14 }
 0x1c3   : > { %1180 = vmatprep.subr.bf16.mxu0 %v9789_v27  ;;  %v1419_v27 = vrot.slane %v1418_v9, 4 }
 0x1c5   : > { %v12273_v33 = vsel %vm12267_vm15, %v1419_v27, %v1423_v28 }
 0x1c6   : > { %1181 = vmatpush1.bf16.msra.mxu0 %v9791_v31  ;;  %v1433_v31 = vrot.slane %v1432_v15, 4  ;;  %v1454_v15 = vor.u32 %v1453_v4, %v1450_v3  ;;  %v9974_v3 = vld [vmem:[#allocation10 + $0xc8] ss:$16 sps:$4 sm:$0xff]  }
 0x1c7   : > { %1357 = vmatprep.subr.bf16.mxu0 %v9794_v32  ;;  %v1435_v32 = vshll.u32 %v9448_v22, 16  ;;  %v9861_v4 = vld [vmem:[#allocation7 + $0x170] ss:$8 sps:$4 sm:$0xff]  }
 0x1c9   : > { %1183 = vmatmul.mubr.bf16.vlgmr.msra.gmra.mrb[0].mxu0 %v9441_v38  ;;  %v1437_v35 = vrot.slane %v1435_v32, 5  ;;  %v9842_v32 = vld [vmem:[#allocation7 + $0x104] ss:$8 sps:$4 sm:$0xff]  }
 0x1ca   : > { %1358 = vmatpush1.bf16.msra.mxu0 %v9792_v42  ;;  %1389 = vmatprep.mubr.bf16.mxu0 %v9444_v47  ;;  %v9813_v42 = vld [vmem:[#allocation7 + $0x70] ss:$8 sps:$4 sm:$0xff]   ;;  %v9824_v47 = vld [vmem:[#allocation7 + $0xa4] ss:$8 sps:$4 sm:$0xff]  }
 0x1cb   : > { %1359 = vmatprep.subr.bf16.mxu0 %v9797_v44  ;;  %v12277_v38 = vsel %vm12267_vm15, %v1433_v31, %v1437_v35  ;;  %v9816_v44 = vld [vmem:[#allocation7 + $0x80] ss:$8 sps:$4 sm:$0xff]   ;;  %v9837_v31 = vld [vmem:[#allocation7 + $0xf0] ss:$8 sps:$4 sm:$0xff]  }
 0x1cc   : > { %v8547_v39 = vcombine.low %v12273_v33, %v12277_v38  ;;  %v8548_v40 = vcombine.high %v12273_v33, %v12277_v38  ;;  %v9903_v33 = vld [vmem:[#allocation8 + $0x150] ss:$8 sps:$4 sm:$0xff]   ;;  %v9908_v38 = vld [vmem:[#allocation8 + $0x164] ss:$8 sps:$4 sm:$0xff]  }
 0x1ce   : > { %1360 = vmatpush1.bf16.msra.mxu0 %v9795_v25  ;;  %v853_v25 = vsub.f32 0.0, %v12205_v21  ;;  %v9833_v21 = vld [vmem:[#allocation7 + $0xd4] ss:$8 sps:$4 sm:$0xff]  }
 0x1cf   : > { %1361 = vmatprep.subr.bf16.mxu0 %v9800_v51  ;;  %v865_v51 = vmin.f32 %v849_v49, 0.0 }
 0x1d0   : > { %v869_v26 = vmin.f32 %v853_v25, 0.0  ;;  %vm861_vm4 = vcmp.gt.f32.partialorder %v853_v25, 0.0 }
 0x1d1   : > { %v876_v56 = vmul.f32 1.442695, %v865_v51  ;;  %v9938_v51 = vld [vmem:[#allocation10 + $0x8] ss:$16 sps:$4 sm:$0xff]  }
 0x1d2   : > { %1362 = vmatpush1.bf16.msra.mxu0 %v9798_v55  ;;  %v874_v55 = vmul.f32 1.442695, %v864_v50  ;;  %v9936_v50 = vld [vmem:[#allocation10 + $0xc] ss:$16 sps:$4 sm:$0xff]  }
 0x1d3   : > { %1363 = vmatprep.subr.bf16.mxu0 %v9803_v58  ;;  %v884_v58 = vmul.f32 1.442695, %v869_v26  ;;  %v9942_v26 = vld [vmem:[#allocation10 + $0x2c] ss:$16 sps:$4 sm:$0xff]   ;;  %3036 = vmatprep.subr.bf16.mxu1 %v9936_v50  ;;  %v9900_v50 = vld [vmem:[#allocation8 + $0x140] ss:$8 sps:$4 sm:$0xff]  }
 0x1d4   : > { %11016 = vpow2.f32 %v874_v55  ;;  %3037 = vmatpush1.bf16.msra.mxu1 %v9938_v51  ;;  %v9950_v55 = vld [vmem:[#allocation10 + $0x48] ss:$16 sps:$4 sm:$0xff]   ;;  %v9905_v51 = vld [vmem:[#allocation8 + $0x154] ss:$8 sps:$4 sm:$0xff]  }
 0x1d5   : > { %11018 = vpow2.f32 %v876_v56  ;;  %3038 = vmatprep.subr.bf16.mxu1 %v9942_v26  ;;  %v9849_v56 = vld [vmem:[#allocation7 + $0x130] ss:$8 sps:$4 sm:$0xff]   ;;  %v9914_v26 = vld [vmem:[#allocation8 + $0x184] ss:$8 sps:$4 sm:$0xff]  }
 0x1d6   : > { %1364 = vmatpush1.bf16.msra.mxu0 %v9801_v0  ;;  %11020 = vpow2.f32 %v882_v57  ;;  %v9836_v0 = vld [vmem:[#allocation7 + $0xe4] ss:$8 sps:$4 sm:$0xff]  }
 0x1d7   : > { %1365 = vmatprep.subr.bf16.mxu0 %v9806_v1  ;;  %11022 = vpow2.f32 %v884_v58  ;;  %v9854_v57 = vld [vmem:[#allocation7 + $0x144] ss:$8 sps:$4 sm:$0xff]  }
 0x1d8   : > { %3039 = vmatpush1.bf16.msra.mxu1 %v9944_v34  ;;  %v9954_v58 = vld [vmem:[#allocation10 + $0x6c] ss:$16 sps:$4 sm:$0xff]  }
 0x1d9   : > { %v9917_v34 = vld [vmem:[#allocation8 + $0x194] ss:$8 sps:$4 sm:$0xff]  }
 0x1da   : > { %1366 = vmatpush1.bf16.msra.mxu0 %v9804_v6  ;;  %v1464_v6 = vrot.slane %v1462_v61, 4  ;;  %v9966_v61 = vld [vmem:[#allocation10 + $0xac] ss:$16 sps:$4 sm:$0xff]  }
 0x1db   : > { %1367 = vmatprep.subr.bf16.mxu0 %v9809_v12  ;;  %v9839_v12 = vld [vmem:[#allocation7 + $0xf4] ss:$8 sps:$4 sm:$0xff]  }
 0x1dc   : > { %v1468_v19 = vor.u32 %v1467_v7, %v1464_v6  ;;  %v9978_v6 = vld [vmem:[#allocation10 + $0xec] ss:$16 sps:$4 sm:$0xff]   ;;  %v9980_v7 = vld [vmem:[#allocation10 + $0xe8] ss:$16 sps:$4 sm:$0xff]  }
 0x1de   : > { %1368 = vmatpush1.bf16.msra.mxu0 %v9807_v16  ;;  %v11017_v1 = vpop.eup %11016 }
 0x1df   : > { %1369 = vmatprep.subr.bf16.mxu0 %v9812_v29  ;;  %v11019_v5 = vpop.eup %11018  ;;  %v8465_v9 = vadd.f32 -1.0, %v11017_v1  ;;  %v9972_v1 = vld [vmem:[#allocation10 + $0xcc] ss:$16 sps:$4 sm:$0xff]  }
 0x1e0   : > { %v11021_v10 = vpop.eup %11020  ;;  %v8466_v11 = vadd.f32 -1.0, %v11019_v5  ;;  %v9866_v5 = vld [vmem:[#allocation7 + $0x184] ss:$8 sps:$4 sm:$0xff]  }
 0x1e1   : > { %v11023_v2 = vpop.eup %11022  ;;  %v8469_v13 = vadd.f32 -1.0, %v11021_v10  ;;  %v896_v14 = vsel %vm856_vm1, %v848_v48, %v8465_v9  ;;  %v9869_v9 = vld [vmem:[#allocation7 + $0x194] ss:$8 sps:$4 sm:$0xff]  }
 0x1e2   : > { %1370 = vmatpush1.bf16.msra.mxu0 %v9810_v36  ;;  %v8470_v16 = vadd.f32 -1.0, %v11023_v2  ;;  %v897_v22 = vsel %vm857_vm2, %v849_v49, %v8466_v11  ;;  %v1455_v36 = vrot.slane %v1454_v15, 4  ;;  %v9984_v10 = vld [vmem:[#allocation10 + $0x10c] ss:$16 sps:$4 sm:$0xff]   ;;  %v9986_v2 = vld [vmem:[#allocation10 + $0x108] ss:$16 sps:$4 sm:$0xff]  }
 0x1e3   : > { %1371 = vmatprep.subr.bf16.mxu0 %v9815_v37  ;;  %v900_v27 = vsel %vm860_vm3, %v852_v24, %v8469_v13  ;;  %v9450_v29 = vpack.c.bf16 %v897_v22, %v896_v14  ;;  %v9872_v11 = vld [vmem:[#allocation7 + $0x1a4] ss:$8 sps:$4 sm:$0xff]   ;;  %v9870_v13 = vld [vmem:[#allocation7 + $0x1a0] ss:$8 sps:$4 sm:$0xff]   ;;  %v9875_v14 = vld [vmem:[#allocation7 + $0x1b4] ss:$8 sps:$4 sm:$0xff]  }
 0x1e4   : > { %v901_v28 = vsel %vm861_vm4, %v853_v25, %v8470_v16  ;;  %v9873_v15 = vld [vmem:[#allocation7 + $0x1b0] ss:$8 sps:$4 sm:$0xff]   ;;  %v9878_v16 = vld [vmem:[#allocation7 + $0x1c4] ss:$8 sps:$4 sm:$0xff]   ;;  %v9881_v22 = vld [vmem:[#allocation7 + $0x1d4] ss:$8 sps:$4 sm:$0xff]  }
 0x1e5   : > { %v9452_v35 = vpack.c.bf16 %v901_v28, %v900_v27  ;;  %v1457_v37 = vshll.u32 %v9450_v29, 16  ;;  %v9879_v27 = vld [vmem:[#allocation7 + $0x1d0] ss:$8 sps:$4 sm:$0xff]   ;;  %v9884_v28 = vld [vmem:[#allocation7 + $0x1e4] ss:$8 sps:$4 sm:$0xff]  }
 0x1e6   : > { %1372 = vmatpush1.bf16.msra.mxu0 %v9813_v42  ;;  %v1469_v42 = vrot.slane %v1468_v19, 4  ;;  %v9876_v19 = vld [vmem:[#allocation7 + $0x1c0] ss:$8 sps:$4 sm:$0xff]  }
 0x1e7   : > { %1373 = vmatprep.subr.bf16.mxu0 %v9818_v43  ;;  %v9840_v43 = vld [vmem:[#allocation7 + $0x100] ss:$8 sps:$4 sm:$0xff]  }
 0x1e8   : > { %v9882_v29 = vld [vmem:[#allocation7 + $0x1e0] ss:$8 sps:$4 sm:$0xff]  }
 0x1ea   : > { %1374 = vmatpush1.bf16.msra.mxu0 %v9816_v44  ;;  %v1471_v44 = vshll.u32 %v9452_v35, 16  ;;  %v9890_v35 = vld [vmem:[#allocation8 + $0x104] ss:$8 sps:$4 sm:$0xff]  }
 0x1eb   : > { %1375 = vmatprep.subr.bf16.mxu0 %v9821_v45  ;;  %v9845_v45 = vld [vmem:[#allocation7 + $0x114] ss:$8 sps:$4 sm:$0xff]  }
 0x1ee   : > { %1376 = vmatpush1.bf16.msra.mxu0 %v9819_v46  ;;  %v1459_v46 = vrot.slane %v1457_v37, 5  ;;  %v9893_v37 = vld [vmem:[#allocation8 + $0x114] ss:$8 sps:$4 sm:$0xff]  }
 0x1ef   : > { %1377 = vmatprep.subr.bf16.mxu0 %v9824_v47  ;;  %v1473_v47 = vrot.slane %v1471_v44, 5  ;;  %v9894_v44 = vld [vmem:[#allocation8 + $0x120] ss:$8 sps:$4 sm:$0xff]  }
 0x1f0   : > { %v12293_v48 = vsel %vm12267_vm15, %v1455_v36, %v1459_v46  ;;  %v9888_v36 = vld [vmem:[#allocation8 + $0x100] ss:$8 sps:$4 sm:$0xff]   ;;  %v9897_v46 = vld [vmem:[#allocation8 + $0x130] ss:$8 sps:$4 sm:$0xff]  }
 0x1f1   : > { %v12297_v49 = vsel %vm12267_vm15, %v1469_v42, %v1473_v47  ;;  %v9891_v42 = vld [vmem:[#allocation8 + $0x110] ss:$8 sps:$4 sm:$0xff]   ;;  %v9902_v47 = vld [vmem:[#allocation8 + $0x144] ss:$8 sps:$4 sm:$0xff]  }
 0x1f2   : > { %1378 = vmatpush1.bf16.msra.mxu0 %v9822_v53  ;;  %v8581_v24 = vcombine.low %v12293_v48, %v12297_v49  ;;  %v8582_v25 = vcombine.high %v12293_v48, %v12297_v49  ;;  %v9848_v53 = vld [vmem:[#allocation7 + $0x124] ss:$8 sps:$4 sm:$0xff]   ;;  %v9975_v48 = vld [vmem:[#allocation11 + $0xc0] ss:$16 sps:$4 sm:$0xff]  }
 0x1f3   : > { %1379 = vmatprep.subr.bf16.mxu0 %v9827_v54  ;;  %v9948_v54 = vld [vmem:[#allocation10 + $0x4c] ss:$16 sps:$4 sm:$0xff]   ;;  %v9983_v49 = vld [vmem:[#allocation11 + $0xe4] ss:$16 sps:$4 sm:$0xff]  }
 0x1f4   : > { %3040 = vmatprep.subr.bf16.mxu1 %v9948_v54  ;;  %v9918_v54 = vld [vmem:[#allocation8 + $0x1a0] ss:$8 sps:$4 sm:$0xff]  }
 0x1f5   : > { %3041 = vmatpush1.bf16.msra.mxu1 %v9950_v55  ;;  %v9923_v55 = vld [vmem:[#allocation8 + $0x1b4] ss:$8 sps:$4 sm:$0xff]  }
 0x1f6   : > { %1380 = vmatpush1.bf16.msra.mxu0 %v9825_v17  ;;  %3042 = vmatprep.subr.bf16.mxu1 %v9954_v58  ;;  %v9852_v17 = vld [vmem:[#allocation7 + $0x140] ss:$8 sps:$4 sm:$0xff]  }
 0x1f7   : > { %1381 = vmatprep.subr.bf16.mxu0 %v9830_v18  ;;  %v9857_v18 = vld [vmem:[#allocation7 + $0x154] ss:$8 sps:$4 sm:$0xff]   ;;  %v9924_v58 = vld [vmem:[#allocation8 + $0x1c0] ss:$8 sps:$4 sm:$0xff]  }
 0x1fa   : > { %1382 = vmatpush1.bf16.msra.mxu0 %v9828_v20  ;;  %v9960_v20 = vld [vmem:[#allocation10 + $0x8c] ss:$16 sps:$4 sm:$0xff]  }
 0x1fb   : > { %1383 = vmatprep.subr.bf16.mxu0 %v9833_v21  ;;  %v9962_v21 = vld [vmem:[#allocation10 + $0x88] ss:$16 sps:$4 sm:$0xff]  }
 0x1fe   : > { %1384 = vmatpush1.bf16.msra.mxu0 %v9831_v63  ;;  %v9858_v63 = vld [vmem:[#allocation7 + $0x160] ss:$8 sps:$4 sm:$0xff]  }
 0x1ff   : > { %1385 = vmatprep.subr.bf16.mxu0 %v9836_v0  ;;  %v9863_v0 = vld [vmem:[#allocation7 + $0x174] ss:$8 sps:$4 sm:$0xff]  }
 0x202   : > { %1386 = vmatpush1.bf16.msra.mxu0 %v9834_v8  ;;  %v9864_v8 = vld [vmem:[#allocation7 + $0x180] ss:$8 sps:$4 sm:$0xff]  }
 0x203   : > { %1387 = vmatprep.subr.bf16.mxu0 %v9839_v12  ;;  %v9867_v12 = vld [vmem:[#allocation7 + $0x190] ss:$8 sps:$4 sm:$0xff]  }
 0x206   : > { %1388 = vmatpush1.bf16.msra.mxu0 %v9837_v31  ;;  %v9887_v31 = vld [vmem:[#allocation7 + $0x1f4] ss:$8 sps:$4 sm:$0xff]  }
 0x207   : > { %1676 = vmatprep.subr.bf16.mxu0 %v9842_v32  ;;  %v9885_v32 = vld [vmem:[#allocation7 + $0x1f0] ss:$8 sps:$4 sm:$0xff]  }
 0x209   : > { %1390 = vmatmul.mubr.bf16.vlgmr.msra.gmra.mrb[0].mxu0 %v9443_v23  ;;  %v9851_v23 = vld [vmem:[#allocation7 + $0x134] ss:$8 sps:$4 sm:$0xff]  }
 0x20a   : > { %1677 = vmatpush1.bf16.msra.mxu0 %v9840_v43  ;;  %1708 = vmatprep.mubr.bf16.mxu0 %v8548_v40  ;;  %v9956_v40 = vld [vmem:[#allocation10 + $0x68] ss:$16 sps:$4 sm:$0xff]   ;;  %v9896_v43 = vld [vmem:[#allocation8 + $0x124] ss:$8 sps:$4 sm:$0xff]  }
 0x20b   : > { %1678 = vmatprep.subr.bf16.mxu0 %v9845_v45  ;;  %3043 = vmatpush1.bf16.msra.mxu1 %v9956_v40  ;;  %v9899_v45 = vld [vmem:[#allocation8 + $0x134] ss:$8 sps:$4 sm:$0xff]  }
 0x20c   : > { %3044 = vmatprep.subr.bf16.mxu1 %v9960_v20  ;;  %v9929_v40 = vld [vmem:[#allocation8 + $0x1d4] ss:$8 sps:$4 sm:$0xff]   ;;  %v9930_v20 = vld [vmem:[#allocation8 + $0x1e0] ss:$8 sps:$4 sm:$0xff]  }
 0x20e   : > { %1679 = vmatpush1.bf16.msra.mxu0 %v9843_v52  ;;  %v9911_v52 = vld [vmem:[#allocation8 + $0x174] ss:$8 sps:$4 sm:$0xff]  }
 0x20f   : > { %1680 = vmatprep.subr.bf16.mxu0 %v9848_v53  ;;  %3045 = vmatpush1.bf16.msra.mxu1 %v9962_v21  ;;  %v9912_v53 = vld [vmem:[#allocation8 + $0x180] ss:$8 sps:$4 sm:$0xff]   ;;  %v9935_v21 = vld [vmem:[#allocation8 + $0x1f4] ss:$8 sps:$4 sm:$0xff]  }
 0x210   : > { %3046 = vmatprep.subr.bf16.mxu1 %v9966_v61  ;;  %v9939_v61 = vld [vmem:[#allocation11] ss:$16 sps:$4 sm:$0xff]  }
 0x212   : > { %1681 = vmatpush1.bf16.msra.mxu0 %v9846_v41  ;;  %v9915_v41 = vld [vmem:[#allocation8 + $0x190] ss:$8 sps:$4 sm:$0xff]  }
 0x213   : > { %1682 = vmatprep.subr.bf16.mxu0 %v9851_v23  ;;  %3047 = vmatpush1.bf16.msra.mxu1 %v9968_v62  ;;  %v9920_v23 = vld [vmem:[#allocation8 + $0x1a4] ss:$8 sps:$4 sm:$0xff]  }
 0x214   : > { %3048 = vmatprep.subr.bf16.mxu1 %v9972_v1  ;;  %v9947_v62 = vld [vmem:[#allocation11 + $0x24] ss:$16 sps:$4 sm:$0xff]   ;;  %v9951_v1 = vld [vmem:[#allocation11 + $0x40] ss:$16 sps:$4 sm:$0xff]  }
 0x216   : > { %1683 = vmatpush1.bf16.msra.mxu0 %v9849_v56  ;;  %v9921_v56 = vld [vmem:[#allocation8 + $0x1b0] ss:$8 sps:$4 sm:$0xff]  }
 0x217   : > { %1684 = vmatprep.subr.bf16.mxu0 %v9854_v57  ;;  %3049 = vmatpush1.bf16.msra.mxu1 %v9974_v3  ;;  %v9926_v57 = vld [vmem:[#allocation8 + $0x1c4] ss:$8 sps:$4 sm:$0xff]  }
 0x218   : > { %3050 = vmatprep.subr.bf16.mxu1 %v9978_v6  ;;  %v9959_v3 = vld [vmem:[#allocation11 + $0x64] ss:$16 sps:$4 sm:$0xff]   ;;  %v9963_v6 = vld [vmem:[#allocation11 + $0x80] ss:$16 sps:$4 sm:$0xff]  }
 0x21a   : > { %1685 = vmatpush1.bf16.msra.mxu0 %v9852_v17  ;;  %v9927_v17 = vld [vmem:[#allocation8 + $0x1d0] ss:$8 sps:$4 sm:$0xff]  }
 0x21b   : > { %1686 = vmatprep.subr.bf16.mxu0 %v9857_v18  ;;  %3051 = vmatpush1.bf16.msra.mxu1 %v9980_v7  ;;  %v9932_v18 = vld [vmem:[#allocation8 + $0x1e4] ss:$8 sps:$4 sm:$0xff]  }
 0x21c   : > { %3052 = vmatprep.subr.bf16.mxu1 %v9984_v10  ;;  %v9971_v7 = vld [vmem:[#allocation11 + $0xa4] ss:$16 sps:$4 sm:$0xff]  }
 0x21d   : > { %v9989_v10 = vld [vmem:[#allocation11 + $0x104] ss:$16 sps:$4 sm:$0xff]  }
 0x21e   : > { %1687 = vmatpush1.bf16.msra.mxu0 %v9855_v59  ;;  %v9933_v59 = vld [vmem:[#allocation8 + $0x1f0] ss:$8 sps:$4 sm:$0xff]  }
 0x21f   : > { %1688 = vmatprep.subr.bf16.mxu0 %v9860_v60  ;;  %3053 = vmatpush1.bf16.msra.mxu1 %v9986_v2  ;;  %v9941_v60 = vld [vmem:[#allocation11 + $0x4] ss:$16 sps:$4 sm:$0xff]   ;;  %v9987_v2 = vld [vmem:[#allocation11 + $0x100] ss:$16 sps:$4 sm:$0xff]  }
 0x222   : > { %1689 = vmatpush1.bf16.msra.mxu0 %v9858_v63  ;;  %v9945_v63 = vld [vmem:[#allocation11 + $0x20] ss:$16 sps:$4 sm:$0xff]  }
 0x223   : > { %1690 = vmatprep.subr.bf16.mxu0 %v9863_v0  ;;  %v9953_v0 = vld [vmem:[#allocation11 + $0x44] ss:$16 sps:$4 sm:$0xff]  }
 0x226   : > { %1691 = vmatpush1.bf16.msra.mxu0 %v9861_v4  ;;  %v9957_v4 = vld [vmem:[#allocation11 + $0x60] ss:$16 sps:$4 sm:$0xff]  }
 0x227   : > { %1692 = vmatprep.subr.bf16.mxu0 %v9866_v5  ;;  %v9965_v5 = vld [vmem:[#allocation11 + $0x84] ss:$16 sps:$4 sm:$0xff]  }
 0x22a   : > { %1693 = vmatpush1.bf16.msra.mxu0 %v9864_v8  ;;  %v9969_v8 = vld [vmem:[#allocation11 + $0xa0] ss:$16 sps:$4 sm:$0xff]  }
 0x22b   : > { %1694 = vmatprep.subr.bf16.mxu0 %v9869_v9  ;;  %v9977_v9 = vld [vmem:[#allocation11 + $0xc4] ss:$16 sps:$4 sm:$0xff]  }
 0x22e   : > { %1695 = vmatpush1.bf16.msra.mxu0 %v9867_v12  ;;  %v9990_v12 = vld [vmem:[#allocation10 + $0x12c] ss:$16 sps:$4 sm:$0xff]  }
 0x22f   : > { %1696 = vmatprep.subr.bf16.mxu0 %v9872_v11  ;;  %3054 = vmatprep.subr.bf16.mxu1 %v9990_v12  ;;  %v9992_v11 = vld [vmem:[#allocation10 + $0x128] ss:$16 sps:$4 sm:$0xff]  }
 0x230   : > { %3055 = vmatpush1.bf16.msra.mxu1 %v9992_v11 }
 0x232   : > { %1697 = vmatpush1.bf16.msra.mxu0 %v9870_v13  ;;  %v9995_v13 = vld [vmem:[#allocation11 + $0x124] ss:$16 sps:$4 sm:$0xff]  }
 0x233   : > { %1698 = vmatprep.subr.bf16.mxu0 %v9875_v14  ;;  %v9993_v14 = vld [vmem:[#allocation11 + $0x120] ss:$16 sps:$4 sm:$0xff]  }
 0x236   : > { %1699 = vmatpush1.bf16.msra.mxu0 %v9873_v15  ;;  %v9996_v15 = vld [vmem:[#allocation10 + $0x14c] ss:$16 sps:$4 sm:$0xff]  }
 0x237   : > { %1700 = vmatprep.subr.bf16.mxu0 %v9878_v16  ;;  %v9998_v16 = vld [vmem:[#allocation10 + $0x148] ss:$16 sps:$4 sm:$0xff]   ;;  %3056 = vmatprep.subr.bf16.mxu1 %v9996_v15 }
 0x238   : > { %3057 = vmatpush1.bf16.msra.mxu1 %v9998_v16 }
 0x23a   : > { %1701 = vmatpush1.bf16.msra.mxu0 %v9876_v19  ;;  %v10001_v19 = vld [vmem:[#allocation11 + $0x144] ss:$16 sps:$4 sm:$0xff]  }
 0x23b   : > { %1702 = vmatprep.subr.bf16.mxu0 %v9881_v22  ;;  %v9999_v22 = vld [vmem:[#allocation11 + $0x140] ss:$16 sps:$4 sm:$0xff]  }
 0x23e   : > { %1703 = vmatpush1.bf16.msra.mxu0 %v9879_v27  ;;  %v10002_v27 = vld [vmem:[#allocation10 + $0x16c] ss:$16 sps:$4 sm:$0xff]  }
 0x23f   : > { %1704 = vmatprep.subr.bf16.mxu0 %v9884_v28  ;;  %v10004_v28 = vld [vmem:[#allocation10 + $0x168] ss:$16 sps:$4 sm:$0xff]   ;;  %3058 = vmatprep.subr.bf16.mxu1 %v10002_v27 }
 0x240   : > { %3059 = vmatpush1.bf16.msra.mxu1 %v10004_v28 }
 0x242   : > { %1705 = vmatpush1.bf16.msra.mxu0 %v9882_v29  ;;  %v10007_v29 = vld [vmem:[#allocation11 + $0x164] ss:$16 sps:$4 sm:$0xff]  }
 0x243   : > { %1706 = vmatprep.subr.bf16.mxu0 %v9887_v31  ;;  %v10005_v31 = vld [vmem:[#allocation11 + $0x160] ss:$16 sps:$4 sm:$0xff]  }
 0x246   : > { %1707 = vmatpush1.bf16.msra.mxu0 %v9885_v32  ;;  %v10008_v32 = vld [vmem:[#allocation10 + $0x18c] ss:$16 sps:$4 sm:$0xff]  }
 0x247   : > { %1924 = vmatprep.subr.bf16.mxu0 %v9890_v35  ;;  %v10010_v35 = vld [vmem:[#allocation10 + $0x188] ss:$16 sps:$4 sm:$0xff]   ;;  %3060 = vmatprep.subr.bf16.mxu1 %v10008_v32 }
 0x248   : > { %3061 = vmatpush1.bf16.msra.mxu1 %v10010_v35 }
 0x249   : > { %1709 = vmatmul.mubr.bf16.vlgmr.msra.gmra.mrb[0].mxu0 %v8547_v39  ;;  %v9906_v39 = vld [vmem:[#allocation8 + $0x160] ss:$8 sps:$4 sm:$0xff]  }
 0x24a   : > { %1925 = vmatpush1.bf16.msra.mxu0 %v9888_v36  ;;  %1956 = vmatprep.mubr.bf16.mxu0 %v8582_v25  ;;  %v9909_v25 = vld [vmem:[#allocation8 + $0x170] ss:$8 sps:$4 sm:$0xff]  }
 0x24b   : > { %1926 = vmatprep.subr.bf16.mxu0 %v9893_v37  ;;  %v10011_v36 = vld [vmem:[#allocation11 + $0x180] ss:$16 sps:$4 sm:$0xff]   ;;  %v10013_v37 = vld [vmem:[#allocation11 + $0x184] ss:$16 sps:$4 sm:$0xff]  }
 0x24e   : > { %1927 = vmatpush1.bf16.msra.mxu0 %v9891_v42  ;;  %v10014_v42 = vld [vmem:[#allocation10 + $0x1ac] ss:$16 sps:$4 sm:$0xff]  }
 0x24f   : > { %1928 = vmatprep.subr.bf16.mxu0 %v9896_v43  ;;  %v10016_v43 = vld [vmem:[#allocation10 + $0x1a8] ss:$16 sps:$4 sm:$0xff]   ;;  %3062 = vmatprep.subr.bf16.mxu1 %v10014_v42 }
 0x250   : > { %3063 = vmatpush1.bf16.msra.mxu1 %v10016_v43 }
 0x252   : > { %1929 = vmatpush1.bf16.msra.mxu0 %v9894_v44  ;;  %v10019_v44 = vld [vmem:[#allocation11 + $0x1a4] ss:$16 sps:$4 sm:$0xff]  }
 0x253   : > { %1930 = vmatprep.subr.bf16.mxu0 %v9899_v45  ;;  %v10020_v45 = vld [vmem:[#allocation10 + $0x1cc] ss:$16 sps:$4 sm:$0xff]  }
 0x254   : > { %3064 = vmatprep.subr.bf16.mxu1 %v10020_v45 }
 0x256   : > { %1931 = vmatpush1.bf16.msra.mxu0 %v9897_v46  ;;  %v10017_v46 = vld [vmem:[#allocation11 + $0x1a0] ss:$16 sps:$4 sm:$0xff]  }
 0x257   : > { %1932 = vmatprep.subr.bf16.mxu0 %v9902_v47  ;;  %v10025_v47 = vld [vmem:[#allocation11 + $0x1c4] ss:$16 sps:$4 sm:$0xff]  }
 0x25a   : > { %1933 = vmatpush1.bf16.msra.mxu0 %v9900_v50  ;;  %v10022_v50 = vld [vmem:[#allocation10 + $0x1c8] ss:$16 sps:$4 sm:$0xff]  }
 0x25b   : > { %1934 = vmatprep.subr.bf16.mxu0 %v9905_v51  ;;  %v10026_v51 = vld [vmem:[#allocation10 + $0x1ec] ss:$16 sps:$4 sm:$0xff]   ;;  %3065 = vmatpush1.bf16.msra.mxu1 %v10022_v50 }
 0x25c   : > { %3066 = vmatprep.subr.bf16.mxu1 %v10026_v51 }
 0x25e   : > { %1935 = vmatpush1.bf16.msra.mxu0 %v9903_v33  ;;  %v10023_v33 = vld [vmem:[#allocation11 + $0x1c0] ss:$16 sps:$4 sm:$0xff]  }
 0x25f   : > { %1936 = vmatprep.subr.bf16.mxu0 %v9908_v38  ;;  %v10031_v38 = vld [vmem:[#allocation11 + $0x1e4] ss:$16 sps:$4 sm:$0xff]  }
 0x262   : > { %1937 = vmatpush1.bf16.msra.mxu0 %v9906_v39  ;;  %v10028_v39 = vld [vmem:[#allocation10 + $0x1e8] ss:$16 sps:$4 sm:$0xff]  }
 0x263   : > { %1938 = vmatprep.subr.bf16.mxu0 %v9911_v52  ;;  %v10029_v52 = vld [vmem:[#allocation11 + $0x1e0] ss:$16 sps:$4 sm:$0xff]   ;;  %3067 = vmatpush1.bf16.msra.mxu1 %v10028_v39 }
 0x266   : > { %1939 = vmatpush1.bf16.msra.mxu0 %v9909_v25  ;;  %v10034_v25 = vld [vmem:[#allocation10 + $0x204] ss:$16 sps:$4 sm:$0xff]  }
 0x267   : > { %1940 = vmatprep.subr.bf16.mxu0 %v9914_v26  ;;  %3544 = vmatprep.subr.bf16.mxu1 %v10034_v25  ;;  %v10037_v26 = vld [vmem:[#allocation11 + $0xc] ss:$16 sps:$4 sm:$0xff]  }
 0x26a   : > { %1941 = vmatpush1.bf16.msra.mxu0 %v9912_v53  ;;  %v1973_v53 = vlaneseq }
 0x26b   : > { %1942 = vmatprep.subr.bf16.mxu0 %v9917_v34 }
 0x26c   : > { %v12318_v34 = vshrl.u32 %v1973_v53, 7 }
 0x26e   : > { %1943 = vmatpush1.bf16.msra.mxu0 %v9915_v41  ;;  %v12321_v41 = vsub.s32 0, %v12318_v34 }
 0x26f   : > { %1944 = vmatprep.subr.bf16.mxu0 %v9920_v23  ;;  %v1971_v23 = vld [vmem:[%s13079_s28] sm:$0x3]  ;;  %s8160_s28 = scalar_lea.sflag [#allocation4], %s12150_s29 }
 0x272   : > { %1945 = vmatpush1.bf16.msra.mxu0 %v9918_v54  ;;  %v12327_v54 = vsub.s32 1, %v12318_v34 }
 0x273   : > { %1946 = vmatprep.subr.bf16.mxu0 %v9923_v55  ;;  %v1976_v55 = vrot.slane %v1971_v23, %v12321_v41 }
 0x276   : > { %1947 = vmatpush1.bf16.msra.mxu0 %v9921_v56  ;;  %v1980_v56 = vrot.slane %v1971_v23, %v12327_v54 }
 0x277   : > { %1948 = vmatprep.subr.bf16.mxu0 %v9926_v57 }
 0x27a   : > { %1949 = vmatpush1.bf16.msra.mxu0 %v9924_v58 }
 0x27b   : > { %1950 = vmatprep.subr.bf16.mxu0 %v9929_v40 }
 0x27e   : > { %1951 = vmatpush1.bf16.msra.mxu0 %v9927_v17 }
 0x27f   : > { %1952 = vmatprep.subr.bf16.mxu0 %v9932_v18 }
 0x282   : > { %1953 = vmatpush1.bf16.msra.mxu0 %v9930_v20 }
 0x283   : > { %1954 = vmatprep.subr.bf16.mxu0 %v9935_v21 }
 0x286   : > { %1955 = vmatpush1.bf16.msra.mxu0 %v9933_v59 }
 0x287   : > { %2583 = vmatprep.subr.bf16.mxu0 %v9941_v60 }
 0x289   : > { %1957 = vmatmul.mubr.bf16.vlgmr.msra.gmra.mrb[0].mxu0 %v8581_v24  ;;  %v9981_v24 = vld [vmem:[#allocation11 + $0xe0] ss:$16 sps:$4 sm:$0xff]  }
 0x28a   : > { %2584 = vmatpush1.bf16.msra.mxu0 %v9939_v61 }
 0x28b   : > { %2585 = vmatprep.subr.bf16.mxu0 %v9947_v62 }
 0x28e   : > { %2586 = vmatpush1.bf16.msra.mxu0 %v9945_v63 }
 0x28f   : > { %2587 = vmatprep.subr.bf16.mxu0 %v9953_v0 }
 0x292   : > { %2588 = vmatpush1.bf16.msra.mxu0 %v9951_v1 }
 0x293   : > { %2589 = vmatprep.subr.bf16.mxu0 %v9959_v3 }
 0x296   : > { %2590 = vmatpush1.bf16.msra.mxu0 %v9957_v4 }
 0x297   : > { %2591 = vmatprep.subr.bf16.mxu0 %v9965_v5 }
 0x29a   : > { %2592 = vmatpush1.bf16.msra.mxu0 %v9963_v6 }
 0x29b   : > { %2593 = vmatprep.subr.bf16.mxu0 %v9971_v7 }
 0x29e   : > { %2594 = vmatpush1.bf16.msra.mxu0 %v9969_v8 }
 0x29f   : > { %2595 = vmatprep.subr.bf16.mxu0 %v9977_v9 }
 0x2a2   : > { %2596 = vmatpush1.bf16.msra.mxu0 %v9975_v48 }
 0x2a3   : > { %2597 = vmatprep.subr.bf16.mxu0 %v9983_v49 }
 0x2a6   : > { %2598 = vmatpush1.bf16.msra.mxu0 %v9981_v24 }
 0x2a7   : > { %2599 = vmatprep.subr.bf16.mxu0 %v9989_v10 }
 0x2aa   : > { %2600 = vmatpush1.bf16.msra.mxu0 %v9987_v2 }
 0x2ab   : > { %2601 = vmatprep.subr.bf16.mxu0 %v9995_v13 }
 0x2ae   : > { %2602 = vmatpush1.bf16.msra.mxu0 %v9993_v14 }
 0x2af   : > { %2603 = vmatprep.subr.bf16.mxu0 %v10001_v19 }
 0x2b2   : > { %2604 = vmatpush1.bf16.msra.mxu0 %v9999_v22 }
 0x2b3   : > { %2605 = vmatprep.subr.bf16.mxu0 %v10007_v29 }
 0x2b6   : > { %2606 = vmatpush1.bf16.msra.mxu0 %v10005_v31 }
 0x2b7   : > { %2607 = vmatprep.subr.bf16.mxu0 %v10013_v37 }
 0x2ba   : > { %2608 = vmatpush1.bf16.msra.mxu0 %v10011_v36 }
 0x2bb   : > { %2609 = vmatprep.subr.bf16.mxu0 %v10019_v44 }
 0x2be   : > { %2610 = vmatpush1.bf16.msra.mxu0 %v10017_v46 }
 0x2bf   : > { %2611 = vmatprep.subr.bf16.mxu0 %v10025_v47 }
 0x2c2   : > { %2612 = vmatpush1.bf16.msra.mxu0 %v10023_v33 }
 0x2c3   : > { %2613 = vmatprep.subr.bf16.mxu0 %v10031_v38 }
 0x2c6   : > { %2614 = vmatpush1.bf16.msra.mxu0 %v10029_v52 }
 0x2c7   : > { %2626 = vmatprep.subr.bf16.mxu0 %v10037_v26 }
 0x35c   : > { %v1958_v57 = vpop.f32.mrb[0].mxu0 }
 0x35d   : > { %v1983_v58 = vadd.f32 %v1976_v55, %v1958_v57  ;;  %v1960_v40 = vpop.f32.mrb[1].mxu0 }
 0x35e   : > { %v1984_v17 = vadd.f32 %v1980_v56, %v1960_v40  ;;  %v1962_v18 = vpop.f32.mrb[2].mxu0 }
 0x35f   : > { %v12331_v20 = vrot.slane %v1983_v58, 7  ;;  %v1985_v21 = vadd.f32 %v1976_v55, %v1962_v18  ;;  %v1964_v59 = vpop.f32.mrb[3].mxu0 }
 0x360   : > { %v12333_v60 = vrot.slane %v1984_v17, 7  ;;  %v1986_v61 = vadd.f32 %v1980_v56, %v1964_v59 }
 0x361   : > { %v2013_v62 = vmin.f32 %v12331_v20, 0.0  ;;  %v12336_v63 = vrot.slane %v1985_v21, 7  ;;  %v12343_v6 = vsub.f32 0.0, %v12331_v20  ;;  %v12348_v48 = vsel %vm789_vm0, 0.0, %v12331_v20 }
 0x362   : > { %v2014_v0 = vmin.f32 %v12333_v60, 0.0  ;;  %v12339_v1 = vrot.slane %v1986_v61, 7  ;;  %v12352_v49 = vsel %vm789_vm0, 0.0, %v12333_v60  ;;  %vm2005_vm5 = vcmp.gt.f32.partialorder %v12331_v20, 0.0 }
 0x363   : > { %v2023_v3 = vmul.f32 1.442695, %v2013_v62  ;;  %v2017_v4 = vmin.f32 %v12336_v63, 0.0  ;;  %v12356_v24 = vsel %vm789_vm0, 0.0, %v12336_v63  ;;  %v2073_v2 = vmin.f32 %v12343_v6, 0.0 }
 0x364   : > { %v2025_v5 = vmul.f32 1.442695, %v2014_v0  ;;  %v2018_v8 = vmin.f32 %v12339_v1, 0.0  ;;  %v12360_v10 = vsel %vm789_vm0, 0.0, %v12339_v1  ;;  %v12365_v12 = vsub.f32 0.0, %v12333_v60 }
 0x365   : > { %11024 = vpow2.f32 %v2023_v3  ;;  %v2031_v7 = vmul.f32 1.442695, %v2017_v4  ;;  %v12368_v11 = vsub.f32 0.0, %v12336_v63  ;;  %v12371_v13 = vsub.f32 0.0, %v12339_v1 }
 0x366   : > { %11026 = vpow2.f32 %v2025_v5  ;;  %v2033_v9 = vmul.f32 1.442695, %v2018_v8  ;;  %v2011_v14 = vmin.f32 %v12348_v48, 0.0  ;;  %v2012_v15 = vmin.f32 %v12352_v49, 0.0 }
 0x367   : > { %11028 = vpow2.f32 %v2031_v7  ;;  %v2015_v16 = vmin.f32 %v12356_v24, 0.0  ;;  %v2016_v19 = vmin.f32 %v12360_v10, 0.0  ;;  %v12378_v22 = vsub.f32 0.0, %v12348_v48 }
 0x368   : > { %11030 = vpow2.f32 %v2033_v9  ;;  %v12381_v27 = vsub.f32 0.0, %v12352_v49  ;;  %v2019_v28 = vmul.f32 1.442695, %v2011_v14  ;;  %v2021_v29 = vmul.f32 1.442695, %v2012_v15 }
 0x369   : > { %v12384_v31 = vsub.f32 0.0, %v12356_v24  ;;  %v12387_v32 = vsub.f32 0.0, %v12360_v10  ;;  %vm2006_vm6 = vcmp.gt.f32.partialorder %v12333_v60, 0.0  ;;  %v2074_v35 = vmin.f32 %v12365_v12, 0.0 }
 0x36a   : > { %v2027_v36 = vmul.f32 1.442695, %v2015_v16  ;;  %v2029_v37 = vmul.f32 1.442695, %v2016_v19  ;;  %v2083_v42 = vmul.f32 1.442695, %v2073_v2  ;;  %11032 = vpow2.f32 %v2019_v28 }
 0x36b   : > { %v2077_v43 = vmin.f32 %v12368_v11, 0.0  ;;  %v2071_v44 = vmin.f32 %v12378_v22, 0.0  ;;  %11034 = vpow2.f32 %v2021_v29  ;;  %v2072_v46 = vmin.f32 %v12381_v27, 0.0 }
 0x36c   : > { %v2075_v47 = vmin.f32 %v12384_v31, 0.0  ;;  %v2076_v50 = vmin.f32 %v12387_v32, 0.0  ;;  %v2078_v33 = vmin.f32 %v12371_v13, 0.0  ;;  %11036 = vpow2.f32 %v2027_v36 }
 0x36d   : > { %v2079_v38 = vmul.f32 1.442695, %v2071_v44  ;;  %11038 = vpow2.f32 %v2029_v37  ;;  %v2081_v25 = vmul.f32 1.442695, %v2072_v46  ;;  %v2085_v58 = vmul.f32 1.442695, %v2074_v35 }
 0x36e   : > { %v2087_v26 = vmul.f32 1.442695, %v2075_v47  ;;  %v2089_v53 = vmul.f32 1.442695, %v2076_v50  ;;  %vm2009_vm7 = vcmp.gt.f32.partialorder %v12336_v63, 0.0  ;;  %vm2010_vm8 = vcmp.gt.f32.partialorder %v12339_v1, 0.0 }
 0x36f   : > { %v11025_v45 = vpop.eup %11024  ;;  %11040 = vpow2.f32 %v2079_v38  ;;  %v2091_v40 = vmul.f32 1.442695, %v2077_v43  ;;  %v2093_v61 = vmul.f32 1.442695, %v2078_v33  ;;  %vm2003_vm9 = vcmp.gt.f32.partialorder %v12348_v48, 0.0 }
 0x370   : > { %v11027_v51 = vpop.eup %11026  ;;  %v8617_v39 = vadd.f32 -1.0, %v11025_v45  ;;  %11042 = vpow2.f32 %v2081_v25  ;;  %vm2004_vm10 = vcmp.gt.f32.partialorder %v12352_v49, 0.0  ;;  %vm2007_vm11 = vcmp.gt.f32.partialorder %v12356_v24, 0.0  ;;  %v10032_v47 = vld [vmem:[#allocation10 + $0x200] ss:$16 sps:$4 sm:$0xff]  }
 0x371   : > { %v11029_v52 = vpop.eup %11028  ;;  %v8618_v23 = vadd.f32 -1.0, %v11027_v51  ;;  %11044 = vpow2.f32 %v2087_v26  ;;  %vm2008_vm12 = vcmp.gt.f32.partialorder %v12360_v10, 0.0  ;;  %vm2063_vm13 = vcmp.gt.f32.partialorder %v12378_v22, 0.0 }
 0x372   : > { %v8621_v55 = vadd.f32 -1.0, %v11029_v52  ;;  %v2045_v56 = vsel %vm2005_vm5, %v12331_v20, %v8617_v39  ;;  %v11031_v57 = vpop.eup %11030  ;;  %11046 = vpow2.f32 %v2089_v53  ;;  %vm2064_vm14 = vcmp.gt.f32.partialorder %v12381_v27, 0.0  ;;  %v10040_v39 = vld [vmem:[#allocation10 + $0x224] ss:$16 sps:$4 sm:$0xff]  }
 0x373   : > { %v8622_v17 = vadd.f32 -1.0, %v11031_v57  ;;  %v2046_v18 = vsel %vm2006_vm6, %v12333_v60, %v8618_v23  ;;  %11048 = vpow2.f32 %v2083_v42  ;;  %vm2067_vm1 = vcmp.gt.f32.partialorder %v12384_v31, 0.0 }
 0x374   : > { %v2049_v21 = vsel %vm2009_vm7, %v12336_v63, %v8621_v55  ;;  %v9458_v59 = vpack.c.bf16 %v2046_v18, %v2045_v56  ;;  %11050 = vpow2.f32 %v2085_v58  ;;  %v11033_v0 = vpop.eup %11032  ;;  %vm2068_vm2 = vcmp.gt.f32.partialorder %v12387_v32, 0.0 }
 0x375   : > { %v2050_v20 = vsel %vm2010_vm8, %v12339_v1, %v8622_v17  ;;  %11052 = vpow2.f32 %v2091_v40  ;;  %v11035_v3 = vpop.eup %11034  ;;  %v8615_v60 = vadd.f32 -1.0, %v11033_v0  ;;  %vm2065_vm3 = vcmp.gt.f32.partialorder %v12343_v6, 0.0 }
 0x376   : > { %v9460_v62 = vpack.c.bf16 %v2050_v20, %v2049_v21  ;;  %v12410_v63 = vshll.u32 %v9458_v59, 16  ;;  %v11037_v4 = vpop.eup %11036  ;;  %v8616_v5 = vadd.f32 -1.0, %v11035_v3  ;;  %11054 = vpow2.f32 %v2093_v61  ;;  %v10035_v21 = vld [vmem:[#allocation11 + $0x8] ss:$16 sps:$4 sm:$0xff]   ;;  %v10038_v3 = vld [vmem:[#allocation10 + $0x220] ss:$16 sps:$4 sm:$0xff]  }
 0x377   : > { %v11039_v7 = vpop.eup %11038  ;;  %v8619_v8 = vadd.f32 -1.0, %v11037_v4  ;;  %v2043_v9 = vsel %vm2003_vm9, %v12348_v48, %v8615_v60  ;;  %vm2066_vm4 = vcmp.gt.f32.partialorder %v12365_v12, 0.0  ;;  %vm2069_vm5 = vcmp.gt.f32.partialorder %v12368_v11, 0.0 }
 0x378   : > { %v12413_v1 = vshll.u32 %v9460_v62, 16  ;;  %v8620_v14 = vadd.f32 -1.0, %v11039_v7  ;;  %v2044_v15 = vsel %vm2004_vm10, %v12352_v49, %v8616_v5  ;;  %v3099_v29 = vrot.slane %v12410_v63, 5 }
 0x379   : > { %v11041_v2 = vpop.eup %11040  ;;  %v2047_v19 = vsel %vm2007_vm11, %v12356_v24, %v8619_v8  ;;  %v9457_v48 = vpack.c.bf16 %v2044_v15, %v2043_v9  ;;  %vm2070_vm6 = vcmp.gt.f32.partialorder %v12371_v13, 0.0 }
 0x37a   : > { %v11043_v16 = vpop.eup %11042  ;;  %v8623_v28 = vadd.f32 -1.0, %v11041_v2  ;;  %v2048_v36 = vsel %vm2008_vm12, %v12360_v10, %v8620_v14  ;;  %v12430_v37 = vpack.c.bf16 %v2047_v19, %v2043_v9  ;;  %v3113_v42 = vrot.slane %v12413_v1, 5 }
 0x37b   : > { %v11045_v35 = vpop.eup %11044  ;;  %v8624_v49 = vadd.f32 -1.0, %v11043_v16  ;;  %v12434_v44 = vpack.c.bf16 %v2048_v36, %v2044_v15  ;;  %v9459_v24 = vpack.c.bf16 %v2048_v36, %v2047_v19  ;;  %v3088_v45 = vshrl.u32 %v9457_v48, 16  ;;  %v10041_v16 = vld [vmem:[#allocation11 + $0x28] ss:$16 sps:$4 sm:$0xff]  }
 0x37c   : > { %v11047_v43 = vpop.eup %11046  ;;  %v3091_v46 = vshll.u32 %v9457_v48, 16  ;;  %v8627_v10 = vadd.f32 -1.0, %v11045_v35  ;;  %v2103_v33 = vsel %vm2063_vm13, %v12378_v22, %v8623_v28 }
 0x37d   : > { %v11049_v50 = vpop.eup %11048  ;;  %v8628_v51 = vadd.f32 -1.0, %v11047_v43  ;;  %v2104_v38 = vsel %vm2064_vm14, %v12381_v27, %v8624_v49  ;;  %3068 = vmatprep.mubr.bf16.mxu1 %v12434_v44  ;;  %v3090_v25 = vrot.slane %v3088_v45, 4  ;;  %v3102_v53 = vshrl.u32 %v9459_v24, 16  ;;  %v10044_v49 = vld [vmem:[#allocation10 + $0x240] ss:$16 sps:$4 sm:$0xff]  }
 0x37e   : > { %v11051_v52 = vpop.eup %11050  ;;  %v3093_v26 = vrot.slane %v3091_v46, 5  ;;  %v3105_v23 = vshll.u32 %v9459_v24, 16  ;;  %3069 = vmatmul.mubr.bf16.vlgmr.msra.gmra.mrb[0].mxu1 %v12430_v37  ;;  %v2107_v22 = vsel %vm2067_vm1, %v12384_v31, %v8627_v10  ;;  %v9461_v56 = vpack.c.bf16 %v2104_v38, %v2103_v33  ;;  %v10043_v31 = vld [vmem:[#allocation11 + $0x2c] ss:$16 sps:$4 sm:$0xff]  }
 0x37f   : > { %v11053_v55 = vpop.eup %11052  ;;  %v2108_v27 = vsel %vm2068_vm2, %v12387_v32, %v8628_v51  ;;  %v8625_v57 = vadd.f32 -1.0, %v11049_v50  ;;  %v3104_v40 = vrot.slane %v3102_v53, 4  ;;  %3545 = vmatpush1.bf16.msra.mxu1 %v10032_v47  ;;  %v12453_v0 = vpack.c.bf16 %v2107_v22, %v2103_v33  ;;  %v10046_v32 = vld [vmem:[#allocation10 + $0x244] ss:$16 sps:$4 sm:$0xff]   ;;  %v10049_v43 = vld [vmem:[#allocation11 + $0x4c] ss:$16 sps:$4 sm:$0xff]  }
 0x380   : > { %v3094_v58 = vor.u32 %v3093_v26, %v3090_v25  ;;  %v3107_v17 = vrot.slane %v3105_v23, 5  ;;  %v9454_v18 = vpack.c.bf16 %v2108_v27, %v2104_v38  ;;  %v11055_v59 = vpop.eup %11054  ;;  %v9463_v61 = vpack.c.bf16 %v2108_v27, %v2107_v22  ;;  %3546 = vmatprep.subr.bf16.mxu1 %v10040_v39  ;;  %v10055_v38 = vld [vmem:[#allocation11 + $0x6c] ss:$16 sps:$4 sm:$0xff]   ;;  %v10053_v53 = vld [vmem:[#allocation11 + $0x68] ss:$16 sps:$4 sm:$0xff]  }
 0x381   : > { %v3124_v20 = vshrl.u32 %v9461_v56, 16  ;;  %v3127_v62 = vshll.u32 %v9461_v56, 16  ;;  %v8626_v5 = vadd.f32 -1.0, %v11051_v52  ;;  %v8629_v7 = vadd.f32 -1.0, %v11053_v55  ;;  %v10056_v55 = vld [vmem:[#allocation10 + $0x280] ss:$16 sps:$4 sm:$0xff]  }
 0x382   : > { %v3095_v60 = vrot.slane %v3094_v58, 4  ;;  %v3108_v4 = vor.u32 %v3107_v17, %v3104_v40  ;;  %2615 = vmatprep.mubr.bf16.mxu0 %v9454_v18  ;;  %v3138_v2 = vshrl.u32 %v9463_v61, 16  ;;  %v3141_v14 = vshll.u32 %v9463_v61, 16  ;;  %v10061_v22 = vld [vmem:[#allocation11 + $0x8c] ss:$16 sps:$4 sm:$0xff]  }
 0x383   : > { %v3126_v8 = vrot.slane %v3124_v20, 4  ;;  %v3129_v9 = vrot.slane %v3127_v62, 5  ;;  %2616 = vmatmul.mubr.bf16.vlgmr.msra.gmra.mrb[4].mxu0 %v12453_v0  ;;  %v8630_v48 = vadd.f32 -1.0, %v11055_v59  ;;  %v2105_v28 = vsel %vm2065_vm3, %v12343_v6, %v8625_v57  ;;  %3547 = vmatpush1.bf16.msra.mxu1 %v10038_v3  ;;  %v10064_v56 = vld [vmem:[#allocation10 + $0x2a4] ss:$16 sps:$4 sm:$0xff]  }
 0x384   : > { %v3109_v15 = vrot.slane %v3108_v4, 4  ;;  %2627 = vmatpush1.bf16.msra.mxu0 %v10035_v21  ;;  %2658 = vmatprep.mubr.bf16.mxu0 %v9454_v18  ;;  %v3100_v19 = vsel %vm12267_vm15, %v3095_v60, %v3099_v29  ;;  %v3140_v35 = vrot.slane %v3138_v2, 4  ;;  %v3143_v36 = vrot.slane %v3141_v14, 5  ;;  %v10052_v29 = vld [vmem:[#allocation10 + $0x264] ss:$16 sps:$4 sm:$0xff]  }
 0x385   : > { %2628 = vmatprep.subr.bf16.mxu0 %v10043_v31  ;;  %v2106_v24 = vsel %vm2066_vm4, %v12365_v12, %v8626_v5  ;;  %v2109_v63 = vsel %vm2069_vm5, %v12368_v11, %v8629_v7  ;;  %3548 = vmatprep.subr.bf16.mxu1 %v10046_v32  ;;  %v2110_v45 = vsel %vm2070_vm6, %v12371_v13, %v8630_v48  ;;  %v10047_v11 = vld [vmem:[#allocation11 + $0x48] ss:$16 sps:$4 sm:$0xff]   ;;  %v10058_v13 = vld [vmem:[#allocation10 + $0x284] ss:$16 sps:$4 sm:$0xff]   ;;  %v10062_v17 = vld [vmem:[#allocation10 + $0x2a0] ss:$16 sps:$4 sm:$0xff]  }
 0x386   : > { %v3114_v6 = vsel %vm12267_vm15, %v3109_v15, %v3113_v42  ;;  %v9462_v46 = vpack.c.bf16 %v2106_v24, %v2105_v28  ;;  %v3130_v47 = vor.u32 %v3129_v9, %v3126_v8  ;;  %v9464_v10 = vpack.c.bf16 %v2110_v45, %v2109_v63  ;;  %v10050_v42 = vld [vmem:[#allocation10 + $0x260] ss:$16 sps:$4 sm:$0xff]   ;;  %v10059_v40 = vld [vmem:[#allocation11 + $0x88] ss:$16 sps:$4 sm:$0xff]   ;;  %v10067_v18 = vld [vmem:[#allocation11 + $0xac] ss:$16 sps:$4 sm:$0xff]  }
 0x387   : > { %v12476_v50 = vcombine.low %v3100_v19, %v3114_v6  ;;  %v12478_v12 = vcombine.high %v3100_v19, %v3114_v6  ;;  %v3144_v51 = vor.u32 %v3143_v36, %v3140_v35  ;;  %3549 = vmatpush1.bf16.msra.mxu1 %v10044_v49  ;;  %v10070_v21 = vld [vmem:[#allocation10 + $0x2c4] ss:$16 sps:$4 sm:$0xff]   ;;  %v10065_v59 = vld [vmem:[#allocation11 + $0xa8] ss:$16 sps:$4 sm:$0xff]   ;;  %v10068_v61 = vld [vmem:[#allocation10 + $0x2c0] ss:$16 sps:$4 sm:$0xff]  }
 0x388   : > { %2629 = vmatpush1.bf16.msra.mxu0 %v10041_v16  ;;  %v3131_v33 = vrot.slane %v3130_v47, 4  ;;  %v3133_v1 = vshll.u32 %v9462_v46, 16  ;;  %v3147_v52 = vshll.u32 %v9464_v10, 16  ;;  %3550 = vmatprep.subr.bf16.mxu1 %v10052_v29  ;;  %v10073_v20 = vld [vmem:[#allocation11 + $0xcc] ss:$16 sps:$4 sm:$0xff]  }
 0x389   : > { %2630 = vmatprep.subr.bf16.mxu0 %v10049_v43  ;;  %v3145_v39 = vrot.slane %v3144_v51, 4  ;;  %3576 = vmatprep.mubr.bf16.mxu1 %v12478_v12  ;;  %v10076_v62 = vld [vmem:[#allocation10 + $0x2e4] ss:$16 sps:$4 sm:$0xff]   ;;  %v10071_v3 = vld [vmem:[#allocation11 + $0xc8] ss:$16 sps:$4 sm:$0xff]  }
 0x38a   : > { %v3135_v25 = vrot.slane %v3133_v1, 5  ;;  %v3149_v26 = vrot.slane %v3147_v52, 5  ;;  %v10074_v31 = vld [vmem:[#allocation10 + $0x2e0] ss:$16 sps:$4 sm:$0xff]   ;;  %v10079_v60 = vld [vmem:[#allocation11 + $0xec] ss:$16 sps:$4 sm:$0xff]  }
 0x38b   : > { %3551 = vmatpush1.bf16.msra.mxu1 %v10050_v42  ;;  %v10082_v4 = vld [vmem:[#allocation10 + $0x304] ss:$16 sps:$4 sm:$0xff]   ;;  %v10077_v32 = vld [vmem:[#allocation11 + $0xe8] ss:$16 sps:$4 sm:$0xff]   ;;  %v10080_v5 = vld [vmem:[#allocation10 + $0x300] ss:$16 sps:$4 sm:$0xff]  }
 0x38c   : > { %2631 = vmatpush1.bf16.msra.mxu0 %v10047_v11  ;;  %v3136_v23 = vsel %vm12267_vm15, %v3131_v33, %v3135_v25  ;;  %v3150_v27 = vsel %vm12267_vm15, %v3145_v39, %v3149_v26  ;;  %3552 = vmatprep.subr.bf16.mxu1 %v10058_v13  ;;  %v10085_v7 = vld [vmem:[#allocation11 + $0x10c] ss:$16 sps:$4 sm:$0xff]   ;;  %v10088_v8 = vld [vmem:[#allocation10 + $0x324] ss:$16 sps:$4 sm:$0xff]   ;;  %v10083_v9 = vld [vmem:[#allocation11 + $0x108] ss:$16 sps:$4 sm:$0xff]  }
 0x38d   : > { %2632 = vmatprep.subr.bf16.mxu0 %v10055_v38  ;;  %v12485_v57 = vcombine.low %v3136_v23, %v3150_v27  ;;  %v12487_v58 = vcombine.high %v3136_v23, %v3150_v27  ;;  %v10086_v2 = vld [vmem:[#allocation10 + $0x320] ss:$16 sps:$4 sm:$0xff]   ;;  %v10091_v14 = vld [vmem:[#allocation11 + $0x12c] ss:$16 sps:$4 sm:$0xff]   ;;  %v10094_v15 = vld [vmem:[#allocation10 + $0x344] ss:$16 sps:$4 sm:$0xff]  }
 0x38e   : > { %v10089_v16 = vld [vmem:[#allocation11 + $0x128] ss:$16 sps:$4 sm:$0xff]   ;;  %v10092_v19 = vld [vmem:[#allocation10 + $0x340] ss:$16 sps:$4 sm:$0xff]   ;;  %v10097_v48 = vld [vmem:[#allocation11 + $0x14c] ss:$16 sps:$4 sm:$0xff]  }
 0x38f   : > { %3553 = vmatpush1.bf16.msra.mxu1 %v10056_v55  ;;  %v10100_v28 = vld [vmem:[#allocation10 + $0x364] ss:$16 sps:$4 sm:$0xff]   ;;  %v10095_v35 = vld [vmem:[#allocation11 + $0x148] ss:$16 sps:$4 sm:$0xff]   ;;  %v10098_v36 = vld [vmem:[#allocation10 + $0x360] ss:$16 sps:$4 sm:$0xff]  }
 0x390   : > { %2633 = vmatpush1.bf16.msra.mxu0 %v10053_v53  ;;  %3554 = vmatprep.subr.bf16.mxu1 %v10064_v56  ;;  %v10103_v49 = vld [vmem:[#allocation11 + $0x16c] ss:$16 sps:$4 sm:$0xff]   ;;  %v10106_v43 = vld [vmem:[#allocation10 + $0x384] ss:$16 sps:$4 sm:$0xff]   ;;  %v10101_v24 = vld [vmem:[#allocation11 + $0x168] ss:$16 sps:$4 sm:$0xff]  }
 0x391   : > { %2634 = vmatprep.subr.bf16.mxu0 %v10061_v22  ;;  %v10104_v63 = vld [vmem:[#allocation10 + $0x380] ss:$16 sps:$4 sm:$0xff]   ;;  %v10109_v6 = vld [vmem:[#allocation11 + $0x18c] ss:$16 sps:$4 sm:$0xff]   ;;  %v10112_v29 = vld [vmem:[#allocation10 + $0x3a4] ss:$16 sps:$4 sm:$0xff]  }
 0x392   : > { %v10107_v45 = vld [vmem:[#allocation11 + $0x188] ss:$16 sps:$4 sm:$0xff]   ;;  %v10110_v46 = vld [vmem:[#allocation10 + $0x3a0] ss:$16 sps:$4 sm:$0xff]   ;;  %v10115_v47 = vld [vmem:[#allocation11 + $0x1ac] ss:$16 sps:$4 sm:$0xff]  }
 0x393   : > { %3555 = vmatpush1.bf16.msra.mxu1 %v10062_v17  ;;  %v10118_v10 = vld [vmem:[#allocation10 + $0x3c4] ss:$16 sps:$4 sm:$0xff]   ;;  %v10113_v51 = vld [vmem:[#allocation11 + $0x1a8] ss:$16 sps:$4 sm:$0xff]   ;;  %v10116_v11 = vld [vmem:[#allocation10 + $0x3c0] ss:$16 sps:$4 sm:$0xff]  }
 0x394   : > { %2635 = vmatpush1.bf16.msra.mxu0 %v10059_v40  ;;  %3556 = vmatprep.subr.bf16.mxu1 %v10070_v21  ;;  %v10121_v33 = vld [vmem:[#allocation11 + $0x1cc] ss:$16 sps:$4 sm:$0xff]   ;;  %v10124_v1 = vld [vmem:[#allocation10 + $0x3e4] ss:$16 sps:$4 sm:$0xff]   ;;  %v10119_v42 = vld [vmem:[#allocation11 + $0x1c8] ss:$16 sps:$4 sm:$0xff]  }
 0x395   : > { %2636 = vmatprep.subr.bf16.mxu0 %v10067_v18  ;;  %v10122_v38 = vld [vmem:[#allocation10 + $0x3e0] ss:$16 sps:$4 sm:$0xff]   ;;  %v10127_v39 = vld [vmem:[#allocation11 + $0x1ec] ss:$16 sps:$4 sm:$0xff]   ;;  %v10125_v13 = vld [vmem:[#allocation11 + $0x1e8] ss:$16 sps:$4 sm:$0xff]  }
 0x396   : > { %v10130_v52 = vld [vmem:[#allocation10 + $0x20c] ss:$16 sps:$4 sm:$0xff]   ;;  %v10128_v25 = vld [vmem:[#allocation10 + $0x208] ss:$16 sps:$4 sm:$0xff]   ;;  %v10133_v26 = vld [vmem:[#allocation10 + $0x4] ss:$16 sps:$4 sm:$0xff]  }
 0x397   : > { %3557 = vmatpush1.bf16.msra.mxu1 %v10068_v61  ;;  %v10136_v53 = vld [vmem:[#allocation10 + $0x22c] ss:$16 sps:$4 sm:$0xff]   ;;  %v10131_v23 = vld [vmem:[#allocation10] ss:$16 sps:$4 sm:$0xff]   ;;  %v10134_v55 = vld [vmem:[#allocation10 + $0x228] ss:$16 sps:$4 sm:$0xff]  }
 0x398   : > { %2637 = vmatpush1.bf16.msra.mxu0 %v10065_v59  ;;  %3558 = vmatprep.subr.bf16.mxu1 %v10076_v62  ;;  %v10139_v22 = vld [vmem:[#allocation10 + $0x24] ss:$16 sps:$4 sm:$0xff]   ;;  %v10142_v27 = vld [vmem:[#allocation10 + $0x24c] ss:$16 sps:$4 sm:$0xff]   ;;  %v10137_v56 = vld [vmem:[#allocation10 + $0x20] ss:$16 sps:$4 sm:$0xff]  }
 0x399   : > { %2638 = vmatprep.subr.bf16.mxu0 %v10073_v20  ;;  %v10140_v40 = vld [vmem:[#allocation10 + $0x248] ss:$16 sps:$4 sm:$0xff]   ;;  %v10145_v17 = vld [vmem:[#allocation10 + $0x44] ss:$16 sps:$4 sm:$0xff]   ;;  %v10148_v18 = vld [vmem:[#allocation10 + $0x26c] ss:$16 sps:$4 sm:$0xff]  }
 0x39a   : > { %v10143_v21 = vld [vmem:[#allocation10 + $0x40] ss:$16 sps:$4 sm:$0xff]   ;;  %v10151_v59 = vld [vmem:[#allocation10 + $0x64] ss:$16 sps:$4 sm:$0xff]   ;;  %v10154_v61 = vld [vmem:[#allocation10 + $0x28c] ss:$16 sps:$4 sm:$0xff]  }
 0x39b   : > { %3559 = vmatpush1.bf16.msra.mxu1 %v10074_v31  ;;  %v10157_v20 = vld [vmem:[#allocation10 + $0x84] ss:$16 sps:$4 sm:$0xff]   ;;  %v10160_v62 = vld [vmem:[#allocation10 + $0x2ac] ss:$16 sps:$4 sm:$0xff]   ;;  %v10158_v31 = vld [vmem:[#allocation10 + $0x2a8] ss:$16 sps:$4 sm:$0xff]  }
 0x39c   : > { %2639 = vmatpush1.bf16.msra.mxu0 %v10071_v3  ;;  %3560 = vmatprep.subr.bf16.mxu1 %v10082_v4  ;;  %v10155_v3 = vld [vmem:[#allocation10 + $0x80] ss:$16 sps:$4 sm:$0xff]   ;;  %v10166_v4 = vld [vmem:[#allocation10 + $0x2cc] ss:$16 sps:$4 sm:$0xff]  }
 0x39d   : > { %2640 = vmatprep.subr.bf16.mxu0 %v10079_v60  ;;  %v10163_v60 = vld [vmem:[#allocation10 + $0xa4] ss:$16 sps:$4 sm:$0xff]  }
 0x39f   : > { %3561 = vmatpush1.bf16.msra.mxu1 %v10080_v5  ;;  %v10164_v5 = vld [vmem:[#allocation10 + $0x2c8] ss:$16 sps:$4 sm:$0xff]  }
 0x3a0   : > { %2641 = vmatpush1.bf16.msra.mxu0 %v10077_v32  ;;  %3562 = vmatprep.subr.bf16.mxu1 %v10088_v8  ;;  %v10161_v32 = vld [vmem:[#allocation10 + $0xa0] ss:$16 sps:$4 sm:$0xff]   ;;  %v10172_v8 = vld [vmem:[#allocation10 + $0x2ec] ss:$16 sps:$4 sm:$0xff]  }
 0x3a1   : > { %2642 = vmatprep.subr.bf16.mxu0 %v10085_v7  ;;  %v10169_v7 = vld [vmem:[#allocation10 + $0xc4] ss:$16 sps:$4 sm:$0xff]  }
 0x3a3   : > { %3563 = vmatpush1.bf16.msra.mxu1 %v10086_v2  ;;  %v10170_v2 = vld [vmem:[#allocation10 + $0x2e8] ss:$16 sps:$4 sm:$0xff]  }
 0x3a4   : > { %2643 = vmatpush1.bf16.msra.mxu0 %v10083_v9  ;;  %3564 = vmatprep.subr.bf16.mxu1 %v10094_v15  ;;  %v10167_v9 = vld [vmem:[#allocation10 + $0xc0] ss:$16 sps:$4 sm:$0xff]   ;;  %v10178_v15 = vld [vmem:[#allocation10 + $0x30c] ss:$16 sps:$4 sm:$0xff]  }
 0x3a5   : > { %2644 = vmatprep.subr.bf16.mxu0 %v10091_v14  ;;  %v10175_v14 = vld [vmem:[#allocation10 + $0xe4] ss:$16 sps:$4 sm:$0xff]  }
 0x3a7   : > { %3565 = vmatpush1.bf16.msra.mxu1 %v10092_v19  ;;  %v10176_v19 = vld [vmem:[#allocation10 + $0x308] ss:$16 sps:$4 sm:$0xff]  }
 0x3a8   : > { %2645 = vmatpush1.bf16.msra.mxu0 %v10089_v16  ;;  %3566 = vmatprep.subr.bf16.mxu1 %v10100_v28  ;;  %v10173_v16 = vld [vmem:[#allocation10 + $0xe0] ss:$16 sps:$4 sm:$0xff]   ;;  %v10184_v28 = vld [vmem:[#allocation10 + $0x32c] ss:$16 sps:$4 sm:$0xff]  }
 0x3a9   : > { %2646 = vmatprep.subr.bf16.mxu0 %v10097_v48  ;;  %v10181_v48 = vld [vmem:[#allocation10 + $0x104] ss:$16 sps:$4 sm:$0xff]  }
 0x3ab   : > { %3567 = vmatpush1.bf16.msra.mxu1 %v10098_v36  ;;  %v10182_v36 = vld [vmem:[#allocation10 + $0x328] ss:$16 sps:$4 sm:$0xff]  }
 0x3ac   : > { %2647 = vmatpush1.bf16.msra.mxu0 %v10095_v35  ;;  %3568 = vmatprep.subr.bf16.mxu1 %v10106_v43  ;;  %v10179_v35 = vld [vmem:[#allocation10 + $0x100] ss:$16 sps:$4 sm:$0xff]   ;;  %v10190_v43 = vld [vmem:[#allocation10 + $0x34c] ss:$16 sps:$4 sm:$0xff]  }
 0x3ad   : > { %2648 = vmatprep.subr.bf16.mxu0 %v10103_v49  ;;  %v10187_v49 = vld [vmem:[#allocation10 + $0x124] ss:$16 sps:$4 sm:$0xff]  }
 0x3af   : > { %3569 = vmatpush1.bf16.msra.mxu1 %v10104_v63  ;;  %v10188_v63 = vld [vmem:[#allocation10 + $0x348] ss:$16 sps:$4 sm:$0xff]  }
 0x3b0   : > { %2649 = vmatpush1.bf16.msra.mxu0 %v10101_v24  ;;  %3570 = vmatprep.subr.bf16.mxu1 %v10112_v29  ;;  %v10185_v24 = vld [vmem:[#allocation10 + $0x120] ss:$16 sps:$4 sm:$0xff]   ;;  %v10196_v29 = vld [vmem:[#allocation10 + $0x36c] ss:$16 sps:$4 sm:$0xff]  }
 0x3b1   : > { %2650 = vmatprep.subr.bf16.mxu0 %v10109_v6  ;;  %v10193_v6 = vld [vmem:[#allocation10 + $0x144] ss:$16 sps:$4 sm:$0xff]  }
 0x3b3   : > { %3571 = vmatpush1.bf16.msra.mxu1 %v10110_v46  ;;  %v10194_v46 = vld [vmem:[#allocation10 + $0x368] ss:$16 sps:$4 sm:$0xff]  }
 0x3b4   : > { %2651 = vmatpush1.bf16.msra.mxu0 %v10107_v45  ;;  %3572 = vmatprep.subr.bf16.mxu1 %v10118_v10  ;;  %v10191_v45 = vld [vmem:[#allocation10 + $0x140] ss:$16 sps:$4 sm:$0xff]   ;;  %v10202_v10 = vld [vmem:[#allocation10 + $0x38c] ss:$16 sps:$4 sm:$0xff]  }
 0x3b5   : > { %2652 = vmatprep.subr.bf16.mxu0 %v10115_v47  ;;  %v10199_v47 = vld [vmem:[#allocation10 + $0x164] ss:$16 sps:$4 sm:$0xff]  }
 0x3b7   : > { %3573 = vmatpush1.bf16.msra.mxu1 %v10116_v11  ;;  %v10200_v11 = vld [vmem:[#allocation10 + $0x388] ss:$16 sps:$4 sm:$0xff]  }
 0x3b8   : > { %2653 = vmatpush1.bf16.msra.mxu0 %v10113_v51  ;;  %3574 = vmatprep.subr.bf16.mxu1 %v10124_v1  ;;  %v10197_v51 = vld [vmem:[#allocation10 + $0x160] ss:$16 sps:$4 sm:$0xff]   ;;  %v10208_v1 = vld [vmem:[#allocation10 + $0x3ac] ss:$16 sps:$4 sm:$0xff]  }
 0x3b9   : > { %2654 = vmatprep.subr.bf16.mxu0 %v10121_v33  ;;  %v10205_v33 = vld [vmem:[#allocation10 + $0x184] ss:$16 sps:$4 sm:$0xff]  }
 0x3bb   : > { %3575 = vmatpush1.bf16.msra.mxu1 %v10122_v38  ;;  %v10206_v38 = vld [vmem:[#allocation10 + $0x3a8] ss:$16 sps:$4 sm:$0xff]  }
 0x3bc   : > { %2655 = vmatpush1.bf16.msra.mxu0 %v10119_v42  ;;  %3587 = vmatprep.subr.bf16.mxu1 %v10130_v52  ;;  %v10203_v42 = vld [vmem:[#allocation10 + $0x180] ss:$16 sps:$4 sm:$0xff]   ;;  %v10214_v52 = vld [vmem:[#allocation10 + $0x3cc] ss:$16 sps:$4 sm:$0xff]  }
 0x3bd   : > { %2656 = vmatprep.subr.bf16.mxu0 %v10127_v39  ;;  %v10211_v39 = vld [vmem:[#allocation10 + $0x1a4] ss:$16 sps:$4 sm:$0xff]  }
 0x3be   : > { %3577 = vmatmul.mubr.bf16.vlgmr.msra.gmra.mrb[4].mxu1 %v12476_v50 }
 0x3bf   : > { %3588 = vmatpush1.bf16.msra.mxu1 %v10128_v25  ;;  %3619 = vmatprep.mubr.bf16.mxu1 %v12478_v12  ;;  %v10146_v12 = vld [vmem:[#allocation10 + $0x268] ss:$16 sps:$4 sm:$0xff]  }
 0x3c0   : > { %2657 = vmatpush1.bf16.msra.mxu0 %v10125_v13  ;;  %3589 = vmatprep.subr.bf16.mxu1 %v10136_v53  ;;  %v10209_v13 = vld [vmem:[#allocation10 + $0x1a0] ss:$16 sps:$4 sm:$0xff]   ;;  %v10212_v25 = vld [vmem:[#allocation10 + $0x3c8] ss:$16 sps:$4 sm:$0xff]   ;;  %v10220_v53 = vld [vmem:[#allocation10 + $0x3ec] ss:$16 sps:$4 sm:$0xff]  }
 0x3c1   : > { %2993 = vmatprep.subr.bf16.mxu0 %v10133_v26  ;;  %v10217_v26 = vld [vmem:[#allocation10 + $0x1c4] ss:$16 sps:$4 sm:$0xff]  }
 0x3c3   : > { %2659 = vmatmul.mubr.bf16.vlgmr.msra.gmra.mrb[8].mxu0 %v12453_v0  ;;  %3590 = vmatpush1.bf16.msra.mxu1 %v10134_v55  ;;  %v10149_v0 = vld [vmem:[#allocation10 + $0x60] ss:$16 sps:$4 sm:$0xff]   ;;  %v10218_v55 = vld [vmem:[#allocation10 + $0x3e8] ss:$16 sps:$4 sm:$0xff]  }
 0x3c4   : > { %2994 = vmatpush1.bf16.msra.mxu0 %v10131_v23  ;;  %3025 = vmatprep.mubr.bf16.mxu0 %v12434_v44  ;;  %v10152_v44 = vld [vmem:[#allocation10 + $0x288] ss:$16 sps:$4 sm:$0xff]   ;;  %v10215_v23 = vld [vmem:[#allocation10 + $0x1c0] ss:$16 sps:$4 sm:$0xff]  }
 0x3c5   : > { %2995 = vmatprep.subr.bf16.mxu0 %v10139_v22  ;;  %3591 = vmatprep.subr.bf16.mxu1 %v10142_v27  ;;  %v10223_v22 = vld [vmem:[#allocation10 + $0x1e4] ss:$16 sps:$4 sm:$0xff]  }
 0x3c6   : > { %v10226_v27 = vld [vmem:[#allocation11 + $0x204] ss:$16 sps:$4 sm:$0xff]  }
 0x3c7   : > { %3592 = vmatpush1.bf16.msra.mxu1 %v10140_v40  ;;  %v10224_v40 = vld [vmem:[#allocation11 + $0x200] ss:$16 sps:$4 sm:$0xff]  }
 0x3c8   : > { %2996 = vmatpush1.bf16.msra.mxu0 %v10137_v56  ;;  %3593 = vmatprep.subr.bf16.mxu1 %v10148_v18  ;;  %v10221_v56 = vld [vmem:[#allocation10 + $0x1e0] ss:$16 sps:$4 sm:$0xff]   ;;  %v10289_v18 = vld [vmem:[#allocation14 + $0x4] ss:$8 sps:$4 sm:$0xff]  }
 0x3c9   : > { %2997 = vmatprep.subr.bf16.mxu0 %v10145_v17  ;;  %v10229_v17 = vld [vmem:[#allocation11 + $0x224] ss:$16 sps:$4 sm:$0xff]  }
 0x3cb   : > { %3594 = vmatpush1.bf16.msra.mxu1 %v10146_v12  ;;  %v10227_v12 = vld [vmem:[#allocation11 + $0x220] ss:$16 sps:$4 sm:$0xff]  }
 0x3cc   : > { %2998 = vmatpush1.bf16.msra.mxu0 %v10143_v21  ;;  %3595 = vmatprep.subr.bf16.mxu1 %v10154_v61  ;;  %v10287_v21 = vld [vmem:[#allocation14] ss:$8 sps:$4 sm:$0xff]   ;;  %v10232_v61 = vld [vmem:[#allocation11 + $0x244] ss:$16 sps:$4 sm:$0xff]  }
 0x3cd   : > { %2999 = vmatprep.subr.bf16.mxu0 %v10151_v59  ;;  %v10295_v59 = vld [vmem:[#allocation14 + $0x14] ss:$8 sps:$4 sm:$0xff]  }
 0x3cf   : > { %3596 = vmatpush1.bf16.msra.mxu1 %v10152_v44  ;;  %v774_v44 = vld [vmem:[%s12165_s2 + $0x8] sm:$0xff] }
 0x3d0   : > { %3000 = vmatpush1.bf16.msra.mxu0 %v10149_v0  ;;  %3597 = vmatprep.subr.bf16.mxu1 %v10160_v62  ;;  %v773_v0 = vld [vmem:[%s12165_s2] sm:$0xff]  ;;  %v776_v62 = vld [vmem:[%s12165_s2 + $0x18] sm:$0xff] }
 0x3d1   : > { %3001 = vmatprep.subr.bf16.mxu0 %v10157_v20  ;;  %v775_v20 = vld [vmem:[%s12165_s2 + $0x10] sm:$0xff] }
 0x3d3   : > { %3598 = vmatpush1.bf16.msra.mxu1 %v10158_v31  ;;  %v10293_v31 = vld [vmem:[#allocation14 + $0x10] ss:$8 sps:$4 sm:$0xff]  }
 0x3d4   : > { %3002 = vmatpush1.bf16.msra.mxu0 %v10155_v3  ;;  %3599 = vmatprep.subr.bf16.mxu1 %v10166_v4  ;;  %v12500_v3 = vrot.slane %v773_v0, 7  ;;  %v12506_v4 = vrot.slane %v776_v62, 7 }
 0x3d5   : > { %3003 = vmatprep.subr.bf16.mxu0 %v10163_v60  ;;  %v12504_v60 = vrot.slane %v775_v20, 7 }
 0x3d6   : > { %vm4209_vm1 = vcmp.gt.f32.partialorder %v12500_v3, 0.0  ;;  %vm4214_vm4 = vcmp.gt.f32.partialorder %v12506_v4, 0.0 }
 0x3d7   : > { %3600 = vmatpush1.bf16.msra.mxu1 %v10164_v5  ;;  %v10301_v5 = vld [vmem:[#allocation14 + $0x24] ss:$8 sps:$4 sm:$0xff]   ;;  %vm4213_vm3 = vcmp.gt.f32.partialorder %v12504_v60, 0.0 }
 0x3d8   : > { %3004 = vmatpush1.bf16.msra.mxu0 %v10161_v32  ;;  %3601 = vmatprep.subr.bf16.mxu1 %v10172_v8  ;;  %v10230_v32 = vld [vmem:[#allocation11 + $0x240] ss:$16 sps:$4 sm:$0xff]  }
 0x3d9   : > { %3005 = vmatprep.subr.bf16.mxu0 %v10169_v7  ;;  %v10235_v7 = vld [vmem:[#allocation11 + $0x264] ss:$16 sps:$4 sm:$0xff]  }
 0x3db   : > { %3602 = vmatpush1.bf16.msra.mxu1 %v10170_v2  ;;  %v12522_v2 = vsel %vm789_vm0, 0.0, %v12506_v4 }
 0x3dc   : > { %3006 = vmatpush1.bf16.msra.mxu0 %v10167_v9  ;;  %3603 = vmatprep.subr.bf16.mxu1 %v10178_v15  ;;  %v12518_v9 = vsel %vm789_vm0, 0.0, %v12504_v60  ;;  %vm4212_vm14 = vcmp.gt.f32.partialorder %v12522_v2, 0.0 }
 0x3dd   : > { %3007 = vmatprep.subr.bf16.mxu0 %v10175_v14  ;;  %vm4211_vm13 = vcmp.gt.f32.partialorder %v12518_v9, 0.0 }
 0x3df   : > { %3604 = vmatpush1.bf16.msra.mxu1 %v10176_v19  ;;  %v12534_v19 = vsub.f32 0.0, %v12522_v2 }
 0x3e0   : > { %3008 = vmatpush1.bf16.msra.mxu0 %v10173_v16  ;;  %3605 = vmatprep.subr.bf16.mxu1 %v10184_v28  ;;  %v12531_v16 = vsub.f32 0.0, %v12518_v9 }
 0x3e1   : > { %3009 = vmatprep.subr.bf16.mxu0 %v10181_v48  ;;  %v10299_v48 = vld [vmem:[#allocation14 + $0x20] ss:$8 sps:$4 sm:$0xff]   ;;  %vm4272_vm10 = vcmp.gt.f32.partialorder %v12534_v19, 0.0 }
 0x3e2   : > { %vm4271_vm9 = vcmp.gt.f32.partialorder %v12531_v16, 0.0 }
 0x3e3   : > { %3606 = vmatpush1.bf16.msra.mxu1 %v10182_v36  ;;  %v10307_v36 = vld [vmem:[#allocation14 + $0x34] ss:$8 sps:$4 sm:$0xff]  }
 0x3e4   : > { %3010 = vmatpush1.bf16.msra.mxu0 %v10179_v35  ;;  %3607 = vmatprep.subr.bf16.mxu1 %v10190_v43  ;;  %v10233_v35 = vld [vmem:[#allocation11 + $0x260] ss:$16 sps:$4 sm:$0xff]   ;;  %v10238_v43 = vld [vmem:[#allocation11 + $0x284] ss:$16 sps:$4 sm:$0xff]  }
 0x3e5   : > { %3011 = vmatprep.subr.bf16.mxu0 %v10187_v49 }
 0x3e7   : > { %3608 = vmatpush1.bf16.msra.mxu1 %v10188_v63  ;;  %v4280_v63 = vmin.f32 %v12534_v19, 0.0 }
 0x3e8   : > { %3012 = vmatpush1.bf16.msra.mxu0 %v10185_v24  ;;  %3609 = vmatprep.subr.bf16.mxu1 %v10196_v29  ;;  %v4279_v24 = vmin.f32 %v12531_v16, 0.0 }
 0x3e9   : > { %3013 = vmatprep.subr.bf16.mxu0 %v10193_v6 }
 0x3eb   : > { %3610 = vmatpush1.bf16.msra.mxu1 %v10194_v46  ;;  %v4291_v46 = vmul.f32 1.442695, %v4279_v24  ;;  %v4219_v24 = vmin.f32 %v12518_v9, 0.0 }
 0x3ec   : > { %3014 = vmatpush1.bf16.msra.mxu0 %v10191_v45  ;;  %3611 = vmatprep.subr.bf16.mxu1 %v10202_v10  ;;  %v10305_v45 = vld [vmem:[#allocation14 + $0x30] ss:$8 sps:$4 sm:$0xff]  }
 0x3ed   : > { %3015 = vmatprep.subr.bf16.mxu0 %v10199_v47  ;;  %v4293_v47 = vmul.f32 1.442695, %v4280_v63  ;;  %v10236_v10 = vld [vmem:[#allocation11 + $0x280] ss:$16 sps:$4 sm:$0xff]   ;;  %v4220_v63 = vmin.f32 %v12522_v2, 0.0 }
 0x3ef   : > { %3612 = vmatpush1.bf16.msra.mxu1 %v10200_v11  ;;  %v10241_v11 = vld [vmem:[#allocation11 + $0x2a4] ss:$16 sps:$4 sm:$0xff]  }
 0x3f0   : > { %3016 = vmatpush1.bf16.msra.mxu0 %v10197_v51  ;;  %3613 = vmatprep.subr.bf16.mxu1 %v10208_v1  ;;  %v10313_v51 = vld [vmem:[#allocation14 + $0x44] ss:$8 sps:$4 sm:$0xff]   ;;  %v10239_v1 = vld [vmem:[#allocation11 + $0x2a0] ss:$16 sps:$4 sm:$0xff]  }
 0x3f1   : > { %3017 = vmatprep.subr.bf16.mxu0 %v10205_v33  ;;  %v10311_v33 = vld [vmem:[#allocation14 + $0x40] ss:$8 sps:$4 sm:$0xff]  }
 0x3f3   : > { %3614 = vmatpush1.bf16.msra.mxu1 %v10206_v38  ;;  %v10244_v38 = vld [vmem:[#allocation11 + $0x2c4] ss:$16 sps:$4 sm:$0xff]  }
 0x3f4   : > { %3018 = vmatpush1.bf16.msra.mxu0 %v10203_v42  ;;  %3615 = vmatprep.subr.bf16.mxu1 %v10214_v52  ;;  %v10319_v42 = vld [vmem:[#allocation14 + $0x54] ss:$8 sps:$4 sm:$0xff]   ;;  %v10242_v52 = vld [vmem:[#allocation11 + $0x2c0] ss:$16 sps:$4 sm:$0xff]  }
 0x3f5   : > { %3019 = vmatprep.subr.bf16.mxu0 %v10211_v39  ;;  %v10317_v39 = vld [vmem:[#allocation14 + $0x50] ss:$8 sps:$4 sm:$0xff]  }
 0x3f7   : > { %3616 = vmatpush1.bf16.msra.mxu1 %v10212_v25 }
 0x3f8   : > { %3020 = vmatpush1.bf16.msra.mxu0 %v10209_v13  ;;  %3617 = vmatprep.subr.bf16.mxu1 %v10220_v53  ;;  %v10325_v13 = vld [vmem:[#allocation14 + $0x64] ss:$8 sps:$4 sm:$0xff]  }
 0x3f9   : > { %3021 = vmatprep.subr.bf16.mxu0 %v10217_v26  ;;  %v10247_v26 = vld [vmem:[#allocation11 + $0x2e4] ss:$16 sps:$4 sm:$0xff]  }
 0x3fb   : > { %3618 = vmatpush1.bf16.msra.mxu1 %v10218_v55 }
 0x3fc   : > { %3022 = vmatpush1.bf16.msra.mxu0 %v10215_v23  ;;  %4031 = vmatprep.subr.bf16.mxu1 %v10226_v27  ;;  %v10323_v27 = vld [vmem:[#allocation14 + $0x60] ss:$8 sps:$4 sm:$0xff]  }
 0x3fd   : > { %3023 = vmatprep.subr.bf16.mxu0 %v10223_v22  ;;  %v10245_v22 = vld [vmem:[#allocation11 + $0x2e0] ss:$16 sps:$4 sm:$0xff]  }
 0x3fe   : > { %3620 = vmatmul.mubr.bf16.vlgmr.msra.gmra.mrb[0].mxu1 %v12476_v50  ;;  %v12502_v50 = vrot.slane %v774_v44, 7  ;;  %v10329_v44 = vld [vmem:[#allocation14 + $0x70] ss:$8 sps:$4 sm:$0xff]  }
 0x3ff   : > { %4032 = vmatpush1.bf16.msra.mxu1 %v10224_v40  ;;  %4063 = vmatprep.mubr.bf16.mxu1 %v12487_v58 }
 0x400   : > { %3024 = vmatpush1.bf16.msra.mxu0 %v10221_v56  ;;  %4033 = vmatprep.subr.bf16.mxu1 %v10229_v17  ;;  %v12514_v8 = vsel %vm789_vm0, 0.0, %v12502_v50  ;;  %v10331_v17 = vld [vmem:[#allocation14 + $0x74] ss:$8 sps:$4 sm:$0xff]   ;;  %vm4210_vm2 = vcmp.gt.f32.partialorder %v12502_v50, 0.0 }
 0x401   : > { %4563 = vmatprep.subr.bf16.mxu0 %v10289_v18  ;;  %v12528_v15 = vsub.f32 0.0, %v12514_v8  ;;  %vm4208_vm12 = vcmp.gt.f32.partialorder %v12514_v8, 0.0 }
 0x403   : > { %3026 = vmatmul.mubr.bf16.vlgmr.msra.gmra.mrb[4].mxu0 %v12430_v37  ;;  %4034 = vmatpush1.bf16.msra.mxu1 %v10227_v12  ;;  %v12510_v37 = vsel %vm789_vm0, 0.0, %v12500_v3  ;;  %v4276_v49 = vmin.f32 %v12528_v15, 0.0  ;;  %vm4268_vm8 = vcmp.gt.f32.partialorder %v12528_v15, 0.0 }
 0x404   : > { %4564 = vmatpush1.bf16.msra.mxu0 %v10287_v21  ;;  %4035 = vmatprep.subr.bf16.mxu1 %v10232_v61  ;;  %v12525_v14 = vsub.f32 0.0, %v12510_v37  ;;  %v10250_v21 = vld [vmem:[#allocation11 + $0x304] ss:$16 sps:$4 sm:$0xff]   ;;  %vm4207_vm11 = vcmp.gt.f32.partialorder %v12510_v37, 0.0 }
 0x405   : > { %4565 = vmatprep.subr.bf16.mxu0 %v10295_v59  ;;  %v4285_v29 = vmul.f32 1.442695, %v4276_v49  ;;  %v10254_v49 = vld [vmem:[#allocation11 + $0x340] ss:$16 sps:$4 sm:$0xff]  }
 0x406   : > { %v4275_v28 = vmin.f32 %v12525_v14, 0.0  ;;  %vm4267_vm7 = vcmp.gt.f32.partialorder %v12525_v14, 0.0 }
 0x407   : > { %4036 = vmatpush1.bf16.msra.mxu1 %v10230_v32  ;;  %v10337_v32 = vld [vmem:[#allocation14 + $0x84] ss:$8 sps:$4 sm:$0xff]  }
 0x408   : > { %4566 = vmatpush1.bf16.msra.mxu0 %v10293_v31  ;;  %4037 = vmatprep.subr.bf16.mxu1 %v10235_v7  ;;  %v4283_v6 = vmul.f32 1.442695, %v4275_v28  ;;  %v10248_v31 = vld [vmem:[#allocation11 + $0x300] ss:$16 sps:$4 sm:$0xff]   ;;  %v10256_v28 = vld [vmem:[#allocation11 + $0x344] ss:$16 sps:$4 sm:$0xff]  }
 0x409   : > { %4567 = vmatprep.subr.bf16.mxu0 %v10301_v5 }
 0x40a   : > { %11056 = vpow2.f32 %v4283_v6  ;;  %v10259_v6 = vld [vmem:[#allocation11 + $0x364] ss:$16 sps:$4 sm:$0xff]  }
 0x40b   : > { %4038 = vmatpush1.bf16.msra.mxu1 %v10233_v35  ;;  %11058 = vpow2.f32 %v4285_v29  ;;  %v4215_v35 = vmin.f32 %v12510_v37, 0.0 }
 0x40c   : > { %4568 = vmatpush1.bf16.msra.mxu0 %v10299_v48  ;;  %4039 = vmatprep.subr.bf16.mxu1 %v10238_v43  ;;  %11060 = vpow2.f32 %v4291_v46  ;;  %v10251_v48 = vld [vmem:[#allocation11 + $0x320] ss:$16 sps:$4 sm:$0xff]   ;;  %v10349_v43 = vld [vmem:[#allocation14 + $0xa4] ss:$8 sps:$4 sm:$0xff]   ;;  %v4231_v46 = vmul.f32 1.442695, %v4219_v24 }
 0x40d   : > { %4569 = vmatprep.subr.bf16.mxu0 %v10307_v36  ;;  %11062 = vpow2.f32 %v4293_v47  ;;  %v4216_v36 = vmin.f32 %v12514_v8, 0.0  ;;  %v4223_v29 = vmul.f32 1.442695, %v4215_v35  ;;  %v4233_v47 = vmul.f32 1.442695, %v4220_v63 }
 0x40e   : > { %v10373_v24 = vld [vmem:[#allocation13 + $0x14] ss:$8 sps:$4 sm:$0xff]  }
 0x40f   : > { %4040 = vmatpush1.bf16.msra.mxu1 %v10236_v10  ;;  %v10347_v10 = vld [vmem:[#allocation14 + $0xa0] ss:$8 sps:$4 sm:$0xff]   ;;  %11064 = vpow2.f32 %v4223_v29  ;;  %v10280_v63 = vld [vmem:[#allocation11 + $0x24c] ss:$16 sps:$4 sm:$0xff]  }
 0x410   : > { %4570 = vmatpush1.bf16.msra.mxu0 %v10305_v45  ;;  %4041 = vmatprep.subr.bf16.mxu1 %v10241_v11  ;;  %v4225_v45 = vmul.f32 1.442695, %v4216_v36  ;;  %v10355_v11 = vld [vmem:[#allocation14 + $0xb4] ss:$8 sps:$4 sm:$0xff]   ;;  %v10368_v36 = vld [vmem:[#allocation13] ss:$8 sps:$4 sm:$0xff]  }
 0x411   : > { %4571 = vmatprep.subr.bf16.mxu0 %v10313_v51  ;;  %v10257_v51 = vld [vmem:[#allocation11 + $0x360] ss:$16 sps:$4 sm:$0xff]   ;;  %v10278_v29 = vld [vmem:[#allocation11 + $0x248] ss:$16 sps:$4 sm:$0xff]  }
 0x412   : > { %11066 = vpow2.f32 %v4225_v45  ;;  %v10374_v45 = vld [vmem:[#allocation13 + $0x20] ss:$8 sps:$4 sm:$0xff]  }
 0x413   : > { %4042 = vmatpush1.bf16.msra.mxu1 %v10239_v1  ;;  %11068 = vpow2.f32 %v4231_v46  ;;  %v10353_v1 = vld [vmem:[#allocation14 + $0xb0] ss:$8 sps:$4 sm:$0xff]  }
 0x414   : > { %4572 = vmatpush1.bf16.msra.mxu0 %v10311_v33  ;;  %v11057_v25 = vpop.eup %11056  ;;  %4043 = vmatprep.subr.bf16.mxu1 %v10244_v38  ;;  %v10262_v33 = vld [vmem:[#allocation11 + $0x384] ss:$16 sps:$4 sm:$0xff]   ;;  %11070 = vpow2.f32 %v4233_v47  ;;  %v10281_v46 = vld [vmem:[#allocation11 + $0x268] ss:$16 sps:$4 sm:$0xff]   ;;  %v10286_v47 = vld [vmem:[#allocation11 + $0x28c] ss:$16 sps:$4 sm:$0xff]  }
 0x415   : > { %4573 = vmatprep.subr.bf16.mxu0 %v10319_v42  ;;  %v11059_v53 = vpop.eup %11058  ;;  %v8911_v23 = vadd.f32 -1.0, %v11057_v25  ;;  %v10260_v42 = vld [vmem:[#allocation11 + $0x380] ss:$16 sps:$4 sm:$0xff]   ;;  %v10358_v38 = vld [vmem:[#allocation14 + $0xc4] ss:$8 sps:$4 sm:$0xff]  }
 0x416   : > { %v11061_v55 = vpop.eup %11060  ;;  %v8912_v56 = vadd.f32 -1.0, %v11059_v53  ;;  %v10361_v25 = vld [vmem:[#allocation14 + $0xd4] ss:$8 sps:$4 sm:$0xff]  }
 0x417   : > { %v11063_v40 = vpop.eup %11062  ;;  %4044 = vmatpush1.bf16.msra.mxu1 %v10242_v52  ;;  %v8915_v18 = vadd.f32 -1.0, %v11061_v55  ;;  %v12547_v59 = vsel %vm4267_vm7, %v12525_v14, %v8911_v23  ;;  %v10253_v14 = vld [vmem:[#allocation11 + $0x324] ss:$16 sps:$4 sm:$0xff]   ;;  %v10356_v52 = vld [vmem:[#allocation14 + $0xc0] ss:$8 sps:$4 sm:$0xff]  }
 0x418   : > { %4574 = vmatpush1.bf16.msra.mxu0 %v10317_v39  ;;  %4045 = vmatprep.subr.bf16.mxu1 %v10247_v26  ;;  %v8916_v12 = vadd.f32 -1.0, %v11063_v40  ;;  %v4308_v61 = vsel %vm4268_vm8, %v12528_v15, %v8912_v56  ;;  %v10335_v15 = vld [vmem:[#allocation14 + $0x80] ss:$8 sps:$4 sm:$0xff]   ;;  %v10265_v39 = vld [vmem:[#allocation11 + $0x3a4] ss:$16 sps:$4 sm:$0xff]  }
 0x419   : > { %4575 = vmatprep.subr.bf16.mxu0 %v10325_v13  ;;  %v12553_v0 = vpack.c.bf16 %v4308_v61, %v12547_v59  ;;  %v12556_v20 = vsel %vm4271_vm9, %v12531_v16, %v8915_v18  ;;  %v10343_v16 = vld [vmem:[#allocation14 + $0x94] ss:$8 sps:$4 sm:$0xff]   ;;  %v10263_v13 = vld [vmem:[#allocation11 + $0x3a0] ss:$16 sps:$4 sm:$0xff]   ;;  %v11065_v26 = vpop.eup %11064  ;;  %v10364_v18 = vld [vmem:[#allocation14 + $0xe4] ss:$8 sps:$4 sm:$0xff]  }
 0x41a   : > { %v4312_v62 = vsel %vm4272_vm10, %v12534_v19, %v8916_v12  ;;  %v10341_v19 = vld [vmem:[#allocation14 + $0x90] ss:$8 sps:$4 sm:$0xff]   ;;  %v10268_v53 = vld [vmem:[#allocation11 + $0x3c4] ss:$16 sps:$4 sm:$0xff]   ;;  %v8903_v55 = vadd.f32 -1.0, %v11065_v26  ;;  %v9465_v35 = vpack.c.bf16 %v12556_v20, %v12547_v59 }
 0x41b   : > { %4046 = vmatpush1.bf16.msra.mxu1 %v10245_v22  ;;  %v9466_v5 = vpack.c.bf16 %v4312_v62, %v4308_v61  ;;  %v12560_v7 = vpack.c.bf16 %v4312_v62, %v12556_v20  ;;  %v10271_v61 = vld [vmem:[#allocation11 + $0x3e4] ss:$16 sps:$4 sm:$0xff]   ;;  %v10283_v20 = vld [vmem:[#allocation11 + $0x26c] ss:$16 sps:$4 sm:$0xff]  }
 0x41c   : > { %4576 = vmatpush1.bf16.msra.mxu0 %v10323_v27  ;;  %4047 = vmatprep.subr.bf16.mxu1 %v10250_v21  ;;  %v11067_v23 = vpop.eup %11066  ;;  %v10359_v27 = vld [vmem:[#allocation14 + $0xd0] ss:$8 sps:$4 sm:$0xff]   ;;  %v12573_v12 = vsel %vm4207_vm11, %v12510_v37, %v8903_v55  ;;  %v10376_v59 = vld [vmem:[#allocation13 + $0x24] ss:$8 sps:$4 sm:$0xff]   ;;  %v10391_v55 = vld [vmem:[#allocation13 + $0x74] ss:$8 sps:$4 sm:$0xff]  }
 0x41d   : > { %4577 = vmatprep.subr.bf16.mxu0 %v10331_v17  ;;  %4595 = vmatprep.mubr.bf16.mxu0 %v9466_v5  ;;  %v11069_v22 = vpop.eup %11068  ;;  %v8904_v56 = vadd.f32 -1.0, %v11067_v23  ;;  %v10266_v17 = vld [vmem:[#allocation11 + $0x3c0] ss:$16 sps:$4 sm:$0xff]   ;;  %v10304_v26 = vld [vmem:[#allocation11 + $0x2ec] ss:$16 sps:$4 sm:$0xff]  }
 0x41e   : > { %v11071_v40 = vpop.eup %11070  ;;  %v8907_v21 = vadd.f32 -1.0, %v11069_v22  ;;  %v10362_v5 = vld [vmem:[#allocation14 + $0xe0] ss:$8 sps:$4 sm:$0xff]   ;;  %v10310_v22 = vld [vmem:[#allocation11 + $0x30c] ss:$16 sps:$4 sm:$0xff]  }
 0x41f   : > { %4048 = vmatpush1.bf16.msra.mxu1 %v10248_v31  ;;  %v4248_v62 = vsel %vm4208_vm12, %v12514_v8, %v8904_v56  ;;  %v10274_v8 = vld [vmem:[#allocation11 + $0x20c] ss:$16 sps:$4 sm:$0xff]   ;;  %v10302_v23 = vld [vmem:[#allocation11 + $0x2e8] ss:$16 sps:$4 sm:$0xff]  }
 0x420   : > { %4578 = vmatpush1.bf16.msra.mxu0 %v10329_v44  ;;  %4049 = vmatprep.subr.bf16.mxu1 %v10253_v14  ;;  %v8908_v44 = vadd.f32 -1.0, %v11071_v40  ;;  %v12579_v31 = vsel %vm4211_vm13, %v12518_v9, %v8907_v21  ;;  %v10365_v9 = vld [vmem:[#allocation14 + $0xf0] ss:$8 sps:$4 sm:$0xff]   ;;  %v10394_v40 = vld [vmem:[#allocation13 + $0x84] ss:$8 sps:$4 sm:$0xff]  }
 0x421   : > { %4579 = vmatprep.subr.bf16.mxu0 %v10337_v32  ;;  %v12582_v32 = vpack.c.bf16 %v4248_v62, %v12573_v12  ;;  %v9467_v37 = vpack.c.bf16 %v12579_v31, %v12573_v12  ;;  %v10308_v56 = vld [vmem:[#allocation11 + $0x308] ss:$16 sps:$4 sm:$0xff]  }
 0x422   : > { %v4252_v14 = vsel %vm4212_vm14, %v12522_v2, %v8908_v44  ;;  %v10370_v2 = vld [vmem:[#allocation13 + $0x4] ss:$8 sps:$4 sm:$0xff]   ;;  %v10314_v21 = vld [vmem:[#allocation11 + $0x328] ss:$16 sps:$4 sm:$0xff]  }
 0x423   : > { %4050 = vmatpush1.bf16.msra.mxu1 %v10251_v48  ;;  %v10367_v48 = vld [vmem:[#allocation14 + $0xf4] ss:$8 sps:$4 sm:$0xff]   ;;  %v4825_v12 = vshll.u32 %v12582_v32, 16 }
 0x424   : > { %4580 = vmatpush1.bf16.msra.mxu0 %v10335_v15  ;;  %4051 = vmatprep.subr.bf16.mxu1 %v10256_v28  ;;  %v10269_v15 = vld [vmem:[#allocation11 + $0x3e0] ss:$16 sps:$4 sm:$0xff]   ;;  %v10272_v28 = vld [vmem:[#allocation11 + $0x208] ss:$16 sps:$4 sm:$0xff]   ;;  %v10322_v44 = vld [vmem:[#allocation11 + $0x34c] ss:$16 sps:$4 sm:$0xff]  }
 0x425   : > { %4581 = vmatprep.subr.bf16.mxu0 %v10343_v16  ;;  %v12588_v16 = vpack.c.bf16 %v4252_v14, %v12579_v31 }
 0x427   : > { %4052 = vmatpush1.bf16.msra.mxu1 %v10254_v49  ;;  %v9468_v49 = vpack.c.bf16 %v4252_v14, %v4248_v62  ;;  %v10395_v62 = vld [vmem:[#allocation13 + $0x90] ss:$8 sps:$4 sm:$0xff]   ;;  %v10400_v14 = vld [vmem:[#allocation13 + $0xa4] ss:$8 sps:$4 sm:$0xff]   ;;  %v4836_v31 = vshrl.u32 %v12588_v16, 16 }
 0x428   : > { %4582 = vmatpush1.bf16.msra.mxu0 %v10341_v19  ;;  %4053 = vmatprep.subr.bf16.mxu1 %v10259_v6  ;;  %v10277_v19 = vld [vmem:[#allocation11 + $0x22c] ss:$16 sps:$4 sm:$0xff]   ;;  %v10371_v6 = vld [vmem:[#allocation13 + $0x10] ss:$8 sps:$4 sm:$0xff]  }
 0x429   : > { %4583 = vmatprep.subr.bf16.mxu0 %v10349_v43  ;;  %v10275_v43 = vld [vmem:[#allocation11 + $0x228] ss:$16 sps:$4 sm:$0xff]  }
 0x42b   : > { %4054 = vmatpush1.bf16.msra.mxu1 %v10257_v51  ;;  %v10284_v51 = vld [vmem:[#allocation11 + $0x288] ss:$16 sps:$4 sm:$0xff]  }
 0x42c   : > { %4584 = vmatpush1.bf16.msra.mxu0 %v10347_v10  ;;  %4055 = vmatprep.subr.bf16.mxu1 %v10262_v33  ;;  %v10377_v10 = vld [vmem:[#allocation13 + $0x30] ss:$8 sps:$4 sm:$0xff]   ;;  %v10292_v33 = vld [vmem:[#allocation11 + $0x2ac] ss:$16 sps:$4 sm:$0xff]  }
 0x42d   : > { %4585 = vmatprep.subr.bf16.mxu0 %v10355_v11  ;;  %v10382_v11 = vld [vmem:[#allocation13 + $0x44] ss:$8 sps:$4 sm:$0xff]  }
 0x42f   : > { %4056 = vmatpush1.bf16.msra.mxu1 %v10260_v42  ;;  %v10290_v42 = vld [vmem:[#allocation11 + $0x2a8] ss:$16 sps:$4 sm:$0xff]  }
 0x430   : > { %4586 = vmatpush1.bf16.msra.mxu0 %v10353_v1  ;;  %4057 = vmatprep.subr.bf16.mxu1 %v10265_v39  ;;  %v10380_v1 = vld [vmem:[#allocation13 + $0x40] ss:$8 sps:$4 sm:$0xff]   ;;  %v10298_v39 = vld [vmem:[#allocation11 + $0x2cc] ss:$16 sps:$4 sm:$0xff]  }
 0x431   : > { %4587 = vmatprep.subr.bf16.mxu0 %v10358_v38  ;;  %v10385_v38 = vld [vmem:[#allocation13 + $0x54] ss:$8 sps:$4 sm:$0xff]  }
 0x433   : > { %4058 = vmatpush1.bf16.msra.mxu1 %v10263_v13  ;;  %v10296_v13 = vld [vmem:[#allocation11 + $0x2c8] ss:$16 sps:$4 sm:$0xff]  }
 0x434   : > { %4588 = vmatpush1.bf16.msra.mxu0 %v10356_v52  ;;  %4059 = vmatprep.subr.bf16.mxu1 %v10268_v53  ;;  %v10383_v52 = vld [vmem:[#allocation13 + $0x50] ss:$8 sps:$4 sm:$0xff]   ;;  %v10386_v53 = vld [vmem:[#allocation13 + $0x60] ss:$8 sps:$4 sm:$0xff]  }
 0x435   : > { %4589 = vmatprep.subr.bf16.mxu0 %v10361_v25  ;;  %v10388_v25 = vld [vmem:[#allocation13 + $0x64] ss:$8 sps:$4 sm:$0xff]  }
 0x437   : > { %4060 = vmatpush1.bf16.msra.mxu1 %v10266_v17  ;;  %v10316_v17 = vld [vmem:[#allocation11 + $0x32c] ss:$16 sps:$4 sm:$0xff]  }
 0x438   : > { %4590 = vmatpush1.bf16.msra.mxu0 %v10359_v27  ;;  %4061 = vmatprep.subr.bf16.mxu1 %v10271_v61  ;;  %v10389_v27 = vld [vmem:[#allocation13 + $0x70] ss:$8 sps:$4 sm:$0xff]   ;;  %v10397_v61 = vld [vmem:[#allocation13 + $0x94] ss:$8 sps:$4 sm:$0xff]  }
 0x439   : > { %4591 = vmatprep.subr.bf16.mxu0 %v10364_v18  ;;  %v10392_v18 = vld [vmem:[#allocation13 + $0x80] ss:$8 sps:$4 sm:$0xff]  }
 0x43b   : > { %4062 = vmatpush1.bf16.msra.mxu1 %v10269_v15  ;;  %v10328_v15 = vld [vmem:[#allocation11 + $0x36c] ss:$16 sps:$4 sm:$0xff]  }
 0x43c   : > { %4592 = vmatpush1.bf16.msra.mxu0 %v10362_v5  ;;  %4074 = vmatprep.subr.bf16.mxu1 %v10274_v8  ;;  %v10320_v5 = vld [vmem:[#allocation11 + $0x348] ss:$16 sps:$4 sm:$0xff]  }
 0x43d   : > { %4593 = vmatprep.subr.bf16.mxu0 %v10367_v48  ;;  %v10398_v48 = vld [vmem:[#allocation13 + $0xa0] ss:$8 sps:$4 sm:$0xff]  }
 0x43e   : > { %4064 = vmatmul.mubr.bf16.vlgmr.msra.gmra.mrb[4].mxu1 %v12485_v57  ;;  %v10326_v8 = vld [vmem:[#allocation11 + $0x368] ss:$16 sps:$4 sm:$0xff]  }
 0x43f   : > { %4075 = vmatpush1.bf16.msra.mxu1 %v10272_v28  ;;  %4106 = vmatprep.mubr.bf16.mxu1 %v12487_v58  ;;  %v10379_v58 = vld [vmem:[#allocation13 + $0x34] ss:$8 sps:$4 sm:$0xff]  }
 0x440   : > { %4594 = vmatpush1.bf16.msra.mxu0 %v10365_v9  ;;  %4076 = vmatprep.subr.bf16.mxu1 %v10277_v19  ;;  %v10403_v9 = vld [vmem:[#allocation13 + $0xb4] ss:$8 sps:$4 sm:$0xff]   ;;  %v10401_v19 = vld [vmem:[#allocation13 + $0xb0] ss:$8 sps:$4 sm:$0xff]  }
 0x441   : > { %4770 = vmatprep.subr.bf16.mxu0 %v10370_v2  ;;  %v10334_v28 = vld [vmem:[#allocation11 + $0x38c] ss:$16 sps:$4 sm:$0xff]   ;;  %v10332_v2 = vld [vmem:[#allocation11 + $0x388] ss:$16 sps:$4 sm:$0xff]  }
 0x443   : > { %4596 = vmatmul.mubr.bf16.vlgmr.msra.gmra.mrb[12].mxu0 %v9465_v35  ;;  %4077 = vmatpush1.bf16.msra.mxu1 %v10275_v43  ;;  %v10406_v35 = vld [vmem:[#allocation13 + $0xc4] ss:$8 sps:$4 sm:$0xff]   ;;  %v10338_v43 = vld [vmem:[#allocation11 + $0x3a8] ss:$16 sps:$4 sm:$0xff]  }
 0x444   : > { %4771 = vmatpush1.bf16.msra.mxu0 %v10368_v36  ;;  %4802 = vmatprep.mubr.bf16.mxu0 %v9468_v49  ;;  %v10340_v36 = vld [vmem:[#allocation11 + $0x3ac] ss:$16 sps:$4 sm:$0xff]   ;;  %v10404_v49 = vld [vmem:[#allocation13 + $0xc0] ss:$8 sps:$4 sm:$0xff]  }
 0x445   : > { %4772 = vmatprep.subr.bf16.mxu0 %v10373_v24  ;;  %4078 = vmatprep.subr.bf16.mxu1 %v10280_v63  ;;  %v10409_v24 = vld [vmem:[#allocation13 + $0xd4] ss:$8 sps:$4 sm:$0xff]  }
 0x446   : > { %v10346_v63 = vld [vmem:[#allocation11 + $0x3cc] ss:$16 sps:$4 sm:$0xff]  }
 0x447   : > { %4079 = vmatpush1.bf16.msra.mxu1 %v10278_v29  ;;  %v10344_v29 = vld [vmem:[#allocation11 + $0x3c8] ss:$16 sps:$4 sm:$0xff]  }
 0x448   : > { %4773 = vmatpush1.bf16.msra.mxu0 %v10371_v6  ;;  %4080 = vmatprep.subr.bf16.mxu1 %v10283_v20  ;;  %v10407_v6 = vld [vmem:[#allocation13 + $0xd0] ss:$8 sps:$4 sm:$0xff]   ;;  %v10352_v20 = vld [vmem:[#allocation11 + $0x3ec] ss:$16 sps:$4 sm:$0xff]  }
 0x449   : > { %4774 = vmatprep.subr.bf16.mxu0 %v10376_v59  ;;  %v10412_v59 = vld [vmem:[#allocation13 + $0xe4] ss:$8 sps:$4 sm:$0xff]  }
 0x44b   : > { %4081 = vmatpush1.bf16.msra.mxu1 %v10281_v46  ;;  %v10350_v46 = vld [vmem:[#allocation11 + $0x3e8] ss:$16 sps:$4 sm:$0xff]  }
 0x44c   : > { %4775 = vmatpush1.bf16.msra.mxu0 %v10374_v45  ;;  %4082 = vmatprep.subr.bf16.mxu1 %v10286_v47  ;;  %v10410_v45 = vld [vmem:[#allocation13 + $0xe0] ss:$8 sps:$4 sm:$0xff]   ;;  %v10413_v47 = vld [vmem:[#allocation13 + $0xf0] ss:$8 sps:$4 sm:$0xff]  }
 0x44d   : > { %4776 = vmatprep.subr.bf16.mxu0 %v10379_v58  ;;  %v10415_v58 = vld [vmem:[#allocation13 + $0xf4] ss:$8 sps:$4 sm:$0xff]  }
 0x44f   : > { %4083 = vmatpush1.bf16.msra.mxu1 %v10284_v51  ;;  %v10416_v51 = vld [vmem:[#allocation13 + $0x100] ss:$8 sps:$4 sm:$0xff]  }
 0x450   : > { %4777 = vmatpush1.bf16.msra.mxu0 %v10377_v10  ;;  %4084 = vmatprep.subr.bf16.mxu1 %v10292_v33  ;;  %v10418_v10 = vld [vmem:[#allocation13 + $0x104] ss:$8 sps:$4 sm:$0xff]   ;;  %v4217_v33 = vmin.f32 %v12500_v3, 0.0 }
 0x451   : > { %4778 = vmatprep.subr.bf16.mxu0 %v10382_v11  ;;  %v10421_v11 = vld [vmem:[#allocation13 + $0x114] ss:$8 sps:$4 sm:$0xff]  }
 0x453   : > { %4085 = vmatpush1.bf16.msra.mxu1 %v10290_v42  ;;  %v4221_v42 = vmin.f32 %v12504_v60, 0.0 }
 0x454   : > { %4779 = vmatpush1.bf16.msra.mxu0 %v10380_v1  ;;  %4086 = vmatprep.subr.bf16.mxu1 %v10298_v39  ;;  %v4218_v1 = vmin.f32 %v12502_v50, 0.0  ;;  %v4227_v39 = vmul.f32 1.442695, %v4217_v33 }
 0x455   : > { %4780 = vmatprep.subr.bf16.mxu0 %v10385_v38  ;;  %v4222_v38 = vmin.f32 %v12506_v4, 0.0 }
 0x456   : > { %11072 = vpow2.f32 %v4227_v39 }
 0x457   : > { %4087 = vmatpush1.bf16.msra.mxu1 %v10296_v13  ;;  %v4235_v13 = vmul.f32 1.442695, %v4221_v42 }
 0x458   : > { %4781 = vmatpush1.bf16.msra.mxu0 %v10383_v52  ;;  %4088 = vmatprep.subr.bf16.mxu1 %v10304_v26  ;;  %v4229_v52 = vmul.f32 1.442695, %v4218_v1  ;;  %v10424_v26 = vld [vmem:[#allocation13 + $0x124] ss:$8 sps:$4 sm:$0xff]   ;;  %v10437_v1 = vld [vmem:[#allocation13 + $0x170] ss:$8 sps:$4 sm:$0xff]  }
 0x459   : > { %4782 = vmatprep.subr.bf16.mxu0 %v10388_v25  ;;  %v4237_v25 = vmul.f32 1.442695, %v4222_v38  ;;  %v10442_v38 = vld [vmem:[#allocation13 + $0x184] ss:$8 sps:$4 sm:$0xff]  }
 0x45a   : > { %11074 = vpow2.f32 %v4229_v52 }
 0x45b   : > { %4089 = vmatpush1.bf16.msra.mxu1 %v10302_v23  ;;  %11076 = vpow2.f32 %v4235_v13  ;;  %v10427_v23 = vld [vmem:[#allocation13 + $0x134] ss:$8 sps:$4 sm:$0xff]   ;;  %v10440_v13 = vld [vmem:[#allocation13 + $0x180] ss:$8 sps:$4 sm:$0xff]  }
 0x45c   : > { %4783 = vmatpush1.bf16.msra.mxu0 %v10386_v53  ;;  %4090 = vmatprep.subr.bf16.mxu1 %v10310_v22  ;;  %v10422_v53 = vld [vmem:[#allocation13 + $0x120] ss:$8 sps:$4 sm:$0xff]   ;;  %11078 = vpow2.f32 %v4237_v25  ;;  %v4839_v22 = vshll.u32 %v12588_v16, 16  ;;  %v10443_v25 = vld [vmem:[#allocation13 + $0x190] ss:$8 sps:$4 sm:$0xff]  }
 0x45d   : > { %4784 = vmatprep.subr.bf16.mxu0 %v10391_v55  ;;  %v4822_v55 = vshrl.u32 %v12582_v32, 16  ;;  %v10433_v32 = vld [vmem:[#allocation13 + $0x154] ss:$8 sps:$4 sm:$0xff]  }
 0x45f   : > { %4091 = vmatpush1.bf16.msra.mxu1 %v10308_v56 }
 0x460   : > { %4785 = vmatpush1.bf16.msra.mxu0 %v10389_v27  ;;  %4092 = vmatprep.subr.bf16.mxu1 %v10316_v17  ;;  %v10430_v27 = vld [vmem:[#allocation13 + $0x144] ss:$8 sps:$4 sm:$0xff]   ;;  %v11073_v56 = vpop.eup %11072  ;;  %v4824_v17 = vrot.slane %v4822_v55, 4  ;;  %v10449_v55 = vld [vmem:[#allocation13 + $0x1b0] ss:$8 sps:$4 sm:$0xff]  }
 0x461   : > { %4786 = vmatprep.subr.bf16.mxu0 %v10394_v40 }
 0x463   : > { %4093 = vmatpush1.bf16.msra.mxu1 %v10314_v21  ;;  %v4838_v21 = vrot.slane %v4836_v31, 4  ;;  %v10452_v31 = vld [vmem:[#allocation13 + $0x1c0] ss:$8 sps:$4 sm:$0xff]  }
 0x464   : > { %4787 = vmatpush1.bf16.msra.mxu0 %v10392_v18  ;;  %4094 = vmatprep.subr.bf16.mxu1 %v10322_v44  ;;  %v11075_v40 = vpop.eup %11074  ;;  %v4827_v18 = vrot.slane %v4825_v12, 5  ;;  %v8905_v44 = vadd.f32 -1.0, %v11073_v56  ;;  %v10454_v12 = vld [vmem:[#allocation13 + $0x1c4] ss:$8 sps:$4 sm:$0xff]   ;;  %v10458_v56 = vld [vmem:[#allocation13 + $0x1e0] ss:$8 sps:$4 sm:$0xff]  }
 0x465   : > { %4788 = vmatprep.subr.bf16.mxu0 %v10397_v61  ;;  %v10428_v61 = vld [vmem:[#allocation13 + $0x140] ss:$8 sps:$4 sm:$0xff]  }
 0x467   : > { %4095 = vmatpush1.bf16.msra.mxu1 %v10320_v5  ;;  %v4841_v5 = vrot.slane %v4839_v22, 5  ;;  %v10455_v22 = vld [vmem:[#allocation13 + $0x1d0] ss:$8 sps:$4 sm:$0xff]  }
 0x468   : > { %4789 = vmatpush1.bf16.msra.mxu0 %v10395_v62  ;;  %4096 = vmatprep.subr.bf16.mxu1 %v10328_v15  ;;  %v11077_v62 = vpop.eup %11076 }
 0x469   : > { %4790 = vmatprep.subr.bf16.mxu0 %v10400_v14  ;;  %v11079_v16 = vpop.eup %11078  ;;  %v8906_v14 = vadd.f32 -1.0, %v11075_v40  ;;  %v8909_v15 = vadd.f32 -1.0, %v11077_v62  ;;  %v10463_v40 = vld [vmem:[#allocation13 + $0x1f4] ss:$8 sps:$4 sm:$0xff]   ;;  %v4266_v62 = vsub.f32 0.0, %v12506_v4 }
 0x46b   : > { %4097 = vmatpush1.bf16.msra.mxu1 %v10326_v8  ;;  %v8910_v8 = vadd.f32 -1.0, %v11079_v16  ;;  %vm4274_vm8 = vcmp.gt.f32.partialorder %v4266_v62, 0.0 }
 0x46c   : > { %4791 = vmatpush1.bf16.msra.mxu0 %v10398_v48  ;;  %4098 = vmatprep.subr.bf16.mxu1 %v10334_v28  ;;  %v4249_v48 = vsel %vm4209_vm1, %v12500_v3, %v8905_v44  ;;  %v4250_v28 = vsel %vm4210_vm2, %v12502_v50, %v8906_v14  ;;  %v4265_v44 = vsub.f32 0.0, %v12504_v60 }
 0x46d   : > { %4792 = vmatprep.subr.bf16.mxu0 %v10403_v9  ;;  %v10431_v9 = vld [vmem:[#allocation13 + $0x150] ss:$8 sps:$4 sm:$0xff]  }
 0x46e   : > { %vm4273_vm7 = vcmp.gt.f32.partialorder %v4265_v44, 0.0 }
 0x46f   : > { %4099 = vmatpush1.bf16.msra.mxu1 %v10332_v2  ;;  %v10436_v2 = vld [vmem:[#allocation13 + $0x164] ss:$8 sps:$4 sm:$0xff]  }
 0x470   : > { %4793 = vmatpush1.bf16.msra.mxu0 %v10401_v19  ;;  %4100 = vmatprep.subr.bf16.mxu1 %v10340_v36  ;;  %v4253_v19 = vsel %vm4213_vm3, %v12504_v60, %v8909_v15  ;;  %v9470_v36 = vpack.c.bf16 %v4250_v28, %v4249_v48  ;;  %v4281_v15 = vmin.f32 %v4265_v44, 0.0  ;;  %v4282_v48 = vmin.f32 %v4266_v62, 0.0  ;;  %v10470_v60 = vld [vmem:[#allocation14 + $0x120] ss:$8 sps:$4 sm:$0xff]  }
 0x471   : > { %4794 = vmatprep.subr.bf16.mxu0 %v10406_v35  ;;  %v4254_v35 = vsel %vm4214_vm4, %v12506_v4, %v8910_v8  ;;  %v10475_v4 = vld [vmem:[#allocation14 + $0x134] ss:$8 sps:$4 sm:$0xff]  }
 0x472   : > { %v4295_v28 = vmul.f32 1.442695, %v4281_v15 }
 0x473   : > { %4101 = vmatpush1.bf16.msra.mxu1 %v10338_v43 }
 0x474   : > { %4795 = vmatpush1.bf16.msra.mxu0 %v10404_v49  ;;  %4102 = vmatprep.subr.bf16.mxu1 %v10346_v63  ;;  %v4828_v49 = vor.u32 %v4827_v18, %v4824_v17  ;;  %v4842_v63 = vor.u32 %v4841_v5, %v4838_v21  ;;  %v10461_v17 = vld [vmem:[#allocation13 + $0x1f0] ss:$8 sps:$4 sm:$0xff]   ;;  %v10466_v18 = vld [vmem:[#allocation14 + $0x104] ss:$8 sps:$4 sm:$0xff]   ;;  %v4261_v21 = vsub.f32 0.0, %v12500_v3 }
 0x475   : > { %4796 = vmatprep.subr.bf16.mxu0 %v10409_v24  ;;  %v9472_v24 = vpack.c.bf16 %v4254_v35, %v4253_v19  ;;  %v10464_v5 = vld [vmem:[#allocation14 + $0x100] ss:$8 sps:$4 sm:$0xff]   ;;  %v10467_v3 = vld [vmem:[#allocation14 + $0x110] ss:$8 sps:$4 sm:$0xff]   ;;  %v4297_v19 = vmul.f32 1.442695, %v4282_v48 }
 0x476   : > { %v4277_v16 = vmin.f32 %v4261_v21, 0.0  ;;  %v4861_v35 = vshll.u32 %v12553_v0, 16  ;;  %vm4269_vm5 = vcmp.gt.f32.partialorder %v4261_v21, 0.0 }
 0x477   : > { %4103 = vmatpush1.bf16.msra.mxu1 %v10344_v29  ;;  %v4829_v29 = vrot.slane %v4828_v49, 4  ;;  %v10473_v49 = vld [vmem:[#allocation14 + $0x130] ss:$8 sps:$4 sm:$0xff]  }
 0x478   : > { %4797 = vmatpush1.bf16.msra.mxu0 %v10407_v6  ;;  %4104 = vmatprep.subr.bf16.mxu1 %v10352_v20  ;;  %v4287_v8 = vmul.f32 1.442695, %v4277_v16 }
 0x479   : > { %4798 = vmatprep.subr.bf16.mxu0 %v10412_v59  ;;  %v4831_v59 = vshll.u32 %v9470_v36, 16  ;;  %v4872_v36 = vshrl.u32 %v12560_v7, 16 }
 0x47a   : > { %11080 = vpow2.f32 %v4287_v8  ;;  %v10488_v8 = vld [vmem:[#allocation14 + $0x180] ss:$8 sps:$4 sm:$0xff]  }
 0x47b   : > { %4105 = vmatpush1.bf16.msra.mxu1 %v10350_v46  ;;  %v4843_v46 = vrot.slane %v4842_v63, 4  ;;  %v10478_v63 = vld [vmem:[#allocation14 + $0x144] ss:$8 sps:$4 sm:$0xff]  }
 0x47c   : > { %4799 = vmatpush1.bf16.msra.mxu0 %v10410_v45  ;;  %v10434_v45 = vld [vmem:[#allocation13 + $0x160] ss:$8 sps:$4 sm:$0xff]  }
 0x47d   : > { %4800 = vmatprep.subr.bf16.mxu0 %v10415_v58  ;;  %v4845_v58 = vshll.u32 %v9472_v24, 16  ;;  %v4875_v24 = vshll.u32 %v12560_v7, 16 }
 0x47e   : > { %4107 = vmatmul.mubr.bf16.vlgmr.msra.gmra.mrb[0].mxu1 %v12485_v57  ;;  %v10419_v57 = vld [vmem:[#allocation13 + $0x110] ss:$8 sps:$4 sm:$0xff]  }
 0x480   : > { %4801 = vmatpush1.bf16.msra.mxu0 %v10413_v47 }
 0x481   : > { %5086 = vmatprep.subr.bf16.mxu0 %v10418_v10  ;;  %v10439_v10 = vld [vmem:[#allocation13 + $0x174] ss:$8 sps:$4 sm:$0xff]  }
 0x483   : > { %4803 = vmatmul.mubr.bf16.vlgmr.msra.gmra.mrb[12].mxu0 %v9467_v37  ;;  %v10425_v37 = vld [vmem:[#allocation13 + $0x130] ss:$8 sps:$4 sm:$0xff]  }
 0x484   : > { %5087 = vmatpush1.bf16.msra.mxu0 %v10416_v51  ;;  %v4833_v51 = vrot.slane %v4831_v59, 5 }
 0x485   : > { %5088 = vmatprep.subr.bf16.mxu0 %v10421_v11  ;;  %v4847_v11 = vrot.slane %v4845_v58, 5  ;;  %v4874_v58 = vrot.slane %v4872_v36, 4  ;;  %v10503_v36 = vld [vmem:[#allocation14 + $0x1d0] ss:$8 sps:$4 sm:$0xff]  }
 0x486   : > { %v4834_v33 = vsel %vm12267_vm15, %v4829_v29, %v4833_v51  ;;  %v11081_v29 = vpop.eup %11080 }
 0x487   : > { %v4848_v42 = vsel %vm12267_vm15, %v4843_v46, %v4847_v11  ;;  %v4863_v46 = vrot.slane %v4861_v35, 5  ;;  %v8913_v51 = vadd.f32 -1.0, %v11081_v29  ;;  %v10505_v35 = vld [vmem:[#allocation14 + $0x1d4] ss:$8 sps:$4 sm:$0xff]   ;;  %v10509_v29 = vld [vmem:[#allocation14 + $0x1f0] ss:$8 sps:$4 sm:$0xff]  }
 0x488   : > { %5089 = vmatpush1.bf16.msra.mxu0 %v10419_v57  ;;  %v8995_v39 = vcombine.low %v4834_v33, %v4848_v42  ;;  %v8996_v52 = vcombine.high %v4834_v33, %v4848_v42  ;;  %v10445_v57 = vld [vmem:[#allocation13 + $0x194] ss:$8 sps:$4 sm:$0xff]   ;;  %v4877_v33 = vrot.slane %v4875_v24, 5  ;;  %v10506_v24 = vld [vmem:[#allocation14 + $0x1e0] ss:$8 sps:$4 sm:$0xff]  }
 0x489   : > { %5090 = vmatprep.subr.bf16.mxu0 %v10424_v26  ;;  %v10448_v26 = vld [vmem:[#allocation13 + $0x1a4] ss:$8 sps:$4 sm:$0xff]  }
 0x48a   : > { %5118 = vmatprep.mubr.bf16.mxu0 %v8996_v52  ;;  %v10479_v52 = vld [vmem:[#allocation14 + $0x150] ss:$8 sps:$4 sm:$0xff]  }
 0x48c   : > { %5091 = vmatpush1.bf16.msra.mxu0 %v10422_v53  ;;  %v10446_v53 = vld [vmem:[#allocation13 + $0x1a0] ss:$8 sps:$4 sm:$0xff]  }
 0x48d   : > { %5092 = vmatprep.subr.bf16.mxu0 %v10427_v23  ;;  %v10451_v23 = vld [vmem:[#allocation13 + $0x1b4] ss:$8 sps:$4 sm:$0xff]  }
 0x490   : > { %5093 = vmatpush1.bf16.msra.mxu0 %v10425_v37  ;;  %v10457_v37 = vld [vmem:[#allocation13 + $0x1d4] ss:$8 sps:$4 sm:$0xff]  }
 0x491   : > { %5094 = vmatprep.subr.bf16.mxu0 %v10430_v27  ;;  %v10460_v27 = vld [vmem:[#allocation13 + $0x1e4] ss:$8 sps:$4 sm:$0xff]  }
 0x494   : > { %5095 = vmatpush1.bf16.msra.mxu0 %v10428_v61  ;;  %v4262_v61 = vsub.f32 0.0, %v12502_v50  ;;  %v10472_v50 = vld [vmem:[#allocation14 + $0x124] ss:$8 sps:$4 sm:$0xff]  }
 0x495   : > { %5096 = vmatprep.subr.bf16.mxu0 %v10433_v32  ;;  %v10469_v32 = vld [vmem:[#allocation14 + $0x114] ss:$8 sps:$4 sm:$0xff]  }
 0x496   : > { %v12614_v43 = vpop.f32.mrb[8].mxu0  ;;  %v4278_v14 = vmin.f32 %v4262_v61, 0.0  ;;  %vm4270_vm6 = vcmp.gt.f32.partialorder %v4262_v61, 0.0 }
 0x497   : > { %v12616_v6 = vpop.f32.mrb[9].mxu0 }
 0x498   : > { %v12618_v20 = vpop.f32.mrb[10].mxu0  ;;  %5097 = vmatpush1.bf16.msra.mxu0 %v10431_v9  ;;  %v4289_v9 = vmul.f32 1.442695, %v4278_v14  ;;  %v10490_v14 = vld [vmem:[#allocation14 + $0x184] ss:$8 sps:$4 sm:$0xff]  }
 0x499   : > { %v12620_v47 = vpop.f32.mrb[11].mxu0  ;;  %5098 = vmatprep.subr.bf16.mxu0 %v10436_v2  ;;  %v4858_v2 = vshrl.u32 %v12553_v0, 16  ;;  %v10481_v0 = vld [vmem:[#allocation14 + $0x154] ss:$8 sps:$4 sm:$0xff]  }
 0x49a   : > { %11082 = vpow2.f32 %v4289_v9  ;;  %v10493_v9 = vld [vmem:[#allocation14 + $0x194] ss:$8 sps:$4 sm:$0xff]  }
 0x49b   : > { %11084 = vpow2.f32 %v4295_v28  ;;  %v10491_v28 = vld [vmem:[#allocation14 + $0x190] ss:$8 sps:$4 sm:$0xff]  }
 0x49c   : > { %5099 = vmatpush1.bf16.msra.mxu0 %v10434_v45  ;;  %11086 = vpow2.f32 %v4297_v19  ;;  %v4860_v45 = vrot.slane %v4858_v2, 4  ;;  %v10494_v19 = vld [vmem:[#allocation14 + $0x1a0] ss:$8 sps:$4 sm:$0xff]  }
 0x49d   : > { %5100 = vmatprep.subr.bf16.mxu0 %v10439_v10  ;;  %v10476_v10 = vld [vmem:[#allocation14 + $0x140] ss:$8 sps:$4 sm:$0xff]  }
 0x49e   : > { %v10500_v2 = vld [vmem:[#allocation14 + $0x1c0] ss:$8 sps:$4 sm:$0xff]  }
 0x4a0   : > { %5101 = vmatpush1.bf16.msra.mxu0 %v10437_v1 }
 0x4a1   : > { %5102 = vmatprep.subr.bf16.mxu0 %v10442_v38  ;;  %v4309_v38 = vsel %vm4269_vm5, %v4261_v21, %v8913_v51  ;;  %v10518_v51 = vld [vmem:[#allocation20 + $0x20] ss:$8 sps:$4 sm:$0xff]  }
 0x4a4   : > { %5103 = vmatpush1.bf16.msra.mxu0 %v10440_v13  ;;  %v11083_v59 = vpop.eup %11082 }
 0x4a5   : > { %5104 = vmatprep.subr.bf16.mxu0 %v10445_v57  ;;  %v11085_v11 = vpop.eup %11084  ;;  %v8914_v7 = vadd.f32 -1.0, %v11083_v59  ;;  %v10514_v59 = vld [vmem:[#allocation20 + $0x4] ss:$8 sps:$4 sm:$0xff]  }
 0x4a6   : > { %v11087_v1 = vpop.eup %11086  ;;  %v8917_v42 = vadd.f32 -1.0, %v11085_v11  ;;  %v10523_v11 = vld [vmem:[#allocation20 + $0x34] ss:$8 sps:$4 sm:$0xff]  }
 0x4a7   : > { %v4310_v13 = vsel %vm4270_vm6, %v4262_v61, %v8914_v7  ;;  %v10487_v61 = vld [vmem:[#allocation14 + $0x174] ss:$8 sps:$4 sm:$0xff]  }
 0x4a8   : > { %5105 = vmatpush1.bf16.msra.mxu0 %v10443_v25  ;;  %v4313_v57 = vsel %vm4273_vm7, %v4265_v44, %v8917_v42  ;;  %v10484_v25 = vld [vmem:[#allocation14 + $0x164] ss:$8 sps:$4 sm:$0xff]   ;;  %v10529_v7 = vld [vmem:[#allocation20 + $0x54] ss:$8 sps:$4 sm:$0xff]  }
 0x4a9   : > { %5106 = vmatprep.subr.bf16.mxu0 %v10448_v26 }
 0x4ac   : > { %5107 = vmatpush1.bf16.msra.mxu0 %v10446_v53  ;;  %v9474_v53 = vpack.c.bf16 %v4310_v13, %v4309_v38 }
 0x4ad   : > { %5108 = vmatprep.subr.bf16.mxu0 %v10451_v23  ;;  %v4864_v23 = vor.u32 %v4863_v46, %v4860_v45  ;;  %v10512_v45 = vld [vmem:[#allocation20] ss:$8 sps:$4 sm:$0xff]   ;;  %v10517_v46 = vld [vmem:[#allocation20 + $0x14] ss:$8 sps:$4 sm:$0xff]  }
 0x4b0   : > { %5109 = vmatpush1.bf16.msra.mxu0 %v10449_v55  ;;  %v4878_v55 = vor.u32 %v4877_v33, %v4874_v58  ;;  %v10515_v58 = vld [vmem:[#allocation20 + $0x10] ss:$8 sps:$4 sm:$0xff]  }
 0x4b1   : > { %5110 = vmatprep.subr.bf16.mxu0 %v10454_v12  ;;  %v10521_v33 = vld [vmem:[#allocation20 + $0x30] ss:$8 sps:$4 sm:$0xff]  }
 0x4b4   : > { %5111 = vmatpush1.bf16.msra.mxu0 %v10452_v31 }
 0x4b5   : > { %5112 = vmatprep.subr.bf16.mxu0 %v10457_v37 }
 0x4b8   : > { %5113 = vmatpush1.bf16.msra.mxu0 %v10455_v22  ;;  %v4865_v22 = vrot.slane %v4864_v23, 4 }
 0x4b9   : > { %5114 = vmatprep.subr.bf16.mxu0 %v10460_v27  ;;  %v4867_v27 = vshll.u32 %v9474_v53, 16 }
 0x4bb   : > { %v4869_v44 = vrot.slane %v4867_v27, 5  ;;  %v10541_v27 = vld [vmem:[#allocation20 + $0x94] ss:$8 sps:$4 sm:$0xff]  }
 0x4bc   : > { %5115 = vmatpush1.bf16.msra.mxu0 %v10458_v56 }
 0x4bd   : > { %5116 = vmatprep.subr.bf16.mxu0 %v10463_v40  ;;  %v10482_v40 = vld [vmem:[#allocation14 + $0x160] ss:$8 sps:$4 sm:$0xff]  }
 0x4c0   : > { %5117 = vmatpush1.bf16.msra.mxu0 %v10461_v17  ;;  %v4879_v17 = vrot.slane %v4878_v55, 4  ;;  %v10530_v55 = vld [vmem:[#allocation20 + $0x60] ss:$8 sps:$4 sm:$0xff]  }
 0x4c1   : > { %5334 = vmatprep.subr.bf16.mxu0 %v10466_v18 }
 0x4c3   : > { %5119 = vmatmul.mubr.bf16.vlgmr.msra.gmra.mrb[12].mxu0 %v8995_v39  ;;  %v8918_v39 = vadd.f32 -1.0, %v11087_v1  ;;  %v10524_v1 = vld [vmem:[#allocation20 + $0x40] ss:$8 sps:$4 sm:$0xff]  }
 0x4c4   : > { %5335 = vmatpush1.bf16.msra.mxu0 %v10464_v5  ;;  %v4870_v5 = vsel %vm12267_vm15, %v4865_v22, %v4869_v44  ;;  %v10538_v22 = vld [vmem:[#allocation20 + $0x84] ss:$8 sps:$4 sm:$0xff]   ;;  %v10548_v44 = vld [vmem:[#allocation20 + $0xc0] ss:$8 sps:$4 sm:$0xff]  }
 0x4c5   : > { %5336 = vmatprep.subr.bf16.mxu0 %v10469_v32  ;;  %v4314_v26 = vsel %vm4274_vm8, %v4266_v62, %v8918_v39  ;;  %v10485_v32 = vld [vmem:[#allocation14 + $0x170] ss:$8 sps:$4 sm:$0xff]  }
 0x4c6   : > { %v9476_v31 = vpack.c.bf16 %v4314_v26, %v4313_v57 }
 0x4c8   : > { %5337 = vmatpush1.bf16.msra.mxu0 %v10467_v3  ;;  %v4881_v18 = vshll.u32 %v9476_v31, 16  ;;  %v10496_v3 = vld [vmem:[#allocation14 + $0x1a4] ss:$8 sps:$4 sm:$0xff]   ;;  %v10533_v31 = vld [vmem:[#allocation20 + $0x70] ss:$8 sps:$4 sm:$0xff]  }
 0x4c9   : > { %5338 = vmatprep.subr.bf16.mxu0 %v10472_v50  ;;  %v10499_v50 = vld [vmem:[#allocation14 + $0x1b4] ss:$8 sps:$4 sm:$0xff]  }
 0x4ca   : > { %v4883_v62 = vrot.slane %v4881_v18, 5  ;;  %v10547_v18 = vld [vmem:[#allocation20 + $0xb4] ss:$8 sps:$4 sm:$0xff]  }
 0x4cc   : > { %5339 = vmatpush1.bf16.msra.mxu0 %v10470_v60  ;;  %v4884_v16 = vsel %vm12267_vm15, %v4879_v17, %v4883_v62  ;;  %v10497_v60 = vld [vmem:[#allocation14 + $0x1b0] ss:$8 sps:$4 sm:$0xff]   ;;  %v10542_v17 = vld [vmem:[#allocation20 + $0xa0] ss:$8 sps:$4 sm:$0xff]   ;;  %v10553_v62 = vld [vmem:[#allocation20 + $0xd4] ss:$8 sps:$4 sm:$0xff]  }
 0x4cd   : > { %5340 = vmatprep.subr.bf16.mxu0 %v10475_v4  ;;  %v9029_v15 = vcombine.low %v4870_v5, %v4884_v16  ;;  %v9030_v48 = vcombine.high %v4870_v5, %v4884_v16  ;;  %v10502_v4 = vld [vmem:[#allocation14 + $0x1c4] ss:$8 sps:$4 sm:$0xff]   ;;  %v10551_v5 = vld [vmem:[#allocation20 + $0xd0] ss:$8 sps:$4 sm:$0xff]   ;;  %v10554_v16 = vld [vmem:[#allocation20 + $0xe0] ss:$8 sps:$4 sm:$0xff]  }
 0x4cf   : > { %5366 = vmatprep.mubr.bf16.mxu0 %v9030_v48  ;;  %v10562_v48 = vld [vmem:[#allocation19 + $0x4] ss:$8 sps:$4 sm:$0xff]  }
 0x4d0   : > { %5341 = vmatpush1.bf16.msra.mxu0 %v10473_v49  ;;  %v10508_v49 = vld [vmem:[#allocation14 + $0x1e4] ss:$8 sps:$4 sm:$0xff]  }
 0x4d1   : > { %5342 = vmatprep.subr.bf16.mxu0 %v10478_v63  ;;  %v10511_v63 = vld [vmem:[#allocation14 + $0x1f4] ss:$8 sps:$4 sm:$0xff]  }
 0x4d4   : > { %5343 = vmatpush1.bf16.msra.mxu0 %v10476_v10  ;;  %v10520_v10 = vld [vmem:[#allocation20 + $0x24] ss:$8 sps:$4 sm:$0xff]  }
 0x4d5   : > { %5344 = vmatprep.subr.bf16.mxu0 %v10481_v0  ;;  %v10526_v0 = vld [vmem:[#allocation20 + $0x44] ss:$8 sps:$4 sm:$0xff]  }
 0x4d6   : > { %v12634_v12 = vpop.f32.mrb[4].mxu0 }
 0x4d7   : > { %v12636_v37 = vpop.f32.mrb[5].mxu0 }
 0x4d8   : > { %v12638_v56 = vpop.f32.mrb[6].mxu0  ;;  %5345 = vmatpush1.bf16.msra.mxu0 %v10479_v52  ;;  %v10527_v52 = vld [vmem:[#allocation20 + $0x50] ss:$8 sps:$4 sm:$0xff]  }
 0x4d9   : > { %v12640_v21 = vpop.f32.mrb[7].mxu0  ;;  %5346 = vmatprep.subr.bf16.mxu0 %v10484_v25  ;;  %v10532_v25 = vld [vmem:[#allocation20 + $0x64] ss:$8 sps:$4 sm:$0xff]  }
 0x4dc   : > { %5347 = vmatpush1.bf16.msra.mxu0 %v10482_v40  ;;  %v10539_v40 = vld [vmem:[#allocation20 + $0x90] ss:$8 sps:$4 sm:$0xff]  }
 0x4dd   : > { %5348 = vmatprep.subr.bf16.mxu0 %v10487_v61  ;;  %v10550_v61 = vld [vmem:[#allocation20 + $0xc4] ss:$8 sps:$4 sm:$0xff]  }
 0x4e0   : > { %5349 = vmatpush1.bf16.msra.mxu0 %v10485_v32  ;;  %v10556_v32 = vld [vmem:[#allocation20 + $0xe4] ss:$8 sps:$4 sm:$0xff]  }
 0x4e1   : > { %5350 = vmatprep.subr.bf16.mxu0 %v10490_v14  ;;  %v10559_v14 = vld [vmem:[#allocation20 + $0xf4] ss:$8 sps:$4 sm:$0xff]  }
 0x4e4   : > { %5351 = vmatpush1.bf16.msra.mxu0 %v10488_v8  ;;  %v4137_v8 = vsub.s32 2, %v12318_v34 }
 0x4e5   : > { %5352 = vmatprep.subr.bf16.mxu0 %v10493_v9  ;;  %v4141_v9 = vsub.s32 3, %v12318_v34 }
 0x4e8   : > { %5353 = vmatpush1.bf16.msra.mxu0 %v10491_v28  ;;  %v12663_v28 = vld [vmem:[%s13080_s8] sm:$0xf]  ;;  %s11520_s8 = sshll.u32 %s11660_s22, 4  ;;  %s11521_s8 = int_to_ptr.vmem [resolvable:$false] %s11520_s8 }
 0x4e9   : > { %5354 = vmatprep.subr.bf16.mxu0 %v10496_v3  ;;  %v4138_v3 = vrot.slane %v12663_v28, %v4137_v8  ;;  %s11522_s1 = scalar_lea.vmem %s11521_s8, 1024  ;;  %p11523_p10 = scmp.lt.s32.totalorder %s12895_s23, %s11521_s8 }
 0x4ea   : > { %p11524_p1 = scmp.lt.s32.totalorder %s11522_s1, %s11516_s13 }
 0x4ec   : > { %5355 = vmatpush1.bf16.msra.mxu0 %v10494_v19  ;;  %p11525_p11 = por %p11524_p1, %p11523_p10 }
 0x4ed   : > { %5356 = vmatprep.subr.bf16.mxu0 %v10499_v50  ;;  %v4142_v50 = vrot.slane %v12663_v28, %v4141_v9 }
 0x4ee   : > { %p11526_p12 = pnand %p11525_p11, %p11519_p3 }
 0x4f0   : > { %5357 = vmatpush1.bf16.msra.mxu0 %v10497_v60 }
 0x4f1   : > { %5358 = vmatprep.subr.bf16.mxu0 %v10502_v4 }
 0x4f4   : > { %5359 = vmatpush1.bf16.msra.mxu0 %v10500_v2  ;;  %v10608_v2 = vld [vmem:[#allocation17] ss:$16 sps:$4 sm:$0xff]  }
 0x4f5   : > { %5360 = vmatprep.subr.bf16.mxu0 %v10505_v35  ;;  %v10610_v35 = vld [vmem:[#allocation17 + $0x4] ss:$16 sps:$4 sm:$0xff]  }
 0x4f6   : > { %6551 = vmatprep.subr.bf16.mxu1 %v10610_v35 }
 0x4f7   : > { %6552 = vmatpush1.bf16.msra.mxu1 %v10608_v2 }
 0x4f8   : > { %5361 = vmatpush1.bf16.msra.mxu0 %v10503_v36 }
 0x4f9   : > { %5362 = vmatprep.subr.bf16.mxu0 %v10508_v49 }
 0x4fc   : > { %5363 = vmatpush1.bf16.msra.mxu0 %v10506_v24  ;;  %v10613_v24 = vld [vmem:[#allocation17 + $0x24] ss:$16 sps:$4 sm:$0xff]  }
 0x4fd   : > { %5364 = vmatprep.subr.bf16.mxu0 %v10511_v63  ;;  %6553 = vmatprep.subr.bf16.mxu1 %v10613_v24 }
 0x500   : > { %5365 = vmatpush1.bf16.msra.mxu0 %v10509_v29 }
 0x501   : > { %5701 = vmatprep.subr.bf16.mxu0 %v10514_v59 }
 0x503   : > { %5367 = vmatmul.mubr.bf16.vlgmr.msra.gmra.mrb[12].mxu0 %v9029_v15  ;;  %v10557_v15 = vld [vmem:[#allocation20 + $0xf0] ss:$8 sps:$4 sm:$0xff]  }
 0x504   : > { %5702 = vmatpush1.bf16.msra.mxu0 %v10512_v45 }
 0x505   : > { %5703 = vmatprep.subr.bf16.mxu0 %v10517_v46 }
 0x508   : > { %5704 = vmatpush1.bf16.msra.mxu0 %v10515_v58  ;;  %v10611_v58 = vld [vmem:[#allocation17 + $0x20] ss:$16 sps:$4 sm:$0xff]  }
 0x509   : > { %5705 = vmatprep.subr.bf16.mxu0 %v10520_v10  ;;  %6554 = vmatpush1.bf16.msra.mxu1 %v10611_v58 }
 0x50c   : > { %5706 = vmatpush1.bf16.msra.mxu0 %v10518_v51 }
 0x50d   : > { %5707 = vmatprep.subr.bf16.mxu0 %v10523_v11 }
 0x510   : > { %5708 = vmatpush1.bf16.msra.mxu0 %v10521_v33 }
 0x511   : > { %5709 = vmatprep.subr.bf16.mxu0 %v10526_v0  ;;  %v4065_v42 = vpop.f32.mrb[4].mxu1 }
 0x512   : > { %v12647_v38 = vadd.f32 %v4065_v42, %v12634_v12  ;;  %v4067_v39 = vpop.f32.mrb[5].mxu1  ;;  %v10535_v12 = vld [vmem:[#allocation20 + $0x74] ss:$8 sps:$4 sm:$0xff]   ;;  %v10614_v42 = vld [vmem:[#allocation17 + $0x40] ss:$16 sps:$4 sm:$0xff]  }
 0x513   : > { %v12650_v13 = vadd.f32 %v4067_v39, %v12636_v37  ;;  %v4069_v57 = vpop.f32.mrb[6].mxu1  ;;  %v10536_v37 = vld [vmem:[#allocation20 + $0x80] ss:$8 sps:$4 sm:$0xff]  }
 0x514   : > { %5710 = vmatpush1.bf16.msra.mxu0 %v10524_v1  ;;  %v12653_v26 = vadd.f32 %v4069_v57, %v12638_v56  ;;  %v4071_v53 = vpop.f32.mrb[7].mxu1  ;;  %v10544_v56 = vld [vmem:[#allocation20 + $0xa4] ss:$8 sps:$4 sm:$0xff]  }
 0x515   : > { %5711 = vmatprep.subr.bf16.mxu0 %v10529_v7  ;;  %v12656_v23 = vadd.f32 %v4071_v53, %v12640_v21  ;;  %v10545_v21 = vld [vmem:[#allocation20 + $0xb0] ss:$8 sps:$4 sm:$0xff]  }
 0x518   : > { %5712 = vmatpush1.bf16.msra.mxu0 %v10527_v52  ;;  %v10619_v52 = vld [vmem:[#allocation17 + $0x64] ss:$16 sps:$4 sm:$0xff]  }
 0x519   : > { %5713 = vmatprep.subr.bf16.mxu0 %v10532_v25 }
 0x51c   : > { %5714 = vmatpush1.bf16.msra.mxu0 %v10530_v55  ;;  %v10617_v55 = vld [vmem:[#allocation17 + $0x60] ss:$16 sps:$4 sm:$0xff]  }
 0x51d   : > { %5715 = vmatprep.subr.bf16.mxu0 %v10535_v12  ;;  %v10622_v12 = vld [vmem:[#allocation17 + $0x84] ss:$16 sps:$4 sm:$0xff]  }
 0x520   : > { %5716 = vmatpush1.bf16.msra.mxu0 %v10533_v31  ;;  %v10620_v31 = vld [vmem:[#allocation17 + $0x80] ss:$16 sps:$4 sm:$0xff]  }
 0x521   : > { %5717 = vmatprep.subr.bf16.mxu0 %v10538_v22  ;;  %v10625_v22 = vld [vmem:[#allocation17 + $0xa4] ss:$16 sps:$4 sm:$0xff]  }
 0x524   : > { %5718 = vmatpush1.bf16.msra.mxu0 %v10536_v37  ;;  %v10623_v37 = vld [vmem:[#allocation17 + $0xa0] ss:$16 sps:$4 sm:$0xff]  }
 0x525   : > { %5719 = vmatprep.subr.bf16.mxu0 %v10541_v27 }
 0x528   : > { %5720 = vmatpush1.bf16.msra.mxu0 %v10539_v40  ;;  %v10628_v40 = vld [vmem:[#allocation17 + $0xc4] ss:$16 sps:$4 sm:$0xff]  }
 0x529   : > { %5721 = vmatprep.subr.bf16.mxu0 %v10544_v56 }
 0x52c   : > { %5722 = vmatpush1.bf16.msra.mxu0 %v10542_v17 }
 0x52d   : > { %5723 = vmatprep.subr.bf16.mxu0 %v10547_v18 }
 0x530   : > { %5724 = vmatpush1.bf16.msra.mxu0 %v10545_v21 }
 0x531   : > { %5725 = vmatprep.subr.bf16.mxu0 %v10550_v61 }
 0x534   : > { %5726 = vmatpush1.bf16.msra.mxu0 %v10548_v44 }
 0x535   : > { %5727 = vmatprep.subr.bf16.mxu0 %v10553_v62  ;;  %v10626_v62 = vld [vmem:[#allocation17 + $0xc0] ss:$16 sps:$4 sm:$0xff]  }
 0x538   : > { %5728 = vmatpush1.bf16.msra.mxu0 %v10551_v5 }
 0x539   : > { %5729 = vmatprep.subr.bf16.mxu0 %v10556_v32  ;;  %v10631_v32 = vld [vmem:[#allocation17 + $0xe4] ss:$16 sps:$4 sm:$0xff]  }
 0x53c   : > { %5730 = vmatpush1.bf16.msra.mxu0 %v10554_v16  ;;  %v10629_v16 = vld [vmem:[#allocation17 + $0xe0] ss:$16 sps:$4 sm:$0xff]  }
 0x53d   : > { %5731 = vmatprep.subr.bf16.mxu0 %v10559_v14  ;;  %v4130_v14 = vrot.slane %v12663_v28, %v12321_v41 }
 0x53f   : > { %v4151_v2 = vadd.f32 %v12653_v26, %v4130_v14 }
 0x540   : > { %5732 = vmatpush1.bf16.msra.mxu0 %v10557_v15  ;;  %v10634_v15 = vld [vmem:[#allocation17 + $0x104] ss:$16 sps:$4 sm:$0xff]  }
 0x541   : > { %5908 = vmatprep.subr.bf16.mxu0 %v10562_v48  ;;  %v4134_v48 = vrot.slane %v12663_v28, %v12327_v54 }
 0x551   : > { %v4108_v19 = vpop.f32.mrb[0].mxu1 }
 0x552   : > { %v9501_v60 = vadd.f32 %v4108_v19, %v12614_v43  ;;  %v4110_v4 = vpop.f32.mrb[1].mxu1  ;;  %v10616_v43 = vld [vmem:[#allocation17 + $0x44] ss:$16 sps:$4 sm:$0xff]   ;;  %v4147_v19 = vadd.f32 %v12647_v38, %v4130_v14 }
 0x553   : > { %v9502_v36 = vadd.f32 %v4110_v4, %v12616_v6  ;;  %v4112_v49 = vpop.f32.mrb[2].mxu1  ;;  %6555 = vmatprep.subr.bf16.mxu1 %v10616_v43 }
 0x554   : > { %v4149_v63 = vadd.f32 %v9501_v60, %v4138_v3  ;;  %v9503_v29 = vadd.f32 %v4112_v49, %v12618_v20  ;;  %v4114_v59 = vpop.f32.mrb[3].mxu1  ;;  %6556 = vmatpush1.bf16.msra.mxu1 %v10614_v42  ;;  %v4148_v60 = vadd.f32 %v12650_v13, %v4134_v48  ;;  %v4152_v49 = vadd.f32 %v12656_v23, %v4134_v48  ;;  %v11171_v23 = vld [vmem:[%s12157_s9 + $0x18] sm:$0xff] }
 0x555   : > { %v4150_v45 = vadd.f32 %v9502_v36, %v4142_v50  ;;  %v9504_v46 = vadd.f32 %v4114_v59, %v12620_v47  ;;  %6557 = vmatprep.subr.bf16.mxu1 %v10619_v52  ;;  %v11169_v59 = vld [vmem:[%s12157_s9 + $0x8] sm:$0xff] }
 0x556   : > { %v4155_v10 = vmax.f32 %v4149_v63, -30.0  ;;  %v4153_v51 = vadd.f32 %v9503_v29, %v4138_v3  ;;  %v10632_v3 = vld [vmem:[#allocation17 + $0x100] ss:$16 sps:$4 sm:$0xff]  }
 0x557   : > { %v4156_v11 = vmax.f32 %v4150_v45, -30.0  ;;  %v4154_v33 = vadd.f32 %v9504_v46, %v4142_v50  ;;  %v11168_v63 = vld [vmem:[%s12157_s9] sm:$0xff]  ;;  %v11170_v46 = vld [vmem:[%s12157_s9 + $0x10] sm:$0xff] }
 0x558   : > { %v4159_v0 = vsub.f32 0.0, %v4155_v10  ;;  %v4157_v6 = vmax.f32 %v4153_v51, -30.0  ;;  %6558 = vmatpush1.bf16.msra.mxu1 %v10617_v55 }
 0x559   : > { %v4160_v1 = vsub.f32 0.0, %v4156_v11  ;;  %v4158_v7 = vmax.f32 %v4154_v33, -30.0  ;;  %6559 = vmatprep.subr.bf16.mxu1 %v10622_v12 }
 0x55a   : > { %v4163_v20 = vmul.f32 1.442695, %v4159_v0  ;;  %v4161_v39 = vsub.f32 0.0, %v4157_v6 }
 0x55b   : > { %v4165_v57 = vmul.f32 1.442695, %v4160_v1  ;;  %v4162_v47 = vsub.f32 0.0, %v4158_v7 }
 0x55c   : > { %11088 = vpow2.f32 %v4163_v20  ;;  %v4167_v25 = vmul.f32 1.442695, %v4161_v39  ;;  %6560 = vmatpush1.bf16.msra.mxu1 %v10620_v31 }
 0x55d   : > { %11090 = vpow2.f32 %v4165_v57  ;;  %v4169_v53 = vmul.f32 1.442695, %v4162_v47  ;;  %6561 = vmatprep.subr.bf16.mxu1 %v10625_v22 }
 0x55e   : > { %11092 = vpow2.f32 %v4167_v25 }
 0x55f   : > { %11094 = vpow2.f32 %v4169_v53 }
 0x560   : > { %6562 = vmatpush1.bf16.msra.mxu1 %v10623_v37 }
 0x561   : > { %6563 = vmatprep.subr.bf16.mxu1 %v10628_v40 }
 0x564   : > { %6564 = vmatpush1.bf16.msra.mxu1 %v10626_v62 }
 0x565   : > { %6565 = vmatprep.subr.bf16.mxu1 %v10631_v32 }
 0x566   : > { %v11089_v27 = vpop.eup %11088 }
 0x567   : > { %v11091_v56 = vpop.eup %11090  ;;  %v4171_v17 = vadd.f32 1.0, %v11089_v27 }
 0x568   : > { %v11093_v18 = vpop.eup %11092  ;;  %v4172_v21 = vadd.f32 1.0, %v11091_v56  ;;  %6566 = vmatpush1.bf16.msra.mxu1 %v10629_v16 }
 0x569   : > { %v11095_v61 = vpop.eup %11094  ;;  %11096 = vrcp.f32 %v4171_v17  ;;  %v4173_v44 = vadd.f32 1.0, %v11093_v18  ;;  %6567 = vmatprep.subr.bf16.mxu1 %v10634_v15 }
 0x56a   : > { %11098 = vrcp.f32 %v4172_v21  ;;  %v4174_v5 = vadd.f32 1.0, %v11095_v61 }
 0x56b   : > { %11100 = vrcp.f32 %v4173_v44 }
 0x56c   : > { %11102 = vrcp.f32 %v4174_v5  ;;  %6568 = vmatpush1.bf16.msra.mxu1 %v10632_v3 }
 0x573   : > { %v11097_v50 = vpop.eup %11096 }
 0x574   : > { %v11099_v4 = vpop.eup %11098  ;;  %v4179_v35 = vmul.f32 %v11097_v50, %v4147_v19 }
 0x575   : > { %v11101_v36 = vpop.eup %11100  ;;  %v4180_v28 = vmul.f32 %v11099_v4, %v4148_v60  ;;  %v10560_v60 = vld [vmem:[#allocation19] ss:$8 sps:$4 sm:$0xff]  }
 0x576   : > { %v11103_v24 = vpop.eup %11102  ;;  %v12684_v29 = vadd.f32 %v11168_v63, %v4179_v35  ;;  %v4181_v38 = vmul.f32 %v11101_v36, %v4151_v2  ;;  %v10565_v36 = vld [vmem:[#allocation19 + $0x14] ss:$8 sps:$4 sm:$0xff]  }
 0x577   : > { %v12687_v45 = vadd.f32 %v11169_v59, %v4180_v28  ;;  %v4182_v13 = vmul.f32 %v11103_v24, %v4152_v49 }
 0x578   : > { %v12690_v58 = vadd.f32 %v11170_v46, %v4181_v38  ;;  %v5433_v26 = vsub.f32 0.0, %v12684_v29  ;;  %4187 = vst [vmem:[%s12694_s7] sm:$0xff] %v12684_v29  ;;  %v5401_v20 = vmin.f32 %v12684_v29, 0.0  ;;  %vm5397_vm1 = vcmp.gt.f32.partialorder %v12684_v29, 0.0  ;;  %v10563_v38 = vld [vmem:[#allocation19 + $0x10] ss:$8 sps:$4 sm:$0xff]  }
 0x579   : > { %v4186_v10 = vadd.f32 %v11171_v23, %v4182_v13  ;;  %v5434_v51 = vsub.f32 0.0, %v12687_v45  ;;  %4188 = vst [vmem:[%s12694_s7 + $0x8] sm:$0xff] %v12687_v45  ;;  %v5402_v33 = vmin.f32 %v12687_v45, 0.0  ;;  %vm5398_vm13 = vcmp.gt.f32.partialorder %v12687_v45, 0.0  ;;  %v10566_v13 = vld [vmem:[#allocation19 + $0x20] ss:$8 sps:$4 sm:$0xff]  }
 0x57a   : > { %v5435_v43 = vsub.f32 0.0, %v12690_v58  ;;  %v5441_v11 = vmin.f32 %v5433_v26, 0.0  ;;  %4189 = vst [vmem:[%s12694_s7 + $0x10] sm:$0xff] %v12690_v58  ;;  %v5403_v25 = vmin.f32 %v12690_v58, 0.0  ;;  %v5405_v12 = vmul.f32 1.442695, %v5401_v20 }
 0x57b   : > { %v5436_v0 = vsub.f32 0.0, %v4186_v10  ;;  %v5442_v6 = vmin.f32 %v5434_v51, 0.0  ;;  %4190 = vst [vmem:[%s12694_s7 + $0x18] sm:$0xff] %v4186_v10  ;;  %v5404_v42 = vmin.f32 %v4186_v10, 0.0  ;;  %v5407_v47 = vmul.f32 1.442695, %v5402_v33 }
 0x57c   : > { %v5443_v1 = vmin.f32 %v5435_v43, 0.0  ;;  %v5445_v7 = vmul.f32 1.442695, %v5441_v11  ;;  %v5409_v31 = vmul.f32 1.442695, %v5403_v25  ;;  %vm5438_vm9 = vcmp.gt.f32.partialorder %v5434_v51, 0.0 }
 0x57d   : > { %v5444_v39 = vmin.f32 %v5436_v0, 0.0  ;;  %v5447_v52 = vmul.f32 1.442695, %v5442_v6  ;;  %v5411_v55 = vmul.f32 1.442695, %v5404_v42  ;;  %vm5437_vm10 = vcmp.gt.f32.partialorder %v5433_v26, 0.0 }
 0x57e   : > { %11104 = vpow2.f32 %v5445_v7  ;;  %v5449_v57 = vmul.f32 1.442695, %v5443_v1  ;;  %vm5439_vm11 = vcmp.gt.f32.partialorder %v5435_v43, 0.0  ;;  %vm5440_vm12 = vcmp.gt.f32.partialorder %v5436_v0, 0.0  ;;  %v10571_v46 = vld [vmem:[#allocation19 + $0x34] ss:$8 sps:$4 sm:$0xff]  }
 0x57f   : > { %11106 = vpow2.f32 %v5447_v52  ;;  %v5451_v53 = vmul.f32 1.442695, %v5444_v39  ;;  %vm5400_vm14 = vcmp.gt.f32.partialorder %v4186_v10, 0.0  ;;  %vm5399_vm2 = vcmp.gt.f32.partialorder %v12690_v58, 0.0  ;;  %v10572_v23 = vld [vmem:[#allocation19 + $0x40] ss:$8 sps:$4 sm:$0xff]  }
 0x580   : > { %11108 = vpow2.f32 %v5449_v57  ;;  %v10583_v11 = vld [vmem:[#allocation19 + $0x74] ss:$8 sps:$4 sm:$0xff]   ;;  %v10581_v33 = vld [vmem:[#allocation19 + $0x70] ss:$8 sps:$4 sm:$0xff]   ;;  %v10584_v6 = vld [vmem:[#allocation19 + $0x80] ss:$8 sps:$4 sm:$0xff]  }
 0x581   : > { %11110 = vpow2.f32 %v5451_v53  ;;  %v10589_v1 = vld [vmem:[#allocation19 + $0x94] ss:$8 sps:$4 sm:$0xff]   ;;  %v10587_v7 = vld [vmem:[#allocation19 + $0x90] ss:$8 sps:$4 sm:$0xff]   ;;  %v10592_v42 = vld [vmem:[#allocation19 + $0xa4] ss:$8 sps:$4 sm:$0xff]  }
 0x582   : > { %11112 = vpow2.f32 %v5407_v47  ;;  %v10590_v20 = vld [vmem:[#allocation19 + $0xa0] ss:$8 sps:$4 sm:$0xff]   ;;  %v10595_v39 = vld [vmem:[#allocation19 + $0xb4] ss:$8 sps:$4 sm:$0xff]   ;;  %v10593_v52 = vld [vmem:[#allocation19 + $0xb0] ss:$8 sps:$4 sm:$0xff]  }
 0x583   : > { %11114 = vpow2.f32 %v5411_v55  ;;  %v10598_v57 = vld [vmem:[#allocation19 + $0xc4] ss:$8 sps:$4 sm:$0xff]   ;;  %v10596_v47 = vld [vmem:[#allocation19 + $0xc0] ss:$8 sps:$4 sm:$0xff]   ;;  %v10601_v25 = vld [vmem:[#allocation19 + $0xd4] ss:$8 sps:$4 sm:$0xff]  }
 0x584   : > { %11116 = vpow2.f32 %v5405_v12  ;;  %v10599_v53 = vld [vmem:[#allocation19 + $0xd0] ss:$8 sps:$4 sm:$0xff]   ;;  %v10604_v55 = vld [vmem:[#allocation19 + $0xe4] ss:$8 sps:$4 sm:$0xff]   ;;  %v10602_v12 = vld [vmem:[#allocation19 + $0xe0] ss:$8 sps:$4 sm:$0xff]  }
 0x585   : > { %11118 = vpow2.f32 %v5409_v31  ;;  %v10607_v31 = vld [vmem:[#allocation19 + $0xf4] ss:$8 sps:$4 sm:$0xff]  }
 0x588   : > { %v11105_v22 = vpop.eup %11104 }
 0x589   : > { %v11107_v37 = vpop.eup %11106  ;;  %v9067_v27 = vadd.f32 -1.0, %v11105_v22  ;;  %v10605_v22 = vld [vmem:[#allocation19 + $0xf0] ss:$8 sps:$4 sm:$0xff]  }
 0x58a   : > { %v11109_v40 = vpop.eup %11108  ;;  %v9068_v56 = vadd.f32 -1.0, %v11107_v37  ;;  %v10637_v37 = vld [vmem:[#allocation17 + $0x124] ss:$16 sps:$4 sm:$0xff]  }
 0x58b   : > { %v11111_v17 = vpop.eup %11110  ;;  %v9069_v18 = vadd.f32 -1.0, %v11109_v40  ;;  %v5457_v62 = vsel %vm5437_vm10, %v5433_v26, %v9067_v27  ;;  %v10569_v26 = vld [vmem:[#allocation19 + $0x30] ss:$8 sps:$4 sm:$0xff]   ;;  %6569 = vmatprep.subr.bf16.mxu1 %v10637_v37  ;;  %v10640_v40 = vld [vmem:[#allocation17 + $0x144] ss:$16 sps:$4 sm:$0xff]  }
 0x58c   : > { %v11113_v21 = vpop.eup %11112  ;;  %v9070_v61 = vadd.f32 -1.0, %v11111_v17  ;;  %v5458_v14 = vsel %vm5438_vm9, %v5434_v51, %v9068_v56  ;;  %v10580_v51 = vld [vmem:[#allocation19 + $0x64] ss:$8 sps:$4 sm:$0xff]   ;;  %v10635_v27 = vld [vmem:[#allocation17 + $0x120] ss:$16 sps:$4 sm:$0xff]  }
 0x58d   : > { %v11115_v44 = vpop.eup %11114  ;;  %v5459_v5 = vsel %vm5439_vm11, %v5435_v43, %v9069_v18  ;;  %v9064_v32 = vadd.f32 -1.0, %v11113_v21  ;;  %v10578_v43 = vld [vmem:[#allocation19 + $0x60] ss:$8 sps:$4 sm:$0xff]   ;;  %6570 = vmatpush1.bf16.msra.mxu1 %v10635_v27  ;;  %v10643_v17 = vld [vmem:[#allocation17 + $0x164] ss:$16 sps:$4 sm:$0xff]  }
 0x58e   : > { %v11117_v16 = vpop.eup %11116  ;;  %v5460_v15 = vsel %vm5440_vm12, %v5436_v0, %v9070_v61  ;;  %v9477_v48 = vpack.c.bf16 %v5459_v5, %v5457_v62  ;;  %v9066_v3 = vadd.f32 -1.0, %v11115_v44  ;;  %v10586_v0 = vld [vmem:[#allocation19 + $0x84] ss:$8 sps:$4 sm:$0xff]   ;;  %v10638_v56 = vld [vmem:[#allocation17 + $0x140] ss:$16 sps:$4 sm:$0xff]   ;;  %6571 = vmatprep.subr.bf16.mxu1 %v10640_v40 }
 0x58f   : > { %v11119_v19 = vpop.eup %11118  ;;  %v9478_v50 = vpack.c.bf16 %v5460_v15, %v5458_v14  ;;  %v9063_v4 = vadd.f32 -1.0, %v11117_v16  ;;  %v5418_v2 = vsel %vm5398_vm13, %v12687_v45, %v9064_v32  ;;  %v10568_v45 = vld [vmem:[#allocation19 + $0x24] ss:$8 sps:$4 sm:$0xff]   ;;  %v10641_v18 = vld [vmem:[#allocation17 + $0x160] ss:$16 sps:$4 sm:$0xff]  }
 0x590   : > { %v5420_v35 = vsel %vm5400_vm14, %v4186_v10, %v9066_v3  ;;  %v9065_v49 = vadd.f32 -1.0, %v11119_v19  ;;  %v10575_v10 = vld [vmem:[#allocation19 + $0x50] ss:$8 sps:$4 sm:$0xff]   ;;  %v10646_v21 = vld [vmem:[#allocation17 + $0x184] ss:$16 sps:$4 sm:$0xff]  }
 0x591   : > { %5733 = vmatprep.mubr.bf16.mxu0 %v9478_v50  ;;  %v9480_v28 = vpack.c.bf16 %v5420_v35, %v5418_v2  ;;  %v12714_v24 = vsel %vm5397_vm1, %v12684_v29, %v9063_v4  ;;  %v10574_v29 = vld [vmem:[#allocation19 + $0x44] ss:$8 sps:$4 sm:$0xff]   ;;  %6572 = vmatpush1.bf16.msra.mxu1 %v10638_v56  ;;  %v10644_v61 = vld [vmem:[#allocation17 + $0x180] ss:$16 sps:$4 sm:$0xff]  }
 0x592   : > { %5734 = vmatmul.mubr.bf16.vlgmr.msra.gmra.mrb[12].mxu0 %v9477_v48  ;;  %v12717_v63 = vsel %vm5399_vm2, %v12690_v58, %v9065_v49  ;;  %v10577_v58 = vld [vmem:[#allocation19 + $0x54] ss:$8 sps:$4 sm:$0xff]   ;;  %6573 = vmatprep.subr.bf16.mxu1 %v10643_v17  ;;  %v10647_v62 = vld [vmem:[#allocation17 + $0x1a0] ss:$16 sps:$4 sm:$0xff]  }
 0x593   : > { %5909 = vmatpush1.bf16.msra.mxu0 %v10560_v60  ;;  %5940 = vmatprep.mubr.bf16.mxu0 %v9480_v28  ;;  %v9479_v59 = vpack.c.bf16 %v12717_v63, %v12714_v24  ;;  %v10649_v44 = vld [vmem:[#allocation17 + $0x1a4] ss:$16 sps:$4 sm:$0xff]   ;;  %v10650_v32 = vld [vmem:[#allocation17 + $0x1c0] ss:$16 sps:$4 sm:$0xff]   ;;  %v10658_v15 = vld [vmem:[#allocation17 + $0xc] ss:$16 sps:$4 sm:$0xff]  }
 0x594   : > { %5910 = vmatprep.subr.bf16.mxu0 %v10565_v36  ;;  %v10652_v5 = vld [vmem:[#allocation17 + $0x1c4] ss:$16 sps:$4 sm:$0xff]   ;;  %v10653_v14 = vld [vmem:[#allocation17 + $0x1e0] ss:$16 sps:$4 sm:$0xff]  }
 0x595   : > { %6574 = vmatpush1.bf16.msra.mxu1 %v10641_v18  ;;  %v10655_v16 = vld [vmem:[#allocation17 + $0x1e4] ss:$16 sps:$4 sm:$0xff]   ;;  %v5381_v48 = vld [vmem:[%s13081_s19] sm:$0x3] }
 0x596   : > { %6575 = vmatprep.subr.bf16.mxu1 %v10646_v21  ;;  %v5386_v3 = vrot.slane %v5381_v48, %v12321_v41  ;;  %v5390_v19 = vrot.slane %v5381_v48, %v12327_v54 }
 0x597   : > { %5911 = vmatpush1.bf16.msra.mxu0 %v10563_v38 }
 0x598   : > { %5912 = vmatprep.subr.bf16.mxu0 %v10568_v45 }
 0x599   : > { %6576 = vmatpush1.bf16.msra.mxu1 %v10644_v61 }
 0x59a   : > { %6577 = vmatprep.subr.bf16.mxu1 %v10649_v44 }
 0x59b   : > { %5913 = vmatpush1.bf16.msra.mxu0 %v10566_v13 }
 0x59c   : > { %5914 = vmatprep.subr.bf16.mxu0 %v10571_v46 }
 0x59d   : > { %6578 = vmatpush1.bf16.msra.mxu1 %v10647_v62 }
 0x59e   : > { %6579 = vmatprep.subr.bf16.mxu1 %v10652_v5 }
 0x59f   : > { %5915 = vmatpush1.bf16.msra.mxu0 %v10569_v26 }
 0x5a0   : > { %5916 = vmatprep.subr.bf16.mxu0 %v10574_v29 }
 0x5a1   : > { %6580 = vmatpush1.bf16.msra.mxu1 %v10650_v32 }
 0x5a2   : > { %6581 = vmatprep.subr.bf16.mxu1 %v10655_v16 }
 0x5a3   : > { %5917 = vmatpush1.bf16.msra.mxu0 %v10572_v23 }
 0x5a4   : > { %5918 = vmatprep.subr.bf16.mxu0 %v10577_v58 }
 0x5a5   : > { %6582 = vmatpush1.bf16.msra.mxu1 %v10653_v14 }
 0x5a6   : > { %6594 = vmatprep.subr.bf16.mxu1 %v10658_v15 }
 0x5a7   : > { %5919 = vmatpush1.bf16.msra.mxu0 %v10575_v10 }
 0x5a8   : > { %5920 = vmatprep.subr.bf16.mxu0 %v10580_v51 }
 0x5ab   : > { %5921 = vmatpush1.bf16.msra.mxu0 %v10578_v43 }
 0x5ac   : > { %5922 = vmatprep.subr.bf16.mxu0 %v10583_v11 }
 0x5af   : > { %5923 = vmatpush1.bf16.msra.mxu0 %v10581_v33 }
 0x5b0   : > { %5924 = vmatprep.subr.bf16.mxu0 %v10586_v0 }
 0x5b3   : > { %5925 = vmatpush1.bf16.msra.mxu0 %v10584_v6 }
 0x5b4   : > { %5926 = vmatprep.subr.bf16.mxu0 %v10589_v1 }
 0x5b7   : > { %5927 = vmatpush1.bf16.msra.mxu0 %v10587_v7 }
 0x5b8   : > { %5928 = vmatprep.subr.bf16.mxu0 %v10592_v42 }
 0x5bb   : > { %5929 = vmatpush1.bf16.msra.mxu0 %v10590_v20 }
 0x5bc   : > { %5930 = vmatprep.subr.bf16.mxu0 %v10595_v39 }
 0x5bf   : > { %5931 = vmatpush1.bf16.msra.mxu0 %v10593_v52 }
 0x5c0   : > { %5932 = vmatprep.subr.bf16.mxu0 %v10598_v57 }
 0x5c3   : > { %5933 = vmatpush1.bf16.msra.mxu0 %v10596_v47 }
 0x5c4   : > { %5934 = vmatprep.subr.bf16.mxu0 %v10601_v25 }
 0x5c7   : > { %5935 = vmatpush1.bf16.msra.mxu0 %v10599_v53 }
 0x5c8   : > { %5936 = vmatprep.subr.bf16.mxu0 %v10604_v55 }
 0x5cb   : > { %5937 = vmatpush1.bf16.msra.mxu0 %v10602_v12 }
 0x5cc   : > { %5938 = vmatprep.subr.bf16.mxu0 %v10607_v31 }
 0x5cf   : > { %5939 = vmatpush1.bf16.msra.mxu0 %v10605_v22 }
 0x5d2   : > { %5941 = vmatmul.mubr.bf16.vlgmr.msra.gmra.mrb[12].mxu0 %v9479_v59 }
 0x6a5   : > { %v5942_v50 = vpop.f32.mrb[12].mxu0 }
 0x6a6   : > { %v9505_v60 = vadd.f32 %v5942_v50, %v5386_v3  ;;  %v5944_v4 = vpop.f32.mrb[13].mxu0 }
 0x6a7   : > { %v9506_v2 = vadd.f32 %v5944_v4, %v5390_v19  ;;  %v5946_v35 = vpop.f32.mrb[14].mxu0 }
 0x6a8   : > { %v12726_v36 = vrot.slane %v9505_v60, 7  ;;  %v9507_v49 = vadd.f32 %v5946_v35, %v5386_v3  ;;  %v5948_v28 = vpop.f32.mrb[15].mxu0 }
 0x6a9   : > { %v12728_v24 = vrot.slane %v9506_v2, 7  ;;  %v9508_v63 = vadd.f32 %v5948_v28, %v5390_v19 }
 0x6aa   : > { %v5981_v38 = vmin.f32 %v12726_v36, 0.0  ;;  %v12732_v45 = vrot.slane %v9507_v49, 7  ;;  %v12738_v26 = vsel %vm789_vm0, 0.0, %v12726_v36  ;;  %v12751_v43 = vsub.f32 0.0, %v12726_v36 }
 0x6ab   : > { %v5982_v59 = vmin.f32 %v12728_v24, 0.0  ;;  %v12734_v46 = vrot.slane %v9508_v63, 7  ;;  %v12747_v10 = vsel %vm789_vm0, 0.0, %v12728_v24  ;;  %v12758_v6 = vsub.f32 0.0, %v12738_v26 }
 0x6ac   : > { %v5991_v13 = vmul.f32 1.442695, %v5981_v38  ;;  %v12742_v23 = vsel %vm789_vm0, 0.0, %v12732_v45  ;;  %v5985_v58 = vmin.f32 %v12732_v45, 0.0  ;;  %v12761_v1 = vsub.f32 0.0, %v12747_v10 }
 0x6ad   : > { %v5993_v29 = vmul.f32 1.442695, %v5982_v59  ;;  %v5986_v51 = vmin.f32 %v12734_v46, 0.0  ;;  %v12755_v33 = vsel %vm789_vm0, 0.0, %v12734_v46  ;;  %v12764_v7 = vsub.f32 0.0, %v12742_v23 }
 0x6ae   : > { %11120 = vpow2.f32 %v5991_v13  ;;  %v5999_v11 = vmul.f32 1.442695, %v5985_v58  ;;  %v12767_v42 = vsub.f32 0.0, %v12755_v33  ;;  %v12770_v20 = vsub.f32 0.0, %v12728_v24 }
 0x6af   : > { %11122 = vpow2.f32 %v5993_v29  ;;  %v6001_v0 = vmul.f32 1.442695, %v5986_v51  ;;  %v6039_v39 = vmin.f32 %v12758_v6, 0.0  ;;  %v6040_v52 = vmin.f32 %v12761_v1, 0.0 }
 0x6b0   : > { %11124 = vpow2.f32 %v5999_v11  ;;  %vm5973_vm0 = vcmp.gt.f32.partialorder %v12726_v36, 0.0  ;;  %v6041_v57 = vmin.f32 %v12751_v43, 0.0  ;;  %v6043_v47 = vmin.f32 %v12764_v7, 0.0 }
 0x6b1   : > { %11126 = vpow2.f32 %v6001_v0  ;;  %v6044_v25 = vmin.f32 %v12767_v42, 0.0  ;;  %v12779_v53 = vsub.f32 0.0, %v12732_v45  ;;  %v12782_v55 = vsub.f32 0.0, %v12734_v46 }
 0x6b2   : > { %v6047_v12 = vmul.f32 1.442695, %v6039_v39  ;;  %v6049_v31 = vmul.f32 1.442695, %v6040_v52  ;;  %v6055_v22 = vmul.f32 1.442695, %v6043_v47 }
 0x6b3   : > { %v6057_v37 = vmul.f32 1.442695, %v6044_v25  ;;  %v5979_v27 = vmin.f32 %v12738_v26, 0.0  ;;  %v5980_v40 = vmin.f32 %v12747_v10, 0.0  ;;  %v6042_v17 = vmin.f32 %v12770_v20, 0.0 }
 0x6b4   : > { %11128 = vpow2.f32 %v6047_v12  ;;  %v5983_v18 = vmin.f32 %v12742_v23, 0.0  ;;  %v5984_v21 = vmin.f32 %v12755_v33, 0.0  ;;  %vm5974_vm3 = vcmp.gt.f32.partialorder %v12728_v24, 0.0 }
 0x6b5   : > { %11130 = vpow2.f32 %v6049_v31  ;;  %v5987_v44 = vmul.f32 1.442695, %v5979_v27  ;;  %v5989_v62 = vmul.f32 1.442695, %v5980_v40  ;;  %v6045_v5 = vmin.f32 %v12779_v53, 0.0 }
 0x6b6   : > { %v6046_v32 = vmin.f32 %v12782_v55, 0.0  ;;  %11132 = vpow2.f32 %v6055_v22  ;;  %v5995_v16 = vmul.f32 1.442695, %v5983_v18  ;;  %v5997_v14 = vmul.f32 1.442695, %v5984_v21 }
 0x6b7   : > { %11134 = vpow2.f32 %v6057_v37  ;;  %v6051_v19 = vmul.f32 1.442695, %v6041_v57  ;;  %v6053_v50 = vmul.f32 1.442695, %v6042_v17  ;;  %vm5977_vm4 = vcmp.gt.f32.partialorder %v12732_v45, 0.0 }
 0x6b8   : > { %v11121_v56 = vpop.eup %11120  ;;  %11136 = vpow2.f32 %v5987_v44  ;;  %v6059_v49 = vmul.f32 1.442695, %v6045_v5  ;;  %vm5978_vm5 = vcmp.gt.f32.partialorder %v12734_v46, 0.0  ;;  %v6061_v38 = vmul.f32 1.442695, %v6046_v32 }
 0x6b9   : > { %v11123_v61 = vpop.eup %11122  ;;  %v9141_v15 = vadd.f32 -1.0, %v11121_v56  ;;  %11138 = vpow2.f32 %v5989_v62  ;;  %vm6031_vm6 = vcmp.gt.f32.partialorder %v12758_v6, 0.0  ;;  %vm6032_vm7 = vcmp.gt.f32.partialorder %v12761_v1, 0.0  ;;  %v10661_v62 = vld [vmem:[#allocation17 + $0x2c] ss:$16 sps:$4 sm:$0xff]  }
 0x6ba   : > { %v9142_v48 = vadd.f32 -1.0, %v11123_v61  ;;  %v11125_v3 = vpop.eup %11124  ;;  %11140 = vpow2.f32 %v5995_v16  ;;  %vm6035_vm8 = vcmp.gt.f32.partialorder %v12764_v7, 0.0  ;;  %vm6036_vm9 = vcmp.gt.f32.partialorder %v12767_v42, 0.0  ;;  %v10656_v61 = vld [vmem:[#allocation17 + $0x8] ss:$16 sps:$4 sm:$0xff]  }
 0x6bb   : > { %v11127_v60 = vpop.eup %11126  ;;  %v9145_v4 = vadd.f32 -1.0, %v11125_v3  ;;  %v6013_v2 = vsel %vm5973_vm0, %v12726_v36, %v9141_v15  ;;  %11142 = vpow2.f32 %v5997_v14  ;;  %vm5971_vm10 = vcmp.gt.f32.partialorder %v12738_v26, 0.0 }
 0x6bc   : > { %v6014_v35 = vsel %vm5974_vm3, %v12728_v24, %v9142_v48  ;;  %v9146_v28 = vadd.f32 -1.0, %v11127_v60  ;;  %11144 = vpow2.f32 %v6051_v19  ;;  %vm5972_vm11 = vcmp.gt.f32.partialorder %v12747_v10, 0.0 }
 0x6bd   : > { %v9486_v63 = vpack.c.bf16 %v6014_v35, %v6013_v2  ;;  %v6017_v59 = vsel %vm5977_vm4, %v12732_v45, %v9145_v4  ;;  %11146 = vpow2.f32 %v6053_v50  ;;  %vm5975_vm12 = vcmp.gt.f32.partialorder %v12742_v23, 0.0 }
 0x6be   : > { %v6018_v13 = vsel %vm5978_vm5, %v12734_v46, %v9146_v28  ;;  %v11129_v36 = vpop.eup %11128  ;;  %11148 = vpow2.f32 %v6059_v49  ;;  %vm5976_vm13 = vcmp.gt.f32.partialorder %v12755_v33, 0.0  ;;  %vm6033_vm14 = vcmp.gt.f32.partialorder %v12751_v43, 0.0  ;;  %v10659_v28 = vld [vmem:[#allocation17 + $0x28] ss:$16 sps:$4 sm:$0xff]  }
 0x6bf   : > { %v9488_v29 = vpack.c.bf16 %v6018_v13, %v6017_v59  ;;  %v11131_v58 = vpop.eup %11130  ;;  %v9147_v24 = vadd.f32 -1.0, %v11129_v36  ;;  %11150 = vpow2.f32 %v6061_v38  ;;  %v12813_v22 = vshll.u32 %v9486_v63, 16  ;;  %v10664_v59 = vld [vmem:[#allocation17 + $0x4c] ss:$16 sps:$4 sm:$0xff]  }
 0x6c0   : > { %v11133_v51 = vpop.eup %11132  ;;  %v9148_v45 = vadd.f32 -1.0, %v11131_v58  ;;  %vm6034_vm1 = vcmp.gt.f32.partialorder %v12770_v20, 0.0  ;;  %vm6037_vm2 = vcmp.gt.f32.partialorder %v12779_v53, 0.0  ;;  %vm6038_vm0 = vcmp.gt.f32.partialorder %v12782_v55, 0.0 }
 0x6c1   : > { %v11135_v11 = vpop.eup %11134  ;;  %v9151_v46 = vadd.f32 -1.0, %v11133_v51  ;;  %v6071_v0 = vsel %vm6031_vm6, %v12758_v6, %v9147_v24  ;;  %v12822_v40 = vshll.u32 %v9488_v29, 16 }
 0x6c2   : > { %v11137_v39 = vpop.eup %11136  ;;  %v9152_v52 = vadd.f32 -1.0, %v11135_v11  ;;  %v6072_v57 = vsel %vm6032_vm7, %v12761_v1, %v9148_v45 }
 0x6c3   : > { %v11139_v47 = vpop.eup %11138  ;;  %v6075_v25 = vsel %vm6035_vm8, %v12764_v7, %v9151_v46  ;;  %v9489_v12 = vpack.c.bf16 %v6072_v57, %v6071_v0  ;;  %v9139_v31 = vadd.f32 -1.0, %v11137_v39  ;;  %v10662_v39 = vld [vmem:[#allocation17 + $0x48] ss:$16 sps:$4 sm:$0xff]  }
 0x6c4   : > { %v11141_v6 = vpop.eup %11140  ;;  %v6076_v1 = vsel %vm6036_vm9, %v12767_v42, %v9152_v52  ;;  %v12820_v37 = vpack.c.bf16 %v6075_v25, %v6071_v0  ;;  %v9140_v27 = vadd.f32 -1.0, %v11139_v47 }
 0x6c5   : > { %v11143_v7 = vpop.eup %11142  ;;  %v9482_v56 = vpack.c.bf16 %v6076_v1, %v6072_v57  ;;  %v9491_v17 = vpack.c.bf16 %v6076_v1, %v6075_v25  ;;  %v7092_v18 = vshrl.u32 %v9489_v12, 16  ;;  %v7095_v21 = vshll.u32 %v9489_v12, 16  ;;  %v10667_v12 = vld [vmem:[#allocation17 + $0x6c] ss:$16 sps:$4 sm:$0xff]  }
 0x6c6   : > { %v11145_v44 = vpop.eup %11144  ;;  %v9143_v5 = vadd.f32 -1.0, %v11141_v6  ;;  %v9144_v32 = vadd.f32 -1.0, %v11143_v7  ;;  %v6011_v42 = vsel %vm5971_vm10, %v12738_v26, %v9139_v31  ;;  %v6012_v16 = vsel %vm5972_vm11, %v12747_v10, %v9140_v27 }
 0x6c7   : > { %v11147_v14 = vpop.eup %11146  ;;  %6583 = vmatprep.mubr.bf16.mxu1 %v9482_v56  ;;  %v7094_v15 = vrot.slane %v7092_v18, 4  ;;  %v7097_v48 = vrot.slane %v7095_v21, 5  ;;  %v7106_v3 = vshrl.u32 %v9491_v17, 16  ;;  %v7109_v19 = vshll.u32 %v9491_v17, 16 }
 0x6c8   : > { %v11149_v50 = vpop.eup %11148  ;;  %6584 = vmatmul.mubr.bf16.vlgmr.msra.gmra.mrb[8].mxu1 %v12820_v37  ;;  %v6015_v60 = vsel %vm5975_vm12, %v12742_v23, %v9143_v5  ;;  %v6016_v26 = vsel %vm5976_vm13, %v12755_v33, %v9144_v32  ;;  %v9485_v4 = vpack.c.bf16 %v6012_v16, %v6011_v42  ;;  %v9149_v2 = vadd.f32 -1.0, %v11145_v44 }
 0x6c9   : > { %v11151_v10 = vpop.eup %11150  ;;  %v7108_v35 = vrot.slane %v7106_v3, 4  ;;  %v7111_v49 = vrot.slane %v7109_v19, 5  ;;  %6595 = vmatpush1.bf16.msra.mxu1 %v10656_v61  ;;  %6626 = vmatprep.mubr.bf16.mxu1 %v9482_v56  ;;  %v12839_v63 = vpack.c.bf16 %v6016_v26, %v6012_v16  ;;  %v9487_v38 = vpack.c.bf16 %v6016_v26, %v6015_v60  ;;  %v10676_v26 = vld [vmem:[#allocation17 + $0xcc] ss:$16 sps:$4 sm:$0xff]  }
 0x6ca   : > { %6596 = vmatprep.subr.bf16.mxu1 %v10661_v62  ;;  %v7056_v13 = vshrl.u32 %v9485_v4, 16  ;;  %v7059_v29 = vshll.u32 %v9485_v4, 16  ;;  %v12841_v23 = vpack.c.bf16 %v6015_v60, %v6011_v42  ;;  %v9150_v36 = vadd.f32 -1.0, %v11147_v14  ;;  %v10670_v62 = vld [vmem:[#allocation17 + $0x8c] ss:$16 sps:$4 sm:$0xff]  }
 0x6cb   : > { %v7070_v58 = vshrl.u32 %v9487_v38, 16  ;;  %v7073_v33 = vshll.u32 %v9487_v38, 16  ;;  %v9153_v24 = vadd.f32 -1.0, %v11149_v50  ;;  %v9154_v51 = vadd.f32 -1.0, %v11151_v10  ;;  %v10673_v50 = vld [vmem:[#allocation17 + $0xac] ss:$16 sps:$4 sm:$0xff]  }
 0x6cc   : > { %v7058_v45 = vrot.slane %v7056_v13, 4  ;;  %v7061_v11 = vrot.slane %v7059_v29, 5  ;;  %v6073_v46 = vsel %vm6033_vm14, %v12751_v43, %v9149_v2  ;;  %v6074_v0 = vsel %vm6034_vm1, %v12770_v20, %v9150_v36  ;;  %v10671_v60 = vld [vmem:[#allocation17 + $0xa8] ss:$16 sps:$4 sm:$0xff]   ;;  %v10679_v2 = vld [vmem:[#allocation17 + $0xec] ss:$16 sps:$4 sm:$0xff]  }
 0x6cd   : > { %6597 = vmatpush1.bf16.msra.mxu1 %v10659_v28  ;;  %v7072_v52 = vrot.slane %v7070_v58, 4  ;;  %v7075_v57 = vrot.slane %v7073_v33, 5  ;;  %v6077_v47 = vsel %vm6037_vm2, %v12779_v53, %v9153_v24  ;;  %v6078_v25 = vsel %vm6038_vm0, %v12782_v55, %v9154_v51  ;;  %v10665_v53 = vld [vmem:[#allocation17 + $0x68] ss:$16 sps:$4 sm:$0xff]   ;;  %v10688_v38 = vld [vmem:[#allocation17 + $0x14c] ss:$16 sps:$4 sm:$0xff]  }
 0x6ce   : > { %6598 = vmatprep.subr.bf16.mxu1 %v10664_v59  ;;  %v7062_v31 = vor.u32 %v7061_v11, %v7058_v45  ;;  %v9490_v43 = vpack.c.bf16 %v6074_v0, %v6073_v46  ;;  %v9492_v6 = vpack.c.bf16 %v6078_v25, %v6077_v47  ;;  %v7098_v1 = vor.u32 %v7097_v48, %v7094_v15  ;;  %v10668_v48 = vld [vmem:[#allocation17 + $0x88] ss:$16 sps:$4 sm:$0xff]   ;;  %v10691_v13 = vld [vmem:[#allocation17 + $0x16c] ss:$16 sps:$4 sm:$0xff]   ;;  %v10706_v0 = vld [vmem:[#allocation16 + $0x4] ss:$16 sps:$4 sm:$0xff]  }
 0x6cf   : > { %v7067_v20 = vrot.slane %v12813_v22, 5  ;;  %v7076_v27 = vor.u32 %v7075_v57, %v7072_v52  ;;  %v7112_v7 = vor.u32 %v7111_v49, %v7108_v35  ;;  %v7081_v44 = vrot.slane %v12822_v40, 5  ;;  %v10674_v4 = vld [vmem:[#allocation17 + $0xc8] ss:$16 sps:$4 sm:$0xff]   ;;  %v10685_v49 = vld [vmem:[#allocation17 + $0x12c] ss:$16 sps:$4 sm:$0xff]  }
 0x6d0   : > { %v7063_v56 = vrot.slane %v7062_v31, 4  ;;  %v7099_v17 = vrot.slane %v7098_v1, 4  ;;  %v7101_v18 = vshll.u32 %v9490_v43, 16  ;;  %v7115_v21 = vshll.u32 %v9492_v6, 16  ;;  %v10677_v10 = vld [vmem:[#allocation17 + $0xe8] ss:$16 sps:$4 sm:$0xff]  }
 0x6d1   : > { %6599 = vmatpush1.bf16.msra.mxu1 %v10662_v39  ;;  %v7077_v61 = vrot.slane %v7076_v27, 4  ;;  %v7113_v55 = vrot.slane %v7112_v7, 4  ;;  %v10680_v35 = vld [vmem:[#allocation17 + $0x108] ss:$16 sps:$4 sm:$0xff]   ;;  %v10694_v36 = vld [vmem:[#allocation17 + $0x18c] ss:$16 sps:$4 sm:$0xff]  }
 0x6d2   : > { %6600 = vmatprep.subr.bf16.mxu1 %v10667_v12  ;;  %v7068_v5 = vsel %vm12267_vm15, %v7063_v56, %v7067_v20  ;;  %v7103_v32 = vrot.slane %v7101_v18, 5  ;;  %v7117_v42 = vrot.slane %v7115_v21, 5  ;;  %v10683_v28 = vld [vmem:[#allocation17 + $0x128] ss:$16 sps:$4 sm:$0xff]   ;;  %v10697_v33 = vld [vmem:[#allocation17 + $0x1ac] ss:$16 sps:$4 sm:$0xff]  }
 0x6d3   : > { %v7082_v22 = vsel %vm12267_vm15, %v7077_v61, %v7081_v44  ;;  %v10686_v59 = vld [vmem:[#allocation17 + $0x148] ss:$16 sps:$4 sm:$0xff]   ;;  %v10700_v51 = vld [vmem:[#allocation17 + $0x1cc] ss:$16 sps:$4 sm:$0xff]   ;;  %v10704_v39 = vld [vmem:[#allocation16] ss:$16 sps:$4 sm:$0xff]  }
 0x6d4   : > { %v12861_v16 = vcombine.low %v7068_v5, %v7082_v22  ;;  %v12863_v14 = vcombine.high %v7068_v5, %v7082_v22  ;;  %v7104_v15 = vsel %vm12267_vm15, %v7099_v17, %v7103_v32  ;;  %v7118_v40 = vsel %vm12267_vm15, %v7113_v55, %v7117_v42  ;;  %v10689_v29 = vld [vmem:[#allocation17 + $0x168] ss:$16 sps:$4 sm:$0xff]   ;;  %v10703_v11 = vld [vmem:[#allocation17 + $0x1ec] ss:$16 sps:$4 sm:$0xff]   ;;  %v10709_v52 = vld [vmem:[#allocation16 + $0x24] ss:$16 sps:$4 sm:$0xff]  }
 0x6d5   : > { %6601 = vmatpush1.bf16.msra.mxu1 %v10665_v53  ;;  %v12869_v3 = vcombine.low %v7104_v15, %v7118_v40  ;;  %v12871_v19 = vcombine.high %v7104_v15, %v7118_v40  ;;  %v10692_v58 = vld [vmem:[#allocation17 + $0x188] ss:$16 sps:$4 sm:$0xff]   ;;  %v10707_v57 = vld [vmem:[#allocation16 + $0x20] ss:$16 sps:$4 sm:$0xff]   ;;  %v10712_v47 = vld [vmem:[#allocation16 + $0x44] ss:$16 sps:$4 sm:$0xff]  }
 0x6d6   : > { %6602 = vmatprep.subr.bf16.mxu1 %v10670_v62  ;;  %v10695_v24 = vld [vmem:[#allocation17 + $0x1a8] ss:$16 sps:$4 sm:$0xff]   ;;  %v10710_v25 = vld [vmem:[#allocation16 + $0x40] ss:$16 sps:$4 sm:$0xff]   ;;  %v10715_v12 = vld [vmem:[#allocation16 + $0x64] ss:$16 sps:$4 sm:$0xff]  }
 0x6d7   : > { %v10698_v45 = vld [vmem:[#allocation17 + $0x1c8] ss:$16 sps:$4 sm:$0xff]   ;;  %v10713_v31 = vld [vmem:[#allocation16 + $0x60] ss:$16 sps:$4 sm:$0xff]   ;;  %v10718_v43 = vld [vmem:[#allocation16 + $0x84] ss:$16 sps:$4 sm:$0xff]  }
 0x6d8   : > { %v10701_v46 = vld [vmem:[#allocation17 + $0x1e8] ss:$16 sps:$4 sm:$0xff]   ;;  %v10716_v6 = vld [vmem:[#allocation16 + $0x80] ss:$16 sps:$4 sm:$0xff]   ;;  %v10721_v1 = vld [vmem:[#allocation16 + $0xa4] ss:$16 sps:$4 sm:$0xff]  }
 0x6d9   : > { %6603 = vmatpush1.bf16.msra.mxu1 %v10668_v48  ;;  %v10724_v20 = vld [vmem:[#allocation16 + $0xc4] ss:$16 sps:$4 sm:$0xff]   ;;  %v10722_v27 = vld [vmem:[#allocation16 + $0xc0] ss:$16 sps:$4 sm:$0xff]  }
 0x6da   : > { %6604 = vmatprep.subr.bf16.mxu1 %v10673_v50  ;;  %v10727_v7 = vld [vmem:[#allocation16 + $0xe4] ss:$16 sps:$4 sm:$0xff]   ;;  %v10725_v56 = vld [vmem:[#allocation16 + $0xe0] ss:$16 sps:$4 sm:$0xff]  }
 0x6db   : > { %v10730_v17 = vld [vmem:[#allocation16 + $0x104] ss:$16 sps:$4 sm:$0xff]   ;;  %v10728_v18 = vld [vmem:[#allocation16 + $0x100] ss:$16 sps:$4 sm:$0xff]  }
 0x6dc   : > { %v10733_v21 = vld [vmem:[#allocation16 + $0x124] ss:$16 sps:$4 sm:$0xff]   ;;  %v10731_v53 = vld [vmem:[#allocation16 + $0x120] ss:$16 sps:$4 sm:$0xff]  }
 0x6dd   : > { %6605 = vmatpush1.bf16.msra.mxu1 %v10671_v60  ;;  %v10736_v61 = vld [vmem:[#allocation16 + $0x144] ss:$16 sps:$4 sm:$0xff]   ;;  %v10734_v44 = vld [vmem:[#allocation16 + $0x140] ss:$16 sps:$4 sm:$0xff]   ;;  %v10754_v60 = vld [vmem:[#allocation16 + $0xc] ss:$16 sps:$4 sm:$0xff]  }
 0x6de   : > { %6606 = vmatprep.subr.bf16.mxu1 %v10676_v26  ;;  %v10739_v55 = vld [vmem:[#allocation16 + $0x164] ss:$16 sps:$4 sm:$0xff]   ;;  %v10737_v62 = vld [vmem:[#allocation16 + $0x160] ss:$16 sps:$4 sm:$0xff]   ;;  %v10752_v26 = vld [vmem:[#allocation16 + $0x8] ss:$16 sps:$4 sm:$0xff]  }
 0x6df   : > { %v10742_v5 = vld [vmem:[#allocation16 + $0x184] ss:$16 sps:$4 sm:$0xff]   ;;  %v10740_v32 = vld [vmem:[#allocation16 + $0x180] ss:$16 sps:$4 sm:$0xff]  }
 0x6e0   : > { %v10745_v42 = vld [vmem:[#allocation16 + $0x1a4] ss:$16 sps:$4 sm:$0xff]   ;;  %v10743_v22 = vld [vmem:[#allocation16 + $0x1a0] ss:$16 sps:$4 sm:$0xff]  }
 0x6e1   : > { %6607 = vmatpush1.bf16.msra.mxu1 %v10674_v4  ;;  %v10748_v15 = vld [vmem:[#allocation16 + $0x1c4] ss:$16 sps:$4 sm:$0xff]   ;;  %v10746_v40 = vld [vmem:[#allocation16 + $0x1c0] ss:$16 sps:$4 sm:$0xff]   ;;  %v10757_v4 = vld [vmem:[#allocation16 + $0x2c] ss:$16 sps:$4 sm:$0xff]  }
 0x6e2   : > { %6608 = vmatprep.subr.bf16.mxu1 %v10679_v2  ;;  %v10751_v48 = vld [vmem:[#allocation16 + $0x1e4] ss:$16 sps:$4 sm:$0xff]   ;;  %v10749_v50 = vld [vmem:[#allocation16 + $0x1e0] ss:$16 sps:$4 sm:$0xff]   ;;  %v10755_v2 = vld [vmem:[#allocation16 + $0x28] ss:$16 sps:$4 sm:$0xff]  }
 0x6e5   : > { %6609 = vmatpush1.bf16.msra.mxu1 %v10677_v10  ;;  %v10760_v10 = vld [vmem:[#allocation16 + $0x4c] ss:$16 sps:$4 sm:$0xff]  }
 0x6e6   : > { %6610 = vmatprep.subr.bf16.mxu1 %v10682_v30  ;;  %v10758_v30 = vld [vmem:[#allocation16 + $0x48] ss:$16 sps:$4 sm:$0xff]  }
 0x6e9   : > { %6611 = vmatpush1.bf16.msra.mxu1 %v10680_v35  ;;  %v10763_v35 = vld [vmem:[#allocation16 + $0x6c] ss:$16 sps:$4 sm:$0xff]  }
 0x6ea   : > { %6612 = vmatprep.subr.bf16.mxu1 %v10685_v49  ;;  %v10761_v49 = vld [vmem:[#allocation16 + $0x68] ss:$16 sps:$4 sm:$0xff]  }
 0x6ed   : > { %6613 = vmatpush1.bf16.msra.mxu1 %v10683_v28  ;;  %v10766_v28 = vld [vmem:[#allocation16 + $0x8c] ss:$16 sps:$4 sm:$0xff]  }
 0x6ee   : > { %6614 = vmatprep.subr.bf16.mxu1 %v10688_v38  ;;  %v10764_v38 = vld [vmem:[#allocation16 + $0x88] ss:$16 sps:$4 sm:$0xff]  }
 0x6f1   : > { %6615 = vmatpush1.bf16.msra.mxu1 %v10686_v59  ;;  %v10769_v59 = vld [vmem:[#allocation16 + $0xac] ss:$16 sps:$4 sm:$0xff]  }
 0x6f2   : > { %6616 = vmatprep.subr.bf16.mxu1 %v10691_v13  ;;  %v10767_v13 = vld [vmem:[#allocation16 + $0xa8] ss:$16 sps:$4 sm:$0xff]  }
 0x6f5   : > { %6617 = vmatpush1.bf16.msra.mxu1 %v10689_v29  ;;  %v10772_v29 = vld [vmem:[#allocation16 + $0xcc] ss:$16 sps:$4 sm:$0xff]  }
 0x6f6   : > { %6618 = vmatprep.subr.bf16.mxu1 %v10694_v36  ;;  %v10775_v36 = vld [vmem:[#allocation16 + $0xec] ss:$16 sps:$4 sm:$0xff]  }
 0x6f9   : > { %6619 = vmatpush1.bf16.msra.mxu1 %v10692_v58  ;;  %v10773_v58 = vld [vmem:[#allocation16 + $0xe8] ss:$16 sps:$4 sm:$0xff]  }
 0x6fa   : > { %6620 = vmatprep.subr.bf16.mxu1 %v10697_v33  ;;  %v10778_v33 = vld [vmem:[#allocation16 + $0x10c] ss:$16 sps:$4 sm:$0xff]  }
 0x6fd   : > { %6621 = vmatpush1.bf16.msra.mxu1 %v10695_v24  ;;  %v10776_v24 = vld [vmem:[#allocation16 + $0x108] ss:$16 sps:$4 sm:$0xff]  }
 0x6fe   : > { %6622 = vmatprep.subr.bf16.mxu1 %v10700_v51  ;;  %v10781_v51 = vld [vmem:[#allocation16 + $0x12c] ss:$16 sps:$4 sm:$0xff]  }
 0x701   : > { %6623 = vmatpush1.bf16.msra.mxu1 %v10698_v45  ;;  %v10779_v45 = vld [vmem:[#allocation16 + $0x128] ss:$16 sps:$4 sm:$0xff]  }
 0x702   : > { %6624 = vmatprep.subr.bf16.mxu1 %v10703_v11  ;;  %v10784_v11 = vld [vmem:[#allocation16 + $0x14c] ss:$16 sps:$4 sm:$0xff]  }
 0x705   : > { %6625 = vmatpush1.bf16.msra.mxu1 %v10701_v46  ;;  %v10782_v46 = vld [vmem:[#allocation16 + $0x148] ss:$16 sps:$4 sm:$0xff]  }
 0x706   : > { %6961 = vmatprep.subr.bf16.mxu1 %v10706_v0  ;;  %v10787_v0 = vld [vmem:[#allocation16 + $0x16c] ss:$16 sps:$4 sm:$0xff]  }
 0x708   : > { %6627 = vmatmul.mubr.bf16.vlgmr.msra.gmra.mrb[12].mxu1 %v12820_v37  ;;  %v10719_v37 = vld [vmem:[#allocation16 + $0xa0] ss:$16 sps:$4 sm:$0xff]  }
 0x709   : > { %6962 = vmatpush1.bf16.msra.mxu1 %v10704_v39  ;;  %6993 = vmatprep.mubr.bf16.mxu1 %v12839_v63  ;;  %v10785_v39 = vld [vmem:[#allocation16 + $0x168] ss:$16 sps:$4 sm:$0xff]  }
 0x70a   : > { %6963 = vmatprep.subr.bf16.mxu1 %v10709_v52  ;;  %v10790_v52 = vld [vmem:[#allocation16 + $0x18c] ss:$16 sps:$4 sm:$0xff]  }
 0x70d   : > { %6964 = vmatpush1.bf16.msra.mxu1 %v10707_v57  ;;  %v10788_v57 = vld [vmem:[#allocation16 + $0x188] ss:$16 sps:$4 sm:$0xff]  }
 0x70e   : > { %6965 = vmatprep.subr.bf16.mxu1 %v10712_v47  ;;  %v10793_v47 = vld [vmem:[#allocation16 + $0x1ac] ss:$16 sps:$4 sm:$0xff]  }
 0x711   : > { %6966 = vmatpush1.bf16.msra.mxu1 %v10710_v25  ;;  %v10791_v25 = vld [vmem:[#allocation16 + $0x1a8] ss:$16 sps:$4 sm:$0xff]  }
 0x712   : > { %6967 = vmatprep.subr.bf16.mxu1 %v10715_v12  ;;  %v10796_v12 = vld [vmem:[#allocation16 + $0x1cc] ss:$16 sps:$4 sm:$0xff]  }
 0x715   : > { %6968 = vmatpush1.bf16.msra.mxu1 %v10713_v31  ;;  %v10794_v31 = vld [vmem:[#allocation16 + $0x1c8] ss:$16 sps:$4 sm:$0xff]  }
 0x716   : > { %6969 = vmatprep.subr.bf16.mxu1 %v10718_v43  ;;  %v10799_v43 = vld [vmem:[#allocation16 + $0x1ec] ss:$16 sps:$4 sm:$0xff]  }
 0x719   : > { %6970 = vmatpush1.bf16.msra.mxu1 %v10716_v6  ;;  %v10797_v6 = vld [vmem:[#allocation16 + $0x1e8] ss:$16 sps:$4 sm:$0xff]  }
 0x71a   : > { %6971 = vmatprep.subr.bf16.mxu1 %v10721_v1  ;;  %v10802_v1 = vld [vmem:[#allocation16 + $0x204] ss:$16 sps:$4 sm:$0xff]  }
 0x71d   : > { %6972 = vmatpush1.bf16.msra.mxu1 %v10719_v37  ;;  %v10800_v37 = vld [vmem:[#allocation16 + $0x200] ss:$16 sps:$4 sm:$0xff]  }
 0x71e   : > { %6973 = vmatprep.subr.bf16.mxu1 %v10724_v20  ;;  %v10805_v20 = vld [vmem:[#allocation16 + $0x224] ss:$16 sps:$4 sm:$0xff]  }
 0x721   : > { %6974 = vmatpush1.bf16.msra.mxu1 %v10722_v27  ;;  %v10803_v27 = vld [vmem:[#allocation16 + $0x220] ss:$16 sps:$4 sm:$0xff]  }
 0x722   : > { %6975 = vmatprep.subr.bf16.mxu1 %v10727_v7  ;;  %v10808_v7 = vld [vmem:[#allocation16 + $0x244] ss:$16 sps:$4 sm:$0xff]  }
 0x725   : > { %6976 = vmatpush1.bf16.msra.mxu1 %v10725_v56  ;;  %v10806_v56 = vld [vmem:[#allocation16 + $0x240] ss:$16 sps:$4 sm:$0xff]  }
 0x726   : > { %6977 = vmatprep.subr.bf16.mxu1 %v10730_v17  ;;  %v10811_v17 = vld [vmem:[#allocation16 + $0x264] ss:$16 sps:$4 sm:$0xff]  }
 0x729   : > { %6978 = vmatpush1.bf16.msra.mxu1 %v10728_v18  ;;  %v10809_v18 = vld [vmem:[#allocation16 + $0x260] ss:$16 sps:$4 sm:$0xff]  }
 0x72a   : > { %6979 = vmatprep.subr.bf16.mxu1 %v10733_v21  ;;  %v10814_v21 = vld [vmem:[#allocation16 + $0x284] ss:$16 sps:$4 sm:$0xff]  }
 0x72d   : > { %6980 = vmatpush1.bf16.msra.mxu1 %v10731_v53  ;;  %v10812_v53 = vld [vmem:[#allocation16 + $0x280] ss:$16 sps:$4 sm:$0xff]  }
 0x72e   : > { %6981 = vmatprep.subr.bf16.mxu1 %v10736_v61  ;;  %v10817_v61 = vld [vmem:[#allocation16 + $0x2a4] ss:$16 sps:$4 sm:$0xff]  }
 0x731   : > { %6982 = vmatpush1.bf16.msra.mxu1 %v10734_v44  ;;  %v10820_v44 = vld [vmem:[#allocation16 + $0x2c4] ss:$16 sps:$4 sm:$0xff]  }
 0x732   : > { %6983 = vmatprep.subr.bf16.mxu1 %v10739_v55  ;;  %v10818_v55 = vld [vmem:[#allocation16 + $0x2c0] ss:$16 sps:$4 sm:$0xff]  }
 0x735   : > { %6984 = vmatpush1.bf16.msra.mxu1 %v10737_v62  ;;  %v10823_v62 = vld [vmem:[#allocation16 + $0x2e4] ss:$16 sps:$4 sm:$0xff]  }
 0x736   : > { %6985 = vmatprep.subr.bf16.mxu1 %v10742_v5  ;;  %v10821_v5 = vld [vmem:[#allocation16 + $0x2e0] ss:$16 sps:$4 sm:$0xff]  }
 0x739   : > { %6986 = vmatpush1.bf16.msra.mxu1 %v10740_v32  ;;  %v10826_v32 = vld [vmem:[#allocation16 + $0x304] ss:$16 sps:$4 sm:$0xff]  }
 0x73a   : > { %6987 = vmatprep.subr.bf16.mxu1 %v10745_v42  ;;  %v10824_v42 = vld [vmem:[#allocation16 + $0x300] ss:$16 sps:$4 sm:$0xff]  }
 0x73d   : > { %6988 = vmatpush1.bf16.msra.mxu1 %v10743_v22  ;;  %v10829_v22 = vld [vmem:[#allocation16 + $0x324] ss:$16 sps:$4 sm:$0xff]  }
 0x73e   : > { %6989 = vmatprep.subr.bf16.mxu1 %v10748_v15  ;;  %v10827_v15 = vld [vmem:[#allocation16 + $0x320] ss:$16 sps:$4 sm:$0xff]  }
 0x741   : > { %6990 = vmatpush1.bf16.msra.mxu1 %v10746_v40  ;;  %v10832_v40 = vld [vmem:[#allocation16 + $0x344] ss:$16 sps:$4 sm:$0xff]  }
 0x742   : > { %6991 = vmatprep.subr.bf16.mxu1 %v10751_v48  ;;  %v10830_v48 = vld [vmem:[#allocation16 + $0x340] ss:$16 sps:$4 sm:$0xff]  }
 0x745   : > { %6992 = vmatpush1.bf16.msra.mxu1 %v10749_v50  ;;  %v10835_v50 = vld [vmem:[#allocation16 + $0x364] ss:$16 sps:$4 sm:$0xff]  }
 0x746   : > { %7004 = vmatprep.subr.bf16.mxu1 %v10754_v60  ;;  %v10833_v60 = vld [vmem:[#allocation16 + $0x360] ss:$16 sps:$4 sm:$0xff]  }
 0x748   : > { %6994 = vmatmul.mubr.bf16.vlgmr.msra.gmra.mrb[8].mxu1 %v12841_v23 }
 0x749   : > { %7005 = vmatpush1.bf16.msra.mxu1 %v10752_v26  ;;  %7036 = vmatprep.mubr.bf16.mxu1 %v12839_v63  ;;  %v10770_v63 = vld [vmem:[#allocation16 + $0xc8] ss:$16 sps:$4 sm:$0xff]   ;;  %v10838_v26 = vld [vmem:[#allocation16 + $0x384] ss:$16 sps:$4 sm:$0xff]  }
 0x74a   : > { %7006 = vmatprep.subr.bf16.mxu1 %v10757_v4  ;;  %v10836_v4 = vld [vmem:[#allocation16 + $0x380] ss:$16 sps:$4 sm:$0xff]  }
 0x74d   : > { %7007 = vmatpush1.bf16.msra.mxu1 %v10755_v2  ;;  %v10841_v2 = vld [vmem:[#allocation16 + $0x3a4] ss:$16 sps:$4 sm:$0xff]  }
 0x74e   : > { %7008 = vmatprep.subr.bf16.mxu1 %v10760_v10  ;;  %v10839_v10 = vld [vmem:[#allocation16 + $0x3a0] ss:$16 sps:$4 sm:$0xff]  }
 0x751   : > { %7009 = vmatpush1.bf16.msra.mxu1 %v10758_v30  ;;  %v10844_v30 = vld [vmem:[#allocation16 + $0x3c4] ss:$16 sps:$4 sm:$0xff]  }
 0x752   : > { %7010 = vmatprep.subr.bf16.mxu1 %v10763_v35  ;;  %v10842_v35 = vld [vmem:[#allocation16 + $0x3c0] ss:$16 sps:$4 sm:$0xff]  }
 0x755   : > { %7011 = vmatpush1.bf16.msra.mxu1 %v10761_v49  ;;  %v10847_v49 = vld [vmem:[#allocation16 + $0x3e4] ss:$16 sps:$4 sm:$0xff]  }
 0x756   : > { %7012 = vmatprep.subr.bf16.mxu1 %v10766_v28  ;;  %v10845_v28 = vld [vmem:[#allocation16 + $0x3e0] ss:$16 sps:$4 sm:$0xff]  }
 0x759   : > { %7013 = vmatpush1.bf16.msra.mxu1 %v10764_v38  ;;  %v10850_v38 = vld [vmem:[#allocation16 + $0x20c] ss:$16 sps:$4 sm:$0xff]  }
 0x75a   : > { %7014 = vmatprep.subr.bf16.mxu1 %v10769_v59  ;;  %v10848_v59 = vld [vmem:[#allocation16 + $0x208] ss:$16 sps:$4 sm:$0xff]  }
 0x75d   : > { %7015 = vmatpush1.bf16.msra.mxu1 %v10767_v13  ;;  %v10853_v13 = vld [vmem:[#allocation16 + $0x22c] ss:$16 sps:$4 sm:$0xff]  }
 0x75e   : > { %7016 = vmatprep.subr.bf16.mxu1 %v10772_v29  ;;  %v10851_v29 = vld [vmem:[#allocation16 + $0x228] ss:$16 sps:$4 sm:$0xff]  }
 0x761   : > { %7017 = vmatpush1.bf16.msra.mxu1 %v10770_v63  ;;  %v10856_v63 = vld [vmem:[#allocation16 + $0x24c] ss:$16 sps:$4 sm:$0xff]  }
 0x762   : > { %7018 = vmatprep.subr.bf16.mxu1 %v10775_v36  ;;  %v10854_v36 = vld [vmem:[#allocation16 + $0x248] ss:$16 sps:$4 sm:$0xff]  }
 0x765   : > { %7019 = vmatpush1.bf16.msra.mxu1 %v10773_v58  ;;  %v10859_v58 = vld [vmem:[#allocation16 + $0x26c] ss:$16 sps:$4 sm:$0xff]  }
 0x766   : > { %7020 = vmatprep.subr.bf16.mxu1 %v10778_v33  ;;  %v10857_v33 = vld [vmem:[#allocation16 + $0x268] ss:$16 sps:$4 sm:$0xff]  }
 0x769   : > { %7021 = vmatpush1.bf16.msra.mxu1 %v10776_v24  ;;  %v10862_v24 = vld [vmem:[#allocation16 + $0x28c] ss:$16 sps:$4 sm:$0xff]  }
 0x76a   : > { %7022 = vmatprep.subr.bf16.mxu1 %v10781_v51  ;;  %v10860_v51 = vld [vmem:[#allocation16 + $0x288] ss:$16 sps:$4 sm:$0xff]  }
 0x76d   : > { %7023 = vmatpush1.bf16.msra.mxu1 %v10779_v45  ;;  %v10865_v45 = vld [vmem:[#allocation16 + $0x2ac] ss:$16 sps:$4 sm:$0xff]  }
 0x76e   : > { %7024 = vmatprep.subr.bf16.mxu1 %v10784_v11  ;;  %v10863_v11 = vld [vmem:[#allocation16 + $0x2a8] ss:$16 sps:$4 sm:$0xff]  }
 0x771   : > { %7025 = vmatpush1.bf16.msra.mxu1 %v10782_v46  ;;  %v10868_v46 = vld [vmem:[#allocation16 + $0x2cc] ss:$16 sps:$4 sm:$0xff]  }
 0x772   : > { %7026 = vmatprep.subr.bf16.mxu1 %v10787_v0  ;;  %v10871_v0 = vld [vmem:[#allocation16 + $0x2ec] ss:$16 sps:$4 sm:$0xff]  }
 0x775   : > { %7027 = vmatpush1.bf16.msra.mxu1 %v10785_v39  ;;  %v10869_v39 = vld [vmem:[#allocation16 + $0x2e8] ss:$16 sps:$4 sm:$0xff]  }
 0x776   : > { %7028 = vmatprep.subr.bf16.mxu1 %v10790_v52  ;;  %v10874_v52 = vld [vmem:[#allocation16 + $0x30c] ss:$16 sps:$4 sm:$0xff]  }
 0x779   : > { %7029 = vmatpush1.bf16.msra.mxu1 %v10788_v57  ;;  %v10872_v57 = vld [vmem:[#allocation16 + $0x308] ss:$16 sps:$4 sm:$0xff]  }
 0x77a   : > { %7030 = vmatprep.subr.bf16.mxu1 %v10793_v47  ;;  %v10877_v47 = vld [vmem:[#allocation16 + $0x32c] ss:$16 sps:$4 sm:$0xff]  }
 0x77d   : > { %7031 = vmatpush1.bf16.msra.mxu1 %v10791_v25  ;;  %v10875_v25 = vld [vmem:[#allocation16 + $0x328] ss:$16 sps:$4 sm:$0xff]  }
 0x77e   : > { %7032 = vmatprep.subr.bf16.mxu1 %v10796_v12  ;;  %v10880_v12 = vld [vmem:[#allocation16 + $0x34c] ss:$16 sps:$4 sm:$0xff]  }
 0x781   : > { %7033 = vmatpush1.bf16.msra.mxu1 %v10794_v31  ;;  %v10878_v31 = vld [vmem:[#allocation16 + $0x348] ss:$16 sps:$4 sm:$0xff]  }
 0x782   : > { %7034 = vmatprep.subr.bf16.mxu1 %v10799_v43  ;;  %v10883_v43 = vld [vmem:[#allocation16 + $0x36c] ss:$16 sps:$4 sm:$0xff]  }
 0x785   : > { %7035 = vmatpush1.bf16.msra.mxu1 %v10797_v6  ;;  %v10881_v6 = vld [vmem:[#allocation16 + $0x368] ss:$16 sps:$4 sm:$0xff]  }
 0x786   : > { %7512 = vmatprep.subr.bf16.mxu1 %v10802_v1  ;;  %v10886_v1 = vld [vmem:[#allocation16 + $0x38c] ss:$16 sps:$4 sm:$0xff]  }
 0x788   : > { %7037 = vmatmul.mubr.bf16.vlgmr.msra.gmra.mrb[12].mxu1 %v12841_v23  ;;  %v10815_v23 = vld [vmem:[#allocation16 + $0x2a0] ss:$16 sps:$4 sm:$0xff]  }
 0x789   : > { %7513 = vmatpush1.bf16.msra.mxu1 %v10800_v37  ;;  %7544 = vmatprep.mubr.bf16.mxu1 %v12863_v14  ;;  %v10884_v37 = vld [vmem:[#allocation16 + $0x388] ss:$16 sps:$4 sm:$0xff]  }
 0x78a   : > { %7514 = vmatprep.subr.bf16.mxu1 %v10805_v20  ;;  %v10889_v20 = vld [vmem:[#allocation16 + $0x3ac] ss:$16 sps:$4 sm:$0xff]  }
 0x78d   : > { %7515 = vmatpush1.bf16.msra.mxu1 %v10803_v27  ;;  %v10887_v27 = vld [vmem:[#allocation16 + $0x3a8] ss:$16 sps:$4 sm:$0xff]  }
 0x78e   : > { %7516 = vmatprep.subr.bf16.mxu1 %v10808_v7  ;;  %v10892_v7 = vld [vmem:[#allocation16 + $0x3cc] ss:$16 sps:$4 sm:$0xff]  }
 0x791   : > { %7517 = vmatpush1.bf16.msra.mxu1 %v10806_v56  ;;  %v10890_v56 = vld [vmem:[#allocation16 + $0x3c8] ss:$16 sps:$4 sm:$0xff]  }
 0x792   : > { %7518 = vmatprep.subr.bf16.mxu1 %v10811_v17  ;;  %v10895_v17 = vld [vmem:[#allocation16 + $0x3ec] ss:$16 sps:$4 sm:$0xff]  }
 0x795   : > { %7519 = vmatpush1.bf16.msra.mxu1 %v10809_v18  ;;  %v10893_v18 = vld [vmem:[#allocation16 + $0x3e8] ss:$16 sps:$4 sm:$0xff]  }
 0x796   : > { %7520 = vmatprep.subr.bf16.mxu1 %v10814_v21  ;;  %v10898_v21 = vld [vmem:[#allocation17 + $0x204] ss:$16 sps:$4 sm:$0xff]  }
 0x799   : > { %7521 = vmatpush1.bf16.msra.mxu1 %v10812_v53  ;;  %v10896_v53 = vld [vmem:[#allocation17 + $0x200] ss:$16 sps:$4 sm:$0xff]  }
 0x79a   : > { %7522 = vmatprep.subr.bf16.mxu1 %v10817_v61  ;;  %v10901_v61 = vld [vmem:[#allocation17 + $0x224] ss:$16 sps:$4 sm:$0xff]  }
 0x79d   : > { %7523 = vmatpush1.bf16.msra.mxu1 %v10815_v23  ;;  %v10899_v23 = vld [vmem:[#allocation17 + $0x220] ss:$16 sps:$4 sm:$0xff]  }
 0x79e   : > { %7524 = vmatprep.subr.bf16.mxu1 %v10820_v44  ;;  %v10904_v44 = vld [vmem:[#allocation17 + $0x244] ss:$16 sps:$4 sm:$0xff]  }
 0x7a1   : > { %7525 = vmatpush1.bf16.msra.mxu1 %v10818_v55  ;;  %v10902_v55 = vld [vmem:[#allocation17 + $0x240] ss:$16 sps:$4 sm:$0xff]  }
 0x7a2   : > { %7526 = vmatprep.subr.bf16.mxu1 %v10823_v62  ;;  %v10907_v62 = vld [vmem:[#allocation17 + $0x264] ss:$16 sps:$4 sm:$0xff]  }
 0x7a5   : > { %7527 = vmatpush1.bf16.msra.mxu1 %v10821_v5  ;;  %v10905_v5 = vld [vmem:[#allocation17 + $0x260] ss:$16 sps:$4 sm:$0xff]  }
 0x7a6   : > { %7528 = vmatprep.subr.bf16.mxu1 %v10826_v32  ;;  %v10910_v32 = vld [vmem:[#allocation17 + $0x284] ss:$16 sps:$4 sm:$0xff]  }
 0x7a9   : > { %7529 = vmatpush1.bf16.msra.mxu1 %v10824_v42  ;;  %v10908_v42 = vld [vmem:[#allocation17 + $0x280] ss:$16 sps:$4 sm:$0xff]  }
 0x7aa   : > { %7530 = vmatprep.subr.bf16.mxu1 %v10829_v22  ;;  %v10913_v22 = vld [vmem:[#allocation17 + $0x2a4] ss:$16 sps:$4 sm:$0xff]  }
 0x7ad   : > { %7531 = vmatpush1.bf16.msra.mxu1 %v10827_v15  ;;  %v10916_v15 = vld [vmem:[#allocation17 + $0x2c4] ss:$16 sps:$4 sm:$0xff]  }
 0x7ae   : > { %7532 = vmatprep.subr.bf16.mxu1 %v10832_v40  ;;  %v10914_v40 = vld [vmem:[#allocation17 + $0x2c0] ss:$16 sps:$4 sm:$0xff]  }
 0x7b1   : > { %7533 = vmatpush1.bf16.msra.mxu1 %v10830_v48  ;;  %v10919_v48 = vld [vmem:[#allocation17 + $0x2e4] ss:$16 sps:$4 sm:$0xff]  }
 0x7b2   : > { %7534 = vmatprep.subr.bf16.mxu1 %v10835_v50  ;;  %v10917_v50 = vld [vmem:[#allocation17 + $0x2e0] ss:$16 sps:$4 sm:$0xff]  }
 0x7b5   : > { %7535 = vmatpush1.bf16.msra.mxu1 %v10833_v60  ;;  %v10922_v60 = vld [vmem:[#allocation17 + $0x304] ss:$16 sps:$4 sm:$0xff]  }
 0x7b6   : > { %7536 = vmatprep.subr.bf16.mxu1 %v10838_v26  ;;  %v10920_v26 = vld [vmem:[#allocation17 + $0x300] ss:$16 sps:$4 sm:$0xff]  }
 0x7b9   : > { %7537 = vmatpush1.bf16.msra.mxu1 %v10836_v4  ;;  %v10925_v4 = vld [vmem:[#allocation17 + $0x324] ss:$16 sps:$4 sm:$0xff]  }
 0x7ba   : > { %7538 = vmatprep.subr.bf16.mxu1 %v10841_v2  ;;  %v10923_v2 = vld [vmem:[#allocation17 + $0x320] ss:$16 sps:$4 sm:$0xff]  }
 0x7bd   : > { %7539 = vmatpush1.bf16.msra.mxu1 %v10839_v10  ;;  %v10928_v10 = vld [vmem:[#allocation17 + $0x344] ss:$16 sps:$4 sm:$0xff]  }
 0x7be   : > { %7540 = vmatprep.subr.bf16.mxu1 %v10844_v30  ;;  %v10926_v30 = vld [vmem:[#allocation17 + $0x340] ss:$16 sps:$4 sm:$0xff]  }
 0x7c1   : > { %7541 = vmatpush1.bf16.msra.mxu1 %v10842_v35  ;;  %v10931_v35 = vld [vmem:[#allocation17 + $0x364] ss:$16 sps:$4 sm:$0xff]  }
 0x7c2   : > { %7542 = vmatprep.subr.bf16.mxu1 %v10847_v49  ;;  %v10929_v49 = vld [vmem:[#allocation17 + $0x360] ss:$16 sps:$4 sm:$0xff]  }
 0x7c5   : > { %7543 = vmatpush1.bf16.msra.mxu1 %v10845_v28  ;;  %v10934_v28 = vld [vmem:[#allocation17 + $0x384] ss:$16 sps:$4 sm:$0xff]  }
 0x7c6   : > { %7555 = vmatprep.subr.bf16.mxu1 %v10850_v38  ;;  %v10932_v38 = vld [vmem:[#allocation17 + $0x380] ss:$16 sps:$4 sm:$0xff]  }
 0x7c8   : > { %7545 = vmatmul.mubr.bf16.vlgmr.msra.gmra.mrb[8].mxu1 %v12861_v16 }
 0x7c9   : > { %7556 = vmatpush1.bf16.msra.mxu1 %v10848_v59  ;;  %7587 = vmatprep.mubr.bf16.mxu1 %v12863_v14  ;;  %v10866_v14 = vld [vmem:[#allocation16 + $0x2c8] ss:$16 sps:$4 sm:$0xff]   ;;  %v10937_v59 = vld [vmem:[#allocation17 + $0x3a4] ss:$16 sps:$4 sm:$0xff]  }
 0x7ca   : > { %7557 = vmatprep.subr.bf16.mxu1 %v10853_v13  ;;  %v10935_v13 = vld [vmem:[#allocation17 + $0x3a0] ss:$16 sps:$4 sm:$0xff]  }
 0x7cd   : > { %7558 = vmatpush1.bf16.msra.mxu1 %v10851_v29  ;;  %v10940_v29 = vld [vmem:[#allocation17 + $0x3c4] ss:$16 sps:$4 sm:$0xff]  }
 0x7ce   : > { %7559 = vmatprep.subr.bf16.mxu1 %v10856_v63  ;;  %v10938_v63 = vld [vmem:[#allocation17 + $0x3c0] ss:$16 sps:$4 sm:$0xff]  }
 0x7d1   : > { %7560 = vmatpush1.bf16.msra.mxu1 %v10854_v36  ;;  %v10943_v36 = vld [vmem:[#allocation17 + $0x3e4] ss:$16 sps:$4 sm:$0xff]  }
 0x7d2   : > { %7561 = vmatprep.subr.bf16.mxu1 %v10859_v58  ;;  %v10941_v58 = vld [vmem:[#allocation17 + $0x3e0] ss:$16 sps:$4 sm:$0xff]  }
 0x7d5   : > { %7562 = vmatpush1.bf16.msra.mxu1 %v10857_v33  ;;  %v10946_v33 = vld [vmem:[#allocation17 + $0x20c] ss:$16 sps:$4 sm:$0xff]  }
 0x7d6   : > { %7563 = vmatprep.subr.bf16.mxu1 %v10862_v24  ;;  %v10944_v24 = vld [vmem:[#allocation17 + $0x208] ss:$16 sps:$4 sm:$0xff]  }
 0x7d9   : > { %7564 = vmatpush1.bf16.msra.mxu1 %v10860_v51  ;;  %v10949_v51 = vld [vmem:[#allocation17 + $0x22c] ss:$16 sps:$4 sm:$0xff]  }
 0x7da   : > { %7565 = vmatprep.subr.bf16.mxu1 %v10865_v45  ;;  %v10947_v45 = vld [vmem:[#allocation17 + $0x228] ss:$16 sps:$4 sm:$0xff]  }
 0x7dd   : > { %7566 = vmatpush1.bf16.msra.mxu1 %v10863_v11  ;;  %v10952_v11 = vld [vmem:[#allocation17 + $0x24c] ss:$16 sps:$4 sm:$0xff]  }
 0x7de   : > { %7567 = vmatprep.subr.bf16.mxu1 %v10868_v46  ;;  %v10950_v46 = vld [vmem:[#allocation17 + $0x248] ss:$16 sps:$4 sm:$0xff]  }
 0x7e1   : > { %7568 = vmatpush1.bf16.msra.mxu1 %v10866_v14  ;;  %v10955_v14 = vld [vmem:[#allocation17 + $0x26c] ss:$16 sps:$4 sm:$0xff]  }
 0x7e2   : > { %7569 = vmatprep.subr.bf16.mxu1 %v10871_v0  ;;  %v10953_v0 = vld [vmem:[#allocation17 + $0x268] ss:$16 sps:$4 sm:$0xff]  }
 0x7e5   : > { %7570 = vmatpush1.bf16.msra.mxu1 %v10869_v39  ;;  %v10958_v39 = vld [vmem:[#allocation17 + $0x28c] ss:$16 sps:$4 sm:$0xff]  }
 0x7e6   : > { %7571 = vmatprep.subr.bf16.mxu1 %v10874_v52  ;;  %v10956_v52 = vld [vmem:[#allocation17 + $0x288] ss:$16 sps:$4 sm:$0xff]  }
 0x7e9   : > { %7572 = vmatpush1.bf16.msra.mxu1 %v10872_v57  ;;  %v10961_v57 = vld [vmem:[#allocation17 + $0x2ac] ss:$16 sps:$4 sm:$0xff]  }
 0x7ea   : > { %7573 = vmatprep.subr.bf16.mxu1 %v10877_v47  ;;  %v10959_v47 = vld [vmem:[#allocation17 + $0x2a8] ss:$16 sps:$4 sm:$0xff]  }
 0x7ed   : > { %7574 = vmatpush1.bf16.msra.mxu1 %v10875_v25  ;;  %v10964_v25 = vld [vmem:[#allocation17 + $0x2cc] ss:$16 sps:$4 sm:$0xff]  }
 0x7ee   : > { %7575 = vmatprep.subr.bf16.mxu1 %v10880_v12  ;;  %v10967_v12 = vld [vmem:[#allocation17 + $0x2ec] ss:$16 sps:$4 sm:$0xff]  }
 0x7f1   : > { %7576 = vmatpush1.bf16.msra.mxu1 %v10878_v31  ;;  %v10965_v31 = vld [vmem:[#allocation17 + $0x2e8] ss:$16 sps:$4 sm:$0xff]  }
 0x7f2   : > { %7577 = vmatprep.subr.bf16.mxu1 %v10883_v43  ;;  %v10970_v43 = vld [vmem:[#allocation17 + $0x30c] ss:$16 sps:$4 sm:$0xff]  }
 0x7f5   : > { %7578 = vmatpush1.bf16.msra.mxu1 %v10881_v6  ;;  %v10968_v6 = vld [vmem:[#allocation17 + $0x308] ss:$16 sps:$4 sm:$0xff]  }
 0x7f6   : > { %7579 = vmatprep.subr.bf16.mxu1 %v10886_v1  ;;  %v10973_v1 = vld [vmem:[#allocation17 + $0x32c] ss:$16 sps:$4 sm:$0xff]  }
 0x7f9   : > { %7580 = vmatpush1.bf16.msra.mxu1 %v10884_v37  ;;  %v10971_v37 = vld [vmem:[#allocation17 + $0x328] ss:$16 sps:$4 sm:$0xff]  }
 0x7fa   : > { %7581 = vmatprep.subr.bf16.mxu1 %v10889_v20  ;;  %v10976_v20 = vld [vmem:[#allocation17 + $0x34c] ss:$16 sps:$4 sm:$0xff]  }
 0x7fd   : > { %7582 = vmatpush1.bf16.msra.mxu1 %v10887_v27  ;;  %v10974_v27 = vld [vmem:[#allocation17 + $0x348] ss:$16 sps:$4 sm:$0xff]  }
 0x7fe   : > { %7583 = vmatprep.subr.bf16.mxu1 %v10892_v7  ;;  %v10979_v7 = vld [vmem:[#allocation17 + $0x36c] ss:$16 sps:$4 sm:$0xff]  }
 0x801   : > { %7584 = vmatpush1.bf16.msra.mxu1 %v10890_v56  ;;  %v10977_v56 = vld [vmem:[#allocation17 + $0x368] ss:$16 sps:$4 sm:$0xff]  }
 0x802   : > { %7585 = vmatprep.subr.bf16.mxu1 %v10895_v17  ;;  %v10982_v17 = vld [vmem:[#allocation17 + $0x38c] ss:$16 sps:$4 sm:$0xff]  }
 0x805   : > { %7586 = vmatpush1.bf16.msra.mxu1 %v10893_v18  ;;  %v10980_v18 = vld [vmem:[#allocation17 + $0x388] ss:$16 sps:$4 sm:$0xff]  }
 0x806   : > { %7999 = vmatprep.subr.bf16.mxu1 %v10898_v21  ;;  %v10985_v21 = vld [vmem:[#allocation17 + $0x3ac] ss:$16 sps:$4 sm:$0xff]  }
 0x808   : > { %7588 = vmatmul.mubr.bf16.vlgmr.msra.gmra.mrb[12].mxu1 %v12861_v16  ;;  %v10911_v16 = vld [vmem:[#allocation17 + $0x2a0] ss:$16 sps:$4 sm:$0xff]  }
 0x809   : > { %8000 = vmatpush1.bf16.msra.mxu1 %v10896_v53  ;;  %8031 = vmatprep.mubr.bf16.mxu1 %v12871_v19  ;;  %v10983_v53 = vld [vmem:[#allocation17 + $0x3a8] ss:$16 sps:$4 sm:$0xff]  }
 0x80a   : > { %8001 = vmatprep.subr.bf16.mxu1 %v10901_v61  ;;  %v10988_v61 = vld [vmem:[#allocation17 + $0x3cc] ss:$16 sps:$4 sm:$0xff]  }
 0x80d   : > { %8002 = vmatpush1.bf16.msra.mxu1 %v10899_v23  ;;  %v10986_v23 = vld [vmem:[#allocation17 + $0x3c8] ss:$16 sps:$4 sm:$0xff]  }
 0x80e   : > { %8003 = vmatprep.subr.bf16.mxu1 %v10904_v44  ;;  %v10991_v44 = vld [vmem:[#allocation17 + $0x3ec] ss:$16 sps:$4 sm:$0xff]  }
 0x811   : > { %8004 = vmatpush1.bf16.msra.mxu1 %v10902_v55  ;;  %v10989_v55 = vld [vmem:[#allocation17 + $0x3e8] ss:$16 sps:$4 sm:$0xff]  }
 0x812   : > { %8005 = vmatprep.subr.bf16.mxu1 %v10907_v62 }
 0x815   : > { %8006 = vmatpush1.bf16.msra.mxu1 %v10905_v5 }
 0x816   : > { %8007 = vmatprep.subr.bf16.mxu1 %v10910_v32 }
 0x819   : > { %8008 = vmatpush1.bf16.msra.mxu1 %v10908_v42 }
 0x81a   : > { %8009 = vmatprep.subr.bf16.mxu1 %v10913_v22 }
 0x81d   : > { %8010 = vmatpush1.bf16.msra.mxu1 %v10911_v16 }
 0x81e   : > { %8011 = vmatprep.subr.bf16.mxu1 %v10916_v15 }
 0x821   : > { %8012 = vmatpush1.bf16.msra.mxu1 %v10914_v40 }
 0x822   : > { %8013 = vmatprep.subr.bf16.mxu1 %v10919_v48 }
 0x825   : > { %8014 = vmatpush1.bf16.msra.mxu1 %v10917_v50 }
 0x826   : > { %8015 = vmatprep.subr.bf16.mxu1 %v10922_v60 }
 0x829   : > { %8016 = vmatpush1.bf16.msra.mxu1 %v10920_v26 }
 0x82a   : > { %8017 = vmatprep.subr.bf16.mxu1 %v10925_v4 }
 0x82d   : > { %8018 = vmatpush1.bf16.msra.mxu1 %v10923_v2 }
 0x82e   : > { %8019 = vmatprep.subr.bf16.mxu1 %v10928_v10 }
 0x831   : > { %8020 = vmatpush1.bf16.msra.mxu1 %v10926_v30 }
 0x832   : > { %8021 = vmatprep.subr.bf16.mxu1 %v10931_v35 }
 0x835   : > { %8022 = vmatpush1.bf16.msra.mxu1 %v10929_v49 }
 0x836   : > { %8023 = vmatprep.subr.bf16.mxu1 %v10934_v28 }
 0x839   : > { %8024 = vmatpush1.bf16.msra.mxu1 %v10932_v38 }
 0x83a   : > { %8025 = vmatprep.subr.bf16.mxu1 %v10937_v59 }
 0x83d   : > { %8026 = vmatpush1.bf16.msra.mxu1 %v10935_v13 }
 0x83e   : > { %8027 = vmatprep.subr.bf16.mxu1 %v10940_v29 }
 0x841   : > { %8028 = vmatpush1.bf16.msra.mxu1 %v10938_v63 }
 0x842   : > { %8029 = vmatprep.subr.bf16.mxu1 %v10943_v36 }
 0x845   : > { %8030 = vmatpush1.bf16.msra.mxu1 %v10941_v58 }
 0x846   : > { %8042 = vmatprep.subr.bf16.mxu1 %v10946_v33 }
 0x848   : > { %8032 = vmatmul.mubr.bf16.vlgmr.msra.gmra.mrb[8].mxu1 %v12869_v3 }
 0x849   : > { %8043 = vmatpush1.bf16.msra.mxu1 %v10944_v24  ;;  %8074 = vmatprep.mubr.bf16.mxu1 %v12871_v19  ;;  %v10962_v19 = vld [vmem:[#allocation17 + $0x2c8] ss:$16 sps:$4 sm:$0xff]  }
 0x84a   : > { %8044 = vmatprep.subr.bf16.mxu1 %v10949_v51 }
 0x84d   : > { %8045 = vmatpush1.bf16.msra.mxu1 %v10947_v45 }
 0x84e   : > { %8046 = vmatprep.subr.bf16.mxu1 %v10952_v11 }
 0x851   : > { %8047 = vmatpush1.bf16.msra.mxu1 %v10950_v46 }
 0x852   : > { %8048 = vmatprep.subr.bf16.mxu1 %v10955_v14 }
 0x855   : > { %8049 = vmatpush1.bf16.msra.mxu1 %v10953_v0 }
 0x856   : > { %8050 = vmatprep.subr.bf16.mxu1 %v10958_v39 }
 0x859   : > { %8051 = vmatpush1.bf16.msra.mxu1 %v10956_v52 }
 0x85a   : > { %8052 = vmatprep.subr.bf16.mxu1 %v10961_v57 }
 0x85d   : > { %8053 = vmatpush1.bf16.msra.mxu1 %v10959_v47 }
 0x85e   : > { %8054 = vmatprep.subr.bf16.mxu1 %v10964_v25 }
 0x861   : > { %8055 = vmatpush1.bf16.msra.mxu1 %v10962_v19 }
 0x862   : > { %8056 = vmatprep.subr.bf16.mxu1 %v10967_v12 }
 0x865   : > { %8057 = vmatpush1.bf16.msra.mxu1 %v10965_v31 }
 0x866   : > { %8058 = vmatprep.subr.bf16.mxu1 %v10970_v43 }
 0x869   : > { %8059 = vmatpush1.bf16.msra.mxu1 %v10968_v6 }
 0x86a   : > { %8060 = vmatprep.subr.bf16.mxu1 %v10973_v1 }
 0x86d   : > { %8061 = vmatpush1.bf16.msra.mxu1 %v10971_v37 }
 0x86e   : > { %8062 = vmatprep.subr.bf16.mxu1 %v10976_v20 }
 0x871   : > { %8063 = vmatpush1.bf16.msra.mxu1 %v10974_v27 }
 0x872   : > { %8064 = vmatprep.subr.bf16.mxu1 %v10979_v7 }
 0x875   : > { %8065 = vmatpush1.bf16.msra.mxu1 %v10977_v56 }
 0x876   : > { %8066 = vmatprep.subr.bf16.mxu1 %v10982_v17 }
 0x879   : > { %8067 = vmatpush1.bf16.msra.mxu1 %v10980_v18 }
 0x87a   : > { %8068 = vmatprep.subr.bf16.mxu1 %v10985_v21 }
 0x87d   : > { %8069 = vmatpush1.bf16.msra.mxu1 %v10983_v53 }
 0x87e   : > { %8070 = vmatprep.subr.bf16.mxu1 %v10988_v61 }
 0x881   : > { %8071 = vmatpush1.bf16.msra.mxu1 %v10986_v23 }
 0x882   : > { %8072 = vmatprep.subr.bf16.mxu1 %v10991_v44 }
 0x885   : > { %8073 = vmatpush1.bf16.msra.mxu1 %v10989_v55 }
 0x888   : > { %8075 = vmatmul.mubr.bf16.vlgmr.msra.gmra.mrb[12].mxu1 %v12869_v3 }
 0x889   : > { %11529 = shalt.err (!%p11526_p12)
}
 0x88a   : > { %s11530_s7 = scalar_lea.hbm %s12892_s17, 512  ;;  %s11534_s9 = scalar_lea.hbm %s13082_s21, 1024 }
 0x88b   : > { %p11531_p6 = scmp.ne.s32.totalorder %s12892_s17, %s11530_s7  ;;  %p11535_p9 = scmp.lt.u32.totalorder %s12892_s17, %s13082_s21 }
 0x88c   : > { %p11536_p0 = scmp.lt.u32.totalorder %s11534_s9, %s11530_s7  ;;  %p11538_p5 = scmp.lt.u32.totalorder %s11530_s7, %s12892_s17 }
 0x88d   : > { %p11532_p13 = pnand %p11531_p6, %p13083_p8 }
 0x88e   : > { %p11537_p2 = por %p11536_p0, %p11535_p9 }
 0x88f   : > { %p11533_p7 = pneg %p11532_p13 }
 0x890   : > { %p11539_p4 = por %p11538_p5, %p11537_p2 }
 0x892   : > { %p11540_p3 = pnand %p11539_p4, %p11533_p7 }
 0x894   : > { %11543 = shalt.err (!%p11540_p3)
}
 0x895   : > { %s11661_s13 = smov 256   ;;  %s11662_s8 = smov 16   ;;  %v11172_v6 = vld [vmem:[%s12165_s2] sm:$0xff]  ;;  %v11174_v27 = vld [vmem:[%s12165_s2 + $0x10] sm:$0xff]  ;;  %v11175_v56 = vld [vmem:[%s12165_s2 + $0x18] sm:$0xff] }
 0x896   : > { %9625 = dma.vmem_to_hbm [thread:$0]  (%p13083_p8), %s12895_s23, 512, %s12892_s17, %s8160_s28, %s11661_s13, %s11661_s13, %s11662_s8  }
 0x897   : > { %s13084_s10 = sld [smem:[#allocation47_spill]]  ;;  %s764_s17 = scalar_lea.vmem [#allocation23], %s12153_s16 }
 0x898   : > { %s8196_s23 = sshll.u32 %s764_s17, 4  ;;  %s13085_s9 = sld [smem:[#allocation49_spill]]  ;;  %s12945_s23 = int_to_ptr.vmem [resolvable:$true] %s8196_s23 }
 0x899   : > { %s8165_s16 = scalar_lea.sflag [#allocation24], %s12150_s29  ;;  %s11544_s22 = scalar_lea.vmem %s12945_s23, 512 }
 0x89a   : > { %p11545_p10 = scmp.ne.s32.totalorder %s12945_s23, %s11544_s22 }
 0x89c   : > { %p11546_p1 = pnand %p11545_p10, %p13083_p8 }
 0x89d   : > { %v8093_v42 = vld [vmem:[%s13084_s10] sm:$0xf] }
 0x89e   : > { %v8106_v22 = vrot.slane %v8093_v42, %v4137_v8  ;;  %v8110_v16 = vrot.slane %v8093_v42, %v4141_v9  ;;  %v8098_v46 = vrot.slane %v8093_v42, %v12321_v41  ;;  %v8102_v14 = vrot.slane %v8093_v42, %v12327_v54  ;;  %v11173_v41 = vld [vmem:[%s12165_s2 + $0x8] sm:$0xff]  ;;  %s12943_s5 = scalar_lea.hbm %s13085_s9, %s9494_s30  ;;  %p11547_p11 = pneg %p11546_p1 }
 0x89f   : > { %s11663_s2 = smov [#allocation23]  }
 0x8a0   : > { %s11548_s0 = sshll.u32 %s11663_s2, 4  ;;  %s11549_s0 = int_to_ptr.vmem [resolvable:$false] %s11548_s0 }
 0x8a1   : > { %s11550_s1 = scalar_lea.vmem %s11549_s0, 1024  ;;  %p11551_p12 = scmp.lt.s32.totalorder %s12945_s23, %s11549_s0 }
 0x8a2   : > { %p11552_p6 = scmp.lt.s32.totalorder %s11550_s1, %s11544_s22 }
 0x8a4   : > { %p11553_p13 = por %p11552_p6, %p11551_p12 }
 0x8a6   : > { %p11554_p7 = pnand %p11553_p13, %p11547_p11 }
 0x91b   : > { %v8033_v3 = vpop.f32.mrb[8].mxu1 }
 0x91c   : > { %v8035_v62 = vpop.f32.mrb[9].mxu1  ;;  %v8115_v0 = vadd.f32 %v8098_v46, %v8033_v3 }
 0x91d   : > { %v8037_v5 = vpop.f32.mrb[10].mxu1  ;;  %v8116_v52 = vadd.f32 %v8102_v14, %v8035_v62 }
 0x91e   : > { %v8039_v32 = vpop.f32.mrb[11].mxu1  ;;  %v8119_v47 = vadd.f32 %v8098_v46, %v8037_v5 }
 0x91f   : > { %v8120_v12 = vadd.f32 %v8102_v14, %v8039_v32 }
 0x95b   : > { %v8076_v15 = vpop.f32.mrb[12].mxu1 }
 0x95c   : > { %v8117_v40 = vadd.f32 %v8106_v22, %v8076_v15  ;;  %v8078_v48 = vpop.f32.mrb[13].mxu1 }
 0x95d   : > { %v8118_v50 = vadd.f32 %v8110_v16, %v8078_v48  ;;  %v8080_v60 = vpop.f32.mrb[14].mxu1 }
 0x95e   : > { %v8123_v26 = vmax.f32 %v8117_v40, -30.0  ;;  %v8121_v4 = vadd.f32 %v8106_v22, %v8080_v60  ;;  %v8082_v2 = vpop.f32.mrb[15].mxu1 }
 0x95f   : > { %v8124_v10 = vmax.f32 %v8118_v50, -30.0  ;;  %v8122_v30 = vadd.f32 %v8110_v16, %v8082_v2 }
 0x960   : > { %v8127_v35 = vsub.f32 0.0, %v8123_v26  ;;  %v8125_v49 = vmax.f32 %v8121_v4, -30.0 }
 0x961   : > { %v8128_v28 = vsub.f32 0.0, %v8124_v10  ;;  %v8126_v38 = vmax.f32 %v8122_v30, -30.0 }
 0x962   : > { %v8131_v59 = vmul.f32 1.442695, %v8127_v35  ;;  %v8129_v13 = vsub.f32 0.0, %v8125_v49 }
 0x963   : > { %v8133_v8 = vmul.f32 1.442695, %v8128_v28  ;;  %v8130_v29 = vsub.f32 0.0, %v8126_v38 }
 0x964   : > { %11152 = vpow2.f32 %v8131_v59  ;;  %v8135_v34 = vmul.f32 1.442695, %v8129_v13 }
 0x965   : > { %11154 = vpow2.f32 %v8133_v8  ;;  %v8137_v9 = vmul.f32 1.442695, %v8130_v29 }
 0x966   : > { %11156 = vpow2.f32 %v8135_v34 }
 0x967   : > { %11158 = vpow2.f32 %v8137_v9 }
 0x96e   : > { %v11153_v63 = vpop.eup %11152 }
 0x96f   : > { %v11155_v36 = vpop.eup %11154  ;;  %v8139_v58 = vadd.f32 1.0, %v11153_v63 }
 0x970   : > { %v11157_v33 = vpop.eup %11156  ;;  %v8140_v24 = vadd.f32 1.0, %v11155_v36 }
 0x971   : > { %v11159_v51 = vpop.eup %11158  ;;  %11160 = vrcp.f32 %v8139_v58  ;;  %v8141_v45 = vadd.f32 1.0, %v11157_v33 }
 0x972   : > { %11162 = vrcp.f32 %v8140_v24  ;;  %v8142_v11 = vadd.f32 1.0, %v11159_v51 }
 0x973   : > { %11164 = vrcp.f32 %v8141_v45 }
 0x974   : > { %11166 = vrcp.f32 %v8142_v11 }
 0x97b   : > { %v11161_v39 = vpop.eup %11160 }
 0x97c   : > { %v11163_v57 = vpop.eup %11162  ;;  %v8147_v25 = vmul.f32 %v11161_v39, %v8115_v0 }
 0x97d   : > { %v11165_v19 = vpop.eup %11164  ;;  %v8148_v31 = vmul.f32 %v11163_v57, %v8116_v52 }
 0x97e   : > { %v11167_v43 = vpop.eup %11166  ;;  %v8151_v1 = vadd.f32 %v11172_v6, %v8147_v25  ;;  %v8149_v37 = vmul.f32 %v11165_v19, %v8119_v47 }
 0x97f   : > { %v8152_v54 = vadd.f32 %v11173_v41, %v8148_v31  ;;  %v8150_v20 = vmul.f32 %v11167_v43, %v8120_v12 }
 0x980   : > { %8155 = vst [vmem:[%s764_s17] sm:$0xff] %v8151_v1  ;;  %v8153_v7 = vadd.f32 %v11174_v27, %v8149_v37 }
 0x981   : > { %8156 = vst [vmem:[%s764_s17 + $0x8] sm:$0xff] %v8152_v54  ;;  %v8154_v17 = vadd.f32 %v11175_v56, %v8150_v20 }
 0x982   : > { %8157 = vst [vmem:[%s764_s17 + $0x10] sm:$0xff] %v8153_v7 }
 0x983   : > { %8158 = vst [vmem:[%s764_s17 + $0x18] sm:$0xff] %v8154_v17 }
 0x984   : > { %11557 = shalt.err (!%p11554_p7)
}
 0x985   : > { %s11558_s30 = scalar_lea.hbm %s12943_s5, 512  ;;  %s11562_s17 = scalar_lea.hbm %s13085_s9, 1024 }
 0x986   : > { %p11559_p9 = scmp.ne.s32.totalorder %s12943_s5, %s11558_s30  ;;  %p11563_p5 = scmp.lt.u32.totalorder %s12943_s5, %s13085_s9 }
 0x987   : > { %p11564_p4 = scmp.lt.u32.totalorder %s11562_s17, %s11558_s30  ;;  %p11566_p10 = scmp.lt.u32.totalorder %s11558_s30, %s12943_s5 }
 0x988   : > { %p11560_p0 = pnand %p11559_p9, %p13083_p8 }
 0x989   : > { %p11565_p3 = por %p11564_p4, %p11563_p5 }
 0x98a   : > { %p11561_p2 = pneg %p11560_p0 }
 0x98b   : > { %p11567_p1 = por %p11566_p10, %p11565_p3 }
 0x98d   : > { %p11568_p11 = pnand %p11567_p1, %p11561_p2 }
 0x98f   : > { %11571 = shalt.err (!%p11568_p11)
}
 0x990   : > { %9626 = dma.vmem_to_hbm [thread:$0]  (%p13083_p8), %s12945_s23, 512, %s12943_s5, %s8165_s16, %s11661_s13, %s11661_s13, %s11662_s8  }
 0x991 PF: > { %s8211_s22 = sand.u32 1, %s11630_s24   ;;  %p13086_p12 = scmp.ne.s32.totalorder %s13057_s20, 0 }
 0x992   : > { %p13087_p6 = scmp.ge.s32.totalorder %s11642_s27, 2  ;;  %s8212_s2 = scalar_lea.sflag [#allocation4], %s8211_s22 }
 0x994   : > { %p9668_p13 = pnand %p13087_p6, %p13086_p12 }
 0x996   : > { %11621 = dma.done.wait (!%p9668_p13), %s8212_s2, 512  }
 0x997   : > { %11623 = vsyncadd (!%p9668_p13), %s8212_s2, 4294966784  ;;  %s8221_s6 = scalar_lea.sflag [#allocation24], %s8211_s22 }
 0x998   : > { %11625 = dma.done.wait (!%p9668_p13), %s8221_s6, 512  }
 0x999   : > { %11627 = vsyncadd (!%p9668_p13), %s8221_s6, 4294966784  ;;  %p42_p8 = scmp.ge.s32.totalorder %s12028_s18, 4   ;;  %s13088_s24 = smov %s11634_s25 }
 0x99a   : > { %s13089_s25 = smov %s11638_s26  ;;  %s13090_s26 = smov %s12039_s3 }
 0x99b   : > { %s13091_s27 = smov %s12028_s18  ;;  %44 = sbr.rel (!%p42_p8) target bundleno = 29 (0x1d), region = 207 }
 0x9a2   :  { %8226 = vsyncpa [#allocation3], 1 }
 0x9a3   :  { %8228 = vsyncpa [#allocation3 + $0x1], 1 }
 0x9a4   :  { %8229 = vsyncpa [#allocation6], 1 }
 0x9a5   :  { %8231 = vsyncpa [#allocation6 + $0x1], 1 }
 0x9a6   :  { %8232 = vsyncpa [#allocation9], 1 }
 0x9a7   :  { %8233 = vsyncpa [#allocation12], 1 }
 0x9a8   :  { %8234 = vsyncpa [#allocation15], 1 }
 0x9a9   :  { %8235 = vsyncpa [#allocation18], 1 }
 0x9aa   :  { %8236 = vsyncpa [#allocation21], 1 }
 0x9ab   :  { %8237 = vsyncpa [#allocation4], 1 }
 0x9ac   :  { %8239 = vsyncpa [#allocation4 + $0x1], 1 }
 0x9ad   :  { %8240 = vsyncpa [#allocation24], 1 }
 0x9ae   :  { %8242 = vsyncpa [#allocation24 + $0x1], 1 }

</bundles_post_ra>
